<compile_context>
chip_gen: v7x
topology: tpu7x:2x2x1
jax: 0.10.0
libtpu: 0.0.40
codegen_flags: <defaults>
</compile_context>

<pallas_src>
import jax
import jax.numpy as jnp
import numpy as np
from jax import lax
from jax.experimental import pallas as pl
from jax.experimental.pallas import tpu as pltpu


def _rup8(n):
    return ((n + 7) // 8) * 8


# --------------------------------------------------------------------------
# Parameter packing: one contiguous (rows, 128) slab + static row offsets.
# Done ONCE outside the per-call path (weights are call-invariant).
# --------------------------------------------------------------------------
def pack_gnn_params(params, dtype=jnp.float32):
    (wl1, bl1, wr1, br1, we1, att1, bo1,
     wl2, bl2, wr2, br2, we2, att2, bo2,
     w0, b0, w1a, w1b, b1, w2, b2) = [jnp.asarray(p, jnp.float32) for p in params]

    LANES = 128
    blocks, offs, row = [], {}, 0

    def put(name, a):
        nonlocal row
        r, c = a.shape
        blk = jnp.zeros((_rup8(r), LANES), jnp.float32).at[:r, :c].set(a)
        offs[name] = row
        blocks.append(blk)
        row += blk.shape[0]

    put("w_lr1", jnp.concatenate([wl1, wr1], axis=1))     # (node_f, 128) fused lin_l|lin_r
    put("b_lr1", jnp.concatenate([bl1, br1], axis=1))     # (1, 128)
    put("w_lr2", jnp.concatenate([wl2, wr2], axis=1))     # (64, 128)
    put("b_lr2", jnp.concatenate([bl2, br2], axis=1))     # (1, 128)
    put("we12", jnp.concatenate([we1, we2], axis=1))      # (edge_f, 128) fused layer1|layer2
    put("att12", jnp.concatenate([att1.T, att2.T], axis=1))  # (1, 128)
    put("bo12", jnp.concatenate([bo1, bo2], axis=1))      # (1, 128)
    put("w0", w0)                                         # (2, 2)
    put("b0", b0)                                         # (1, 2)
    put("w1a", w1a)                                       # (64, 32)  fc1 rows for h
    put("w1b", w1b)                                       # (2, 32)   fc1 rows for y
    put("b1", b1)                                         # (1, 32)
    put("w2", w2)                                         # (32, act) -> zero-padded to 128 lanes
    put("b2", b2)                                         # (1, act)  -> zero-padded to 128 lanes

    # dtype=jnp.bfloat16 halves the (only) non-trivial DMA on v5e; f32 default.
    slab = jnp.concatenate(blocks, axis=0).astype(dtype)  # (248, 128)
    dims = dict(node_f=wl1.shape[0], edge_f=we1.shape[0],
                hid=wl1.shape[1], act=w2.shape[1])
    return slab, offs, dims


# --------------------------------------------------------------------------
# Kernel factory (all dims / offsets are static Python ints at trace time).
# --------------------------------------------------------------------------
def _build_kernel(n, e0, node_f, edge_f, hid, ry, offs):
    e = e0 + n                       # edges incl. one self-loop per node
    factor = n // ry                 # repeat_interleave factor
    f32 = jnp.float32

    def kernel(ei_ref, idx_ref, p_ref, x_ref, ea_ref, y_ref, o_ref):
        # ------------- params: static slices of the single weight slab ------
        def p(name, r, c0, c1):
            o = offs[name]
            return p_ref[o:o + r, c0:c1]

        w_lr1 = p("w_lr1", node_f, 0, 2 * hid)
        b_lr1 = p("b_lr1", 1, 0, 2 * hid)
        w_lr2 = p("w_lr2", hid, 0, 2 * hid)
        b_lr2 = p("b_lr2", 1, 0, 2 * hid)
        we12 = p("we12", edge_f, 0, 2 * hid)
        att1 = p("att12", 1, 0, hid)
        att2 = p("att12", 1, hid, 2 * hid)
        bo1 = p("bo12", 1, 0, hid)
        bo2 = p("bo12", 1, hid, 2 * hid)
        w0 = p("w0", 2, 0, 2)
        b0 = p("b0", 1, 0, 2)
        w1a = p("w1a", hid, 0, 32)
        w1b = p("w1b", 2, 0, 32)
        b1 = p("b1", 1, 0, 32)
        w2p = p("w2", 32, 0, 128)
        b2p = p("b2", 1, 0, 128)

        x = x_ref[...]                      # (n, node_f)
        ea = ea_ref[...]                    # (e0, edge_f)
        y2 = y_ref[...]                     # (ry, 2)

        # ------- gather/scatter one-hots from int32 SMEM ids + iota ---------
        epos_en = lax.broadcasted_iota(jnp.int32, (e, n), 0)     # edge id per row
        npos_en = lax.broadcasted_iota(jnp.int32, (e, n), 1)     # node id per lane
        epos_ne = lax.broadcasted_iota(jnp.int32, (n, e), 1)
        npos_ne = lax.broadcasted_iota(jnp.int32, (n, e), 0)

        # self-loop rows (>= e0) default to their own node id; real rows filled
        # from SMEM scalars (unrolled, e0 is a small static int).
        src_en = epos_en - e0
        dst_en = epos_en - e0
        dst_ne = epos_ne - e0
        for j in range(e0):
            sj = ei_ref[j]                   # src[j] (int32 scalar from SMEM)
            dj = ei_ref[e0 + j]              # dst[j]
            row_j = epos_en == j
            src_en = jnp.where(row_j, sj, src_en)
            dst_en = jnp.where(row_j, dj, dst_en)
            dst_ne = jnp.where(epos_ne == j, dj, dst_ne)

        S = (src_en == npos_en).astype(f32)        # (e, n)  src one-hot
        D = (dst_en == npos_en).astype(f32)        # (e, n)  dst one-hot
        D_T = (dst_ne == npos_ne).astype(f32)      # (n, e)  dst one-hot (transposed)
        L = (epos_en - e0 == npos_en).astype(f32)  # (e, n)  self-loop rows only

        # -------- self-loop edge_attr = per-dst mean (PyG fill='mean'),
        #          projected ONCE for both layers with fused [we1|we2] --------
        d_real_t = D_T[:, 0:e0]                                          # (n, e0)
        cnt = jnp.sum(d_real_t, axis=1, keepdims=True)                   # (n, 1) in-degree
        loop_attr = (jnp.dot(d_real_t, ea, preferred_element_type=f32)
                     / jnp.maximum(cnt, 1.0))                            # (n, edge_f)
        el_real = jnp.dot(ea, we12, preferred_element_type=f32)          # (e0, 2H)
        el_loop = jnp.dot(loop_attr, we12, preferred_element_type=f32)   # (n, 2H)
        R = (lax.broadcasted_iota(jnp.int32, (e, e0), 0)
             == lax.broadcasted_iota(jnp.int32, (e, e0), 1)).astype(f32)  # (e, e0)
        el12 = (jnp.dot(R, el_real, preferred_element_type=f32)
                + jnp.dot(L, el_loop, preferred_element_type=f32))        # (e, 2H)

        # ------------------------------ GATv2 -------------------------------
        def gat(h, w_lr, b_lr, el, att_row, bo):
            xlr = jnp.dot(h, w_lr, preferred_element_type=f32) + b_lr     # (n, 2H)
            xl, xr = xlr[:, 0:hid], xlr[:, hid:2 * hid]
            xl_src = jnp.dot(S, xl, preferred_element_type=f32)           # (e, H)
            xr_dst = jnp.dot(D, xr, preferred_element_type=f32)           # (e, H)
            m = xl_src + xr_dst + el
            m = jnp.where(m > 0, m, 0.2 * m)                              # leaky_relu(0.2)
            logit = jnp.sum(m * att_row, axis=1, keepdims=True)           # (e, 1)
            logit = logit - jnp.max(logit, axis=0, keepdims=True)         # stability shift
            pnum = jnp.exp(logit)                                         # (e, 1)
            gsum = jnp.sum(D * pnum, axis=0, keepdims=True)               # (1, n) per-dst sum
            esum = jnp.sum(D * gsum, axis=1, keepdims=True)               # (e, 1) gathered back
            alpha = pnum / esum                                           # exact softmax
            out = jnp.dot(D_T, alpha * xl_src,
                          preferred_element_type=f32)                     # (n, H) scatter-add
            return out + bo

        h = jnp.maximum(gat(x, w_lr1, b_lr1, el12[:, 0:hid], att1, bo1), 0.0)
        h = jnp.maximum(gat(h, w_lr2, b_lr2, el12[:, hid:2 * hid], att2, bo2), 0.0)

        # ------------------------------ MLP head -----------------------------
        y0 = jnp.maximum(jnp.dot(y2, w0, preferred_element_type=f32) + b0, 0.0)  # (ry, 2)
        ri = lax.broadcasted_iota(jnp.int32, (n, ry), 0)
        ci = lax.broadcasted_iota(jnp.int32, (n, ry), 1)
        diff = ri - ci * factor
        rep = jnp.logical_and(diff >= 0, diff < factor).astype(f32)       # (n, ry)
        yr = jnp.dot(rep, y0, preferred_element_type=f32)                 # (n, 2) repeat_interleave
        z = jnp.maximum(jnp.dot(h, w1a, preferred_element_type=f32)
                        + jnp.dot(yr, w1b, preferred_element_type=f32) + b1, 0.0)
        final = jnp.dot(z, w2p, preferred_element_type=f32) + b2p         # (n, 128) lane-dense

        # -------- in-kernel node_idx selection: row 0 of the output ----------
        idx = idx_ref[0]
        sel = jnp.logical_and(
            lax.broadcasted_iota(jnp.int32, (8, n), 1) == idx,
            lax.broadcasted_iota(jnp.int32, (8, n), 0) == 0).astype(f32)   # (8, n)
        o_ref[...] = jnp.dot(sel, final, preferred_element_type=f32)       # (8, 128)

    return kernel


# --------------------------------------------------------------------------
# Forward wrapper: no per-call slab assembly; raw inputs + scalar prefetch.
# --------------------------------------------------------------------------
def gnn_forward(x, edge_index, edge_attr, y, node_idx, packed):
    pslab, offs, dims = packed
    node_f, edge_f, hid, act = dims["node_f"], dims["edge_f"], dims["hid"], dims["act"]
    n = x.shape[0]
    e0 = edge_index.shape[1]
    y2 = jnp.asarray(y, jnp.float32).reshape(-1, 2)
    ry = y2.shape[0]
    assert n % ry == 0, "repeat_interleave requires N to be a multiple of y rows"

    ei_flat = jnp.asarray(edge_index, jnp.int32).reshape(-1)    # [src..., dst...] -> SMEM
    idx_arr = jnp.asarray(node_idx, jnp.int32).reshape(1)       # node_idx -> SMEM

    kernel = _build_kernel(n, e0, node_f, edge_f, hid, ry, offs)

    grid_spec = pltpu.PrefetchScalarGridSpec(
        num_scalar_prefetch=2,
        grid=(1,),
        in_specs=[
            pl.BlockSpec(pslab.shape, lambda i, ei, idx: (0, 0)),      # weight slab (1 DMA)
            pl.BlockSpec((n, node_f), lambda i, ei, idx: (0, 0)),      # x (raw, full block)
            pl.BlockSpec((e0, edge_f), lambda i, ei, idx: (0, 0)),     # edge_attr (raw)
            pl.BlockSpec((ry, 2), lambda i, ei, idx: (0, 0)),          # y2 (raw)
        ],
        out_specs=pl.BlockSpec((8, 128), lambda i, ei, idx: (0, 0)),
    )
    out = pl.pallas_call(
        kernel,
        out_shape=jax.ShapeDtypeStruct((8, 128), jnp.float32),
        grid_spec=grid_spec,
        # TODO(synk): for batched inference add a leading "parallel" grid axis
        # over graphs so v7x's second TensorCore is used; single graph here.
        compiler_params=pltpu.CompilerParams(dimension_semantics=("arbitrary",)),
    )(ei_flat, idx_arr, pslab,
      jnp.asarray(x, jnp.float32), jnp.asarray(edge_attr, jnp.float32), y2)
    # TODO(synk): PyG's remove_self_loops pre-step is skipped (test graph has none).
    return out[0, :act]


# --------------------------------------------------------------------------
# Pure-JAX reference (segment ops) for cross-checking the kernel.
# --------------------------------------------------------------------------
def _gat_ref(h, src, dst, ea, wl, bl, wr, br, we, att, bo, N):
    xl = h @ wl + bl
    xr = h @ wr + br
    el = ea @ we
    m = xl[src] + xr[dst] + el
    m = jnp.where(m > 0, m, 0.2 * m)
    logit = (m @ att)[:, 0]
    gmax = jax.ops.segment_max(logit, dst, num_segments=N)
    anum = jnp.exp(logit - gmax[dst])
    gsum = jax.ops.segment_sum(anum, dst, num_segments=N)
    alpha = anum / gsum[dst]
    return jax.ops.segment_sum(alpha[:, None] * xl[src], dst, num_segments=N) + bo


def gnn_ref(x, edge_index, edge_attr, y, node_idx, p):
    (wl1, bl1, wr1, br1, we1, att1, bo1,
     wl2, bl2, wr2, br2, we2, att2, bo2,
     w0, b0, w1a, w1b, b1, w2, b2) = p
    N = x.shape[0]
    src, dst = edge_index[0], edge_index[1]
    loop_sum = jax.ops.segment_sum(edge_attr, dst, num_segments=N)
    loop_cnt = jax.ops.segment_sum(jnp.ones((src.shape[0],), jnp.float32), dst,
                                   num_segments=N)
    loop_attr = loop_sum / jnp.maximum(loop_cnt, 1.0)[:, None]
    ar = jnp.arange(N, dtype=src.dtype)
    src_f = jnp.concatenate([src, ar])
    dst_f = jnp.concatenate([dst, ar])
    ea_f = jnp.concatenate([edge_attr, loop_attr], axis=0)
    h = jnp.maximum(_gat_ref(x, src_f, dst_f, ea_f, wl1, bl1, wr1, br1, we1, att1, bo1, N), 0.0)
    h = jnp.maximum(_gat_ref(h, src_f, dst_f, ea_f, wl2, bl2, wr2, br2, we2, att2, bo2, N), 0.0)
    y2 = y.reshape(-1, 2)
    yr = jnp.repeat(y2, N // y2.shape[0], axis=0)
    yr = jnp.maximum(yr @ w0 + b0, 0.0)
    z = jnp.maximum(h @ w1a + yr @ w1b + b1, 0.0)
    return (z @ w2 + b2)[node_idx]


# --------------------------------------------------------------------------
if __name__ == "__main__":
    # Full-precision reference matmuls so the f32 kernel can be checked tightly.
    jax.config.update("jax_default_matmul_precision", "highest")

    NODE_F, EDGE_F, ACT = 6, 3, 5     # node_feat_dim, edge_feat_dim, action_space_dim
    N, HID = 8, 64                    # 8 nodes, GATv2 hidden width 64

    key = jax.random.PRNGKey(0)
    keys = iter(jax.random.split(key, 32))

    def nrm(shape, scale=0.1):
        return scale * jax.random.normal(next(keys), shape, dtype=jnp.float32)

    # Deterministic synthetic parameters (shapes match the nn module __init__).
    params = [
        # conv1: lin_l(W,b), lin_r(W,b), lin_edge(W), att, out-bias
        nrm((NODE_F, HID)), nrm((1, HID)), nrm((NODE_F, HID)), nrm((1, HID)),
        nrm((EDGE_F, HID)), nrm((HID, 1)), nrm((1, HID)),
        # conv2
        nrm((HID, HID)), nrm((1, HID)), nrm((HID, HID)), nrm((1, HID)),
        nrm((EDGE_F, HID)), nrm((HID, 1)), nrm((1, HID)),
        # fc0: Linear(2, 2)
        nrm((2, 2)), nrm((1, 2)),
        # fc1: Linear(66, 32) split into [64->32] and [2->32]
        nrm((HID, 32)), nrm((2, 32)), nrm((1, 32)),
        # fc2: Linear(32, ACT)
        nrm((32, ACT)), nrm((1, ACT)),
    ]

    x = nrm((N, NODE_F), 1.0)                                   # data.x
    src = jnp.array([0, 1, 2, 3, 4, 5, 6, 7, 0, 2, 4, 6], dtype=jnp.int32)
    dst = jnp.array([1, 2, 3, 4, 5, 6, 7, 0, 3, 5, 7, 1], dtype=jnp.int32)
    edge_index = jnp.stack([src, dst])                          # data.edge_index (2, 12)
    edge_attr = nrm((src.shape[0], EDGE_F), 1.0)                # data.edge_attr
    y = nrm((2, 2), 1.0)       # data.y -> reshape(-1,2) gives 2 rows; repeat_factor = 4
    node_idx = 3

    packed = pack_gnn_params(params)      # one-time packing into a single slab
    out = gnn_forward(x, edge_index, edge_attr, y, node_idx, packed)
    out = jax.block_until_ready(out)

    ref = gnn_ref(x, edge_index, edge_attr, y, node_idx, params)
    assert out.shape == (ACT,)
    np.testing.assert_allclose(np.asarray(out), np.asarray(ref), rtol=5e-4, atol=5e-5)
    print("KERNEL_OK")
</pallas_src>

<mosaic_0001>
module attributes {stable_mosaic.version = 11 : i64} {
  func.func @kernel(%arg0: i32, %arg1: memref<24xi32, #tpu.memory_space<smem>>, %arg2: memref<1xi32, #tpu.memory_space<smem>>, %arg3: memref<248x128xf32, #tpu.memory_space<vmem>>, %arg4: memref<8x6xf32, #tpu.memory_space<vmem>>, %arg5: memref<12x3xf32, #tpu.memory_space<vmem>>, %arg6: memref<2x2xf32, #tpu.memory_space<vmem>>, %arg7: memref<8x128xf32, #tpu.memory_space<vmem>>) attributes {dimension_semantics = [#tpu.dimension_semantics<arbitrary>], iteration_bounds = array<i64: 1>, scalar_prefetch = 2 : i64, scratch_operands = 0 : i64, tpu.core_type = #tpu.core_type<tc>, window_params = [{pipeline_mode = #tpu.pipeline_mode<synchronous>, transform_indices = @transform_0, window_bounds = array<i64: 248, 128>}, {pipeline_mode = #tpu.pipeline_mode<synchronous>, transform_indices = @transform_1, window_bounds = array<i64: 8, 6>}, {pipeline_mode = #tpu.pipeline_mode<synchronous>, transform_indices = @transform_2, window_bounds = array<i64: 12, 3>}, {pipeline_mode = #tpu.pipeline_mode<synchronous>, transform_indices = @transform_3, window_bounds = array<i64: 2, 2>}, {pipeline_mode = #tpu.pipeline_mode<synchronous>, transform_indices = @transform_4, window_bounds = array<i64: 8, 128>}]} {
    %c0 = arith.constant 0 : index
    %c0_0 = arith.constant 0 : index
    %0 = vector.load %arg3[%c0, %c0_0] : memref<248x128xf32, #tpu.memory_space<vmem>>, vector<6x128xf32>
    %c8 = arith.constant 8 : index
    %c0_1 = arith.constant 0 : index
    %1 = vector.load %arg3[%c8, %c0_1] : memref<248x128xf32, #tpu.memory_space<vmem>>, vector<1x128xf32>
    %c16 = arith.constant 16 : index
    %c0_2 = arith.constant 0 : index
    %2 = vector.load %arg3[%c16, %c0_2] : memref<248x128xf32, #tpu.memory_space<vmem>>, vector<64x128xf32>
    %c80 = arith.constant 80 : index
    %c0_3 = arith.constant 0 : index
    %3 = vector.load %arg3[%c80, %c0_3] : memref<248x128xf32, #tpu.memory_space<vmem>>, vector<1x128xf32>
    %c88 = arith.constant 88 : index
    %c0_4 = arith.constant 0 : index
    %4 = vector.load %arg3[%c88, %c0_4] : memref<248x128xf32, #tpu.memory_space<vmem>>, vector<3x128xf32>
    %c96 = arith.constant 96 : index
    %c0_5 = arith.constant 0 : index
    %5 = vector.load %arg3[%c96, %c0_5] : memref<248x128xf32, #tpu.memory_space<vmem>>, vector<1x64xf32>
    %c96_6 = arith.constant 96 : index
    %c64 = arith.constant 64 : index
    %6 = vector.load %arg3[%c96_6, %c64] : memref<248x128xf32, #tpu.memory_space<vmem>>, vector<1x64xf32>
    %c104 = arith.constant 104 : index
    %c0_7 = arith.constant 0 : index
    %7 = vector.load %arg3[%c104, %c0_7] : memref<248x128xf32, #tpu.memory_space<vmem>>, vector<1x64xf32>
    %c104_8 = arith.constant 104 : index
    %c64_9 = arith.constant 64 : index
    %8 = vector.load %arg3[%c104_8, %c64_9] : memref<248x128xf32, #tpu.memory_space<vmem>>, vector<1x64xf32>
    %c112 = arith.constant 112 : index
    %c0_10 = arith.constant 0 : index
    %9 = vector.load %arg3[%c112, %c0_10] : memref<248x128xf32, #tpu.memory_space<vmem>>, vector<2x2xf32>
    %c120 = arith.constant 120 : index
    %c0_11 = arith.constant 0 : index
    %10 = vector.load %arg3[%c120, %c0_11] : memref<248x128xf32, #tpu.memory_space<vmem>>, vector<1x2xf32>
    %c128 = arith.constant 128 : index
    %c0_12 = arith.constant 0 : index
    %11 = vector.load %arg3[%c128, %c0_12] : memref<248x128xf32, #tpu.memory_space<vmem>>, vector<64x32xf32>
    %c192 = arith.constant 192 : index
    %c0_13 = arith.constant 0 : index
    %12 = vector.load %arg3[%c192, %c0_13] : memref<248x128xf32, #tpu.memory_space<vmem>>, vector<2x32xf32>
    %c200 = arith.constant 200 : index
    %c0_14 = arith.constant 0 : index
    %13 = vector.load %arg3[%c200, %c0_14] : memref<248x128xf32, #tpu.memory_space<vmem>>, vector<1x32xf32>
    %c208 = arith.constant 208 : index
    %c0_15 = arith.constant 0 : index
    %14 = vector.load %arg3[%c208, %c0_15] : memref<248x128xf32, #tpu.memory_space<vmem>>, vector<32x128xf32>
    %c240 = arith.constant 240 : index
    %c0_16 = arith.constant 0 : index
    %15 = vector.load %arg3[%c240, %c0_16] : memref<248x128xf32, #tpu.memory_space<vmem>>, vector<1x128xf32>
    %c0_17 = arith.constant 0 : index
    %c0_18 = arith.constant 0 : index
    %16 = vector.load %arg4[%c0_17, %c0_18] : memref<8x6xf32, #tpu.memory_space<vmem>>, vector<8x6xf32>
    %c0_19 = arith.constant 0 : index
    %c0_20 = arith.constant 0 : index
    %17 = vector.load %arg5[%c0_19, %c0_20] : memref<12x3xf32, #tpu.memory_space<vmem>>, vector<12x3xf32>
    %c0_21 = arith.constant 0 : index
    %c0_22 = arith.constant 0 : index
    %18 = vector.load %arg6[%c0_21, %c0_22] : memref<2x2xf32, #tpu.memory_space<vmem>>, vector<2x2xf32>
    %19 = tpu.iota {dimensions = array<i32: 0>} : vector<20x8xi32>
    %20 = tpu.iota {dimensions = array<i32: 1>} : vector<20x8xi32>
    %21 = tpu.iota {dimensions = array<i32: 1>} : vector<8x20xi32>
    %22 = tpu.iota {dimensions = array<i32: 0>} : vector<8x20xi32>
    %c12_i32 = arith.constant 12 : i32
    %23 = vector.broadcast %c12_i32 : i32 to vector<20x8xi32>
    %24 = arith.subi %19, %23 : vector<20x8xi32>
    %c12_i32_23 = arith.constant 12 : i32
    %25 = vector.broadcast %c12_i32_23 : i32 to vector<20x8xi32>
    %26 = arith.subi %19, %25 : vector<20x8xi32>
    %c12_i32_24 = arith.constant 12 : i32
    %27 = vector.broadcast %c12_i32_24 : i32 to vector<8x20xi32>
    %28 = arith.subi %21, %27 : vector<8x20xi32>
    %c0_25 = arith.constant 0 : index
    %29 = memref.load %arg1[%c0_25] : memref<24xi32, #tpu.memory_space<smem>>
    %c12 = arith.constant 12 : index
    %30 = memref.load %arg1[%c12] : memref<24xi32, #tpu.memory_space<smem>>
    %c0_i32 = arith.constant 0 : i32
    %31 = vector.broadcast %c0_i32 : i32 to vector<20x8xi32>
    %32 = arith.cmpi eq, %19, %31 : vector<20x8xi32>
    %33 = vector.broadcast %29 : i32 to vector<20x8xi32>
    %34 = arith.select %32, %33, %24 : vector<20x8xi1>, vector<20x8xi32>
    %35 = vector.broadcast %30 : i32 to vector<20x8xi32>
    %36 = arith.select %32, %35, %26 : vector<20x8xi1>, vector<20x8xi32>
    %c0_i32_26 = arith.constant 0 : i32
    %37 = vector.broadcast %c0_i32_26 : i32 to vector<8x20xi32>
    %38 = arith.cmpi eq, %21, %37 : vector<8x20xi32>
    %39 = vector.broadcast %30 : i32 to vector<8x20xi32>
    %40 = arith.select %38, %39, %28 : vector<8x20xi1>, vector<8x20xi32>
    %c1 = arith.constant 1 : index
    %41 = memref.load %arg1[%c1] : memref<24xi32, #tpu.memory_space<smem>>
    %c13 = arith.constant 13 : index
    %42 = memref.load %arg1[%c13] : memref<24xi32, #tpu.memory_space<smem>>
    %c1_i32 = arith.constant 1 : i32
    %43 = vector.broadcast %c1_i32 : i32 to vector<20x8xi32>
    %44 = arith.cmpi eq, %19, %43 : vector<20x8xi32>
    %45 = vector.broadcast %41 : i32 to vector<20x8xi32>
    %46 = arith.select %44, %45, %34 : vector<20x8xi1>, vector<20x8xi32>
    %47 = vector.broadcast %42 : i32 to vector<20x8xi32>
    %48 = arith.select %44, %47, %36 : vector<20x8xi1>, vector<20x8xi32>
    %c1_i32_27 = arith.constant 1 : i32
    %49 = vector.broadcast %c1_i32_27 : i32 to vector<8x20xi32>
    %50 = arith.cmpi eq, %21, %49 : vector<8x20xi32>
    %51 = vector.broadcast %42 : i32 to vector<8x20xi32>
    %52 = arith.select %50, %51, %40 : vector<8x20xi1>, vector<8x20xi32>
    %c2 = arith.constant 2 : index
    %53 = memref.load %arg1[%c2] : memref<24xi32, #tpu.memory_space<smem>>
    %c14 = arith.constant 14 : index
    %54 = memref.load %arg1[%c14] : memref<24xi32, #tpu.memory_space<smem>>
    %c2_i32 = arith.constant 2 : i32
    %55 = vector.broadcast %c2_i32 : i32 to vector<20x8xi32>
    %56 = arith.cmpi eq, %19, %55 : vector<20x8xi32>
    %57 = vector.broadcast %53 : i32 to vector<20x8xi32>
    %58 = arith.select %56, %57, %46 : vector<20x8xi1>, vector<20x8xi32>
    %59 = vector.broadcast %54 : i32 to vector<20x8xi32>
    %60 = arith.select %56, %59, %48 : vector<20x8xi1>, vector<20x8xi32>
    %c2_i32_28 = arith.constant 2 : i32
    %61 = vector.broadcast %c2_i32_28 : i32 to vector<8x20xi32>
    %62 = arith.cmpi eq, %21, %61 : vector<8x20xi32>
    %63 = vector.broadcast %54 : i32 to vector<8x20xi32>
    %64 = arith.select %62, %63, %52 : vector<8x20xi1>, vector<8x20xi32>
    %c3 = arith.constant 3 : index
    %65 = memref.load %arg1[%c3] : memref<24xi32, #tpu.memory_space<smem>>
    %c15 = arith.constant 15 : index
    %66 = memref.load %arg1[%c15] : memref<24xi32, #tpu.memory_space<smem>>
    %c3_i32 = arith.constant 3 : i32
    %67 = vector.broadcast %c3_i32 : i32 to vector<20x8xi32>
    %68 = arith.cmpi eq, %19, %67 : vector<20x8xi32>
    %69 = vector.broadcast %65 : i32 to vector<20x8xi32>
    %70 = arith.select %68, %69, %58 : vector<20x8xi1>, vector<20x8xi32>
    %71 = vector.broadcast %66 : i32 to vector<20x8xi32>
    %72 = arith.select %68, %71, %60 : vector<20x8xi1>, vector<20x8xi32>
    %c3_i32_29 = arith.constant 3 : i32
    %73 = vector.broadcast %c3_i32_29 : i32 to vector<8x20xi32>
    %74 = arith.cmpi eq, %21, %73 : vector<8x20xi32>
    %75 = vector.broadcast %66 : i32 to vector<8x20xi32>
    %76 = arith.select %74, %75, %64 : vector<8x20xi1>, vector<8x20xi32>
    %c4 = arith.constant 4 : index
    %77 = memref.load %arg1[%c4] : memref<24xi32, #tpu.memory_space<smem>>
    %c16_30 = arith.constant 16 : index
    %78 = memref.load %arg1[%c16_30] : memref<24xi32, #tpu.memory_space<smem>>
    %c4_i32 = arith.constant 4 : i32
    %79 = vector.broadcast %c4_i32 : i32 to vector<20x8xi32>
    %80 = arith.cmpi eq, %19, %79 : vector<20x8xi32>
    %81 = vector.broadcast %77 : i32 to vector<20x8xi32>
    %82 = arith.select %80, %81, %70 : vector<20x8xi1>, vector<20x8xi32>
    %83 = vector.broadcast %78 : i32 to vector<20x8xi32>
    %84 = arith.select %80, %83, %72 : vector<20x8xi1>, vector<20x8xi32>
    %c4_i32_31 = arith.constant 4 : i32
    %85 = vector.broadcast %c4_i32_31 : i32 to vector<8x20xi32>
    %86 = arith.cmpi eq, %21, %85 : vector<8x20xi32>
    %87 = vector.broadcast %78 : i32 to vector<8x20xi32>
    %88 = arith.select %86, %87, %76 : vector<8x20xi1>, vector<8x20xi32>
    %c5 = arith.constant 5 : index
    %89 = memref.load %arg1[%c5] : memref<24xi32, #tpu.memory_space<smem>>
    %c17 = arith.constant 17 : index
    %90 = memref.load %arg1[%c17] : memref<24xi32, #tpu.memory_space<smem>>
    %c5_i32 = arith.constant 5 : i32
    %91 = vector.broadcast %c5_i32 : i32 to vector<20x8xi32>
    %92 = arith.cmpi eq, %19, %91 : vector<20x8xi32>
    %93 = vector.broadcast %89 : i32 to vector<20x8xi32>
    %94 = arith.select %92, %93, %82 : vector<20x8xi1>, vector<20x8xi32>
    %95 = vector.broadcast %90 : i32 to vector<20x8xi32>
    %96 = arith.select %92, %95, %84 : vector<20x8xi1>, vector<20x8xi32>
    %c5_i32_32 = arith.constant 5 : i32
    %97 = vector.broadcast %c5_i32_32 : i32 to vector<8x20xi32>
    %98 = arith.cmpi eq, %21, %97 : vector<8x20xi32>
    %99 = vector.broadcast %90 : i32 to vector<8x20xi32>
    %100 = arith.select %98, %99, %88 : vector<8x20xi1>, vector<8x20xi32>
    %c6 = arith.constant 6 : index
    %101 = memref.load %arg1[%c6] : memref<24xi32, #tpu.memory_space<smem>>
    %c18 = arith.constant 18 : index
    %102 = memref.load %arg1[%c18] : memref<24xi32, #tpu.memory_space<smem>>
    %c6_i32 = arith.constant 6 : i32
    %103 = vector.broadcast %c6_i32 : i32 to vector<20x8xi32>
    %104 = arith.cmpi eq, %19, %103 : vector<20x8xi32>
    %105 = vector.broadcast %101 : i32 to vector<20x8xi32>
    %106 = arith.select %104, %105, %94 : vector<20x8xi1>, vector<20x8xi32>
    %107 = vector.broadcast %102 : i32 to vector<20x8xi32>
    %108 = arith.select %104, %107, %96 : vector<20x8xi1>, vector<20x8xi32>
    %c6_i32_33 = arith.constant 6 : i32
    %109 = vector.broadcast %c6_i32_33 : i32 to vector<8x20xi32>
    %110 = arith.cmpi eq, %21, %109 : vector<8x20xi32>
    %111 = vector.broadcast %102 : i32 to vector<8x20xi32>
    %112 = arith.select %110, %111, %100 : vector<8x20xi1>, vector<8x20xi32>
    %c7 = arith.constant 7 : index
    %113 = memref.load %arg1[%c7] : memref<24xi32, #tpu.memory_space<smem>>
    %c19 = arith.constant 19 : index
    %114 = memref.load %arg1[%c19] : memref<24xi32, #tpu.memory_space<smem>>
    %c7_i32 = arith.constant 7 : i32
    %115 = vector.broadcast %c7_i32 : i32 to vector<20x8xi32>
    %116 = arith.cmpi eq, %19, %115 : vector<20x8xi32>
    %117 = vector.broadcast %113 : i32 to vector<20x8xi32>
    %118 = arith.select %116, %117, %106 : vector<20x8xi1>, vector<20x8xi32>
    %119 = vector.broadcast %114 : i32 to vector<20x8xi32>
    %120 = arith.select %116, %119, %108 : vector<20x8xi1>, vector<20x8xi32>
    %c7_i32_34 = arith.constant 7 : i32
    %121 = vector.broadcast %c7_i32_34 : i32 to vector<8x20xi32>
    %122 = arith.cmpi eq, %21, %121 : vector<8x20xi32>
    %123 = vector.broadcast %114 : i32 to vector<8x20xi32>
    %124 = arith.select %122, %123, %112 : vector<8x20xi1>, vector<8x20xi32>
    %c8_35 = arith.constant 8 : index
    %125 = memref.load %arg1[%c8_35] : memref<24xi32, #tpu.memory_space<smem>>
    %c20 = arith.constant 20 : index
    %126 = memref.load %arg1[%c20] : memref<24xi32, #tpu.memory_space<smem>>
    %c8_i32 = arith.constant 8 : i32
    %127 = vector.broadcast %c8_i32 : i32 to vector<20x8xi32>
    %128 = arith.cmpi eq, %19, %127 : vector<20x8xi32>
    %129 = vector.broadcast %125 : i32 to vector<20x8xi32>
    %130 = arith.select %128, %129, %118 : vector<20x8xi1>, vector<20x8xi32>
    %131 = vector.broadcast %126 : i32 to vector<20x8xi32>
    %132 = arith.select %128, %131, %120 : vector<20x8xi1>, vector<20x8xi32>
    %c8_i32_36 = arith.constant 8 : i32
    %133 = vector.broadcast %c8_i32_36 : i32 to vector<8x20xi32>
    %134 = arith.cmpi eq, %21, %133 : vector<8x20xi32>
    %135 = vector.broadcast %126 : i32 to vector<8x20xi32>
    %136 = arith.select %134, %135, %124 : vector<8x20xi1>, vector<8x20xi32>
    %c9 = arith.constant 9 : index
    %137 = memref.load %arg1[%c9] : memref<24xi32, #tpu.memory_space<smem>>
    %c21 = arith.constant 21 : index
    %138 = memref.load %arg1[%c21] : memref<24xi32, #tpu.memory_space<smem>>
    %c9_i32 = arith.constant 9 : i32
    %139 = vector.broadcast %c9_i32 : i32 to vector<20x8xi32>
    %140 = arith.cmpi eq, %19, %139 : vector<20x8xi32>
    %141 = vector.broadcast %137 : i32 to vector<20x8xi32>
    %142 = arith.select %140, %141, %130 : vector<20x8xi1>, vector<20x8xi32>
    %143 = vector.broadcast %138 : i32 to vector<20x8xi32>
    %144 = arith.select %140, %143, %132 : vector<20x8xi1>, vector<20x8xi32>
    %c9_i32_37 = arith.constant 9 : i32
    %145 = vector.broadcast %c9_i32_37 : i32 to vector<8x20xi32>
    %146 = arith.cmpi eq, %21, %145 : vector<8x20xi32>
    %147 = vector.broadcast %138 : i32 to vector<8x20xi32>
    %148 = arith.select %146, %147, %136 : vector<8x20xi1>, vector<8x20xi32>
    %c10 = arith.constant 10 : index
    %149 = memref.load %arg1[%c10] : memref<24xi32, #tpu.memory_space<smem>>
    %c22 = arith.constant 22 : index
    %150 = memref.load %arg1[%c22] : memref<24xi32, #tpu.memory_space<smem>>
    %c10_i32 = arith.constant 10 : i32
    %151 = vector.broadcast %c10_i32 : i32 to vector<20x8xi32>
    %152 = arith.cmpi eq, %19, %151 : vector<20x8xi32>
    %153 = vector.broadcast %149 : i32 to vector<20x8xi32>
    %154 = arith.select %152, %153, %142 : vector<20x8xi1>, vector<20x8xi32>
    %155 = vector.broadcast %150 : i32 to vector<20x8xi32>
    %156 = arith.select %152, %155, %144 : vector<20x8xi1>, vector<20x8xi32>
    %c10_i32_38 = arith.constant 10 : i32
    %157 = vector.broadcast %c10_i32_38 : i32 to vector<8x20xi32>
    %158 = arith.cmpi eq, %21, %157 : vector<8x20xi32>
    %159 = vector.broadcast %150 : i32 to vector<8x20xi32>
    %160 = arith.select %158, %159, %148 : vector<8x20xi1>, vector<8x20xi32>
    %c11 = arith.constant 11 : index
    %161 = memref.load %arg1[%c11] : memref<24xi32, #tpu.memory_space<smem>>
    %c23 = arith.constant 23 : index
    %162 = memref.load %arg1[%c23] : memref<24xi32, #tpu.memory_space<smem>>
    %c11_i32 = arith.constant 11 : i32
    %163 = vector.broadcast %c11_i32 : i32 to vector<20x8xi32>
    %164 = arith.cmpi eq, %19, %163 : vector<20x8xi32>
    %165 = vector.broadcast %161 : i32 to vector<20x8xi32>
    %166 = arith.select %164, %165, %154 : vector<20x8xi1>, vector<20x8xi32>
    %167 = vector.broadcast %162 : i32 to vector<20x8xi32>
    %168 = arith.select %164, %167, %156 : vector<20x8xi1>, vector<20x8xi32>
    %c11_i32_39 = arith.constant 11 : i32
    %169 = vector.broadcast %c11_i32_39 : i32 to vector<8x20xi32>
    %170 = arith.cmpi eq, %21, %169 : vector<8x20xi32>
    %171 = vector.broadcast %162 : i32 to vector<8x20xi32>
    %172 = arith.select %170, %171, %160 : vector<8x20xi1>, vector<8x20xi32>
    %173 = arith.cmpi eq, %166, %20 : vector<20x8xi32>
    %174 = arith.extui %173 : vector<20x8xi1> to vector<20x8xi32>
    %175 = arith.sitofp %174 : vector<20x8xi32> to vector<20x8xf32>
    %176 = arith.cmpi eq, %168, %20 : vector<20x8xi32>
    %177 = arith.extui %176 : vector<20x8xi1> to vector<20x8xi32>
    %178 = arith.sitofp %177 : vector<20x8xi32> to vector<20x8xf32>
    %179 = arith.cmpi eq, %172, %22 : vector<8x20xi32>
    %180 = arith.extui %179 : vector<8x20xi1> to vector<8x20xi32>
    %181 = arith.sitofp %180 : vector<8x20xi32> to vector<8x20xf32>
    %c12_i32_40 = arith.constant 12 : i32
    %182 = vector.broadcast %c12_i32_40 : i32 to vector<20x8xi32>
    %183 = arith.subi %19, %182 : vector<20x8xi32>
    %184 = arith.cmpi eq, %183, %20 : vector<20x8xi32>
    %185 = arith.extui %184 : vector<20x8xi1> to vector<20x8xi32>
    %186 = arith.sitofp %185 : vector<20x8xi32> to vector<20x8xf32>
    %187 = vector.extract_strided_slice %181 {offsets = [0, 0], sizes = [8, 12], strides = [1, 1]} : vector<8x20xf32> to vector<8x12xf32>
    %cst = arith.constant dense<0.000000e+00> : vector<8xf32>
    %188 = vector.multi_reduction <add>, %187, %cst [1] : vector<8x12xf32> to vector<8xf32>
    %189 = vector.shape_cast %188 : vector<8xf32> to vector<8x1xf32>
    %cst_41 = arith.constant dense<0.000000e+00> : vector<8x3xf32>
    %190 = tpu.matmul %187, %17, %cst_41 {dimension_numbers = #tpu.dot_dimension_numbers<[1], [0], [0], [1], [0, 0, 1, 1], [], []>, precision = #tpu.contract_precision<fp32>} : vector<8x12xf32>, vector<12x3xf32>, vector<8x3xf32> -> vector<8x3xf32>
    %cst_42 = arith.constant 1.000000e+00 : f32
    %191 = vector.broadcast %cst_42 : f32 to vector<8x1xf32>
    %192 = arith.maximumf %189, %191 : vector<8x1xf32>
    %193 = vector.broadcast %192 : vector<8x1xf32> to vector<8x3xf32>
    %194 = arith.divf %190, %193 : vector<8x3xf32>
    %cst_43 = arith.constant dense<0.000000e+00> : vector<12x128xf32>
    %195 = tpu.matmul %17, %4, %cst_43 {dimension_numbers = #tpu.dot_dimension_numbers<[1], [0], [0], [1], [0, 0, 1, 1], [], []>, precision = #tpu.contract_precision<fp32>} : vector<12x3xf32>, vector<3x128xf32>, vector<12x128xf32> -> vector<12x128xf32>
    %cst_44 = arith.constant dense<0.000000e+00> : vector<8x128xf32>
    %196 = tpu.matmul %194, %4, %cst_44 {dimension_numbers = #tpu.dot_dimension_numbers<[1], [0], [0], [1], [0, 0, 1, 1], [], []>, precision = #tpu.contract_precision<fp32>} : vector<8x3xf32>, vector<3x128xf32>, vector<8x128xf32> -> vector<8x128xf32>
    %197 = tpu.iota {dimensions = array<i32: 0>} : vector<20x12xi32>
    %198 = tpu.iota {dimensions = array<i32: 1>} : vector<20x12xi32>
    %199 = arith.cmpi eq, %197, %198 : vector<20x12xi32>
    %200 = arith.extui %199 : vector<20x12xi1> to vector<20x12xi32>
    %201 = arith.sitofp %200 : vector<20x12xi32> to vector<20x12xf32>
    %cst_45 = arith.constant dense<0.000000e+00> : vector<20x128xf32>
    %202 = tpu.matmul %201, %195, %cst_45 {dimension_numbers = #tpu.dot_dimension_numbers<[1], [0], [0], [1], [0, 0, 1, 1], [], []>, precision = #tpu.contract_precision<fp32>} : vector<20x12xf32>, vector<12x128xf32>, vector<20x128xf32> -> vector<20x128xf32>
    %cst_46 = arith.constant dense<0.000000e+00> : vector<20x128xf32>
    %203 = tpu.matmul %186, %196, %cst_46 {dimension_numbers = #tpu.dot_dimension_numbers<[1], [0], [0], [1], [0, 0, 1, 1], [], []>, precision = #tpu.contract_precision<fp32>} : vector<20x8xf32>, vector<8x128xf32>, vector<20x128xf32> -> vector<20x128xf32>
    %204 = arith.addf %202, %203 : vector<20x128xf32>
    %205 = vector.extract_strided_slice %204 {offsets = [0, 0], sizes = [20, 64], strides = [1, 1]} : vector<20x128xf32> to vector<20x64xf32>
    %cst_47 = arith.constant dense<0.000000e+00> : vector<8x128xf32>
    %206 = tpu.matmul %16, %0, %cst_47 {dimension_numbers = #tpu.dot_dimension_numbers<[1], [0], [0], [1], [0, 0, 1, 1], [], []>, precision = #tpu.contract_precision<fp32>} : vector<8x6xf32>, vector<6x128xf32>, vector<8x128xf32> -> vector<8x128xf32>
    %207 = vector.broadcast %1 : vector<1x128xf32> to vector<8x128xf32>
    %208 = arith.addf %206, %207 : vector<8x128xf32>
    %209 = vector.extract_strided_slice %208 {offsets = [0, 0], sizes = [8, 64], strides = [1, 1]} : vector<8x128xf32> to vector<8x64xf32>
    %210 = vector.extract_strided_slice %208 {offsets = [0, 64], sizes = [8, 64], strides = [1, 1]} : vector<8x128xf32> to vector<8x64xf32>
    %cst_48 = arith.constant dense<0.000000e+00> : vector<20x64xf32>
    %211 = tpu.matmul %175, %209, %cst_48 {dimension_numbers = #tpu.dot_dimension_numbers<[1], [0], [0], [1], [0, 0, 1, 1], [], []>, precision = #tpu.contract_precision<fp32>} : vector<20x8xf32>, vector<8x64xf32>, vector<20x64xf32> -> vector<20x64xf32>
    %cst_49 = arith.constant dense<0.000000e+00> : vector<20x64xf32>
    %212 = tpu.matmul %178, %210, %cst_49 {dimension_numbers = #tpu.dot_dimension_numbers<[1], [0], [0], [1], [0, 0, 1, 1], [], []>, precision = #tpu.contract_precision<fp32>} : vector<20x8xf32>, vector<8x64xf32>, vector<20x64xf32> -> vector<20x64xf32>
    %213 = arith.addf %211, %212 : vector<20x64xf32>
    %214 = arith.addf %213, %205 : vector<20x64xf32>
    %cst_50 = arith.constant 0.000000e+00 : f32
    %215 = vector.broadcast %cst_50 : f32 to vector<20x64xf32>
    %216 = arith.cmpf ogt, %214, %215 : vector<20x64xf32>
    %cst_51 = arith.constant 2.000000e-01 : f32
    %217 = vector.broadcast %cst_51 : f32 to vector<20x64xf32>
    %218 = arith.mulf %217, %214 : vector<20x64xf32>
    %219 = arith.select %216, %214, %218 : vector<20x64xi1>, vector<20x64xf32>
    %220 = vector.broadcast %5 : vector<1x64xf32> to vector<20x64xf32>
    %221 = arith.mulf %219, %220 : vector<20x64xf32>
    %cst_52 = arith.constant dense<0.000000e+00> : vector<20xf32>
    %222 = vector.multi_reduction <add>, %221, %cst_52 [1] : vector<20x64xf32> to vector<20xf32>
    %223 = vector.shape_cast %222 : vector<20xf32> to vector<20x1xf32>
    %cst_53 = arith.constant dense<0xFF800000> : vector<1xf32>
    %224 = vector.multi_reduction <maximumf>, %223, %cst_53 [0] : vector<20x1xf32> to vector<1xf32>
    %225 = vector.shape_cast %224 : vector<1xf32> to vector<1x1xf32>
    %226 = vector.broadcast %225 : vector<1x1xf32> to vector<20x1xf32>
    %227 = arith.subf %223, %226 : vector<20x1xf32>
    %228 = math.exp %227 : vector<20x1xf32>
    %229 = vector.broadcast %228 : vector<20x1xf32> to vector<20x8xf32>
    %230 = arith.mulf %178, %229 : vector<20x8xf32>
    %cst_54 = arith.constant dense<0.000000e+00> : vector<8xf32>
    %231 = vector.multi_reduction <add>, %230, %cst_54 [0] : vector<20x8xf32> to vector<8xf32>
    %232 = vector.shape_cast %231 : vector<8xf32> to vector<1x8xf32>
    %233 = vector.broadcast %232 : vector<1x8xf32> to vector<20x8xf32>
    %234 = arith.mulf %178, %233 : vector<20x8xf32>
    %cst_55 = arith.constant dense<0.000000e+00> : vector<20xf32>
    %235 = vector.multi_reduction <add>, %234, %cst_55 [1] : vector<20x8xf32> to vector<20xf32>
    %236 = vector.shape_cast %235 : vector<20xf32> to vector<20x1xf32>
    %237 = arith.divf %228, %236 : vector<20x1xf32>
    %238 = vector.broadcast %237 : vector<20x1xf32> to vector<20x64xf32>
    %239 = arith.mulf %238, %211 : vector<20x64xf32>
    %cst_56 = arith.constant dense<0.000000e+00> : vector<8x64xf32>
    %240 = tpu.matmul %181, %239, %cst_56 {dimension_numbers = #tpu.dot_dimension_numbers<[1], [0], [0], [1], [0, 0, 1, 1], [], []>, precision = #tpu.contract_precision<fp32>} : vector<8x20xf32>, vector<20x64xf32>, vector<8x64xf32> -> vector<8x64xf32>
    %241 = vector.broadcast %7 : vector<1x64xf32> to vector<8x64xf32>
    %242 = arith.addf %240, %241 : vector<8x64xf32>
    %cst_57 = arith.constant 0.000000e+00 : f32
    %243 = vector.broadcast %cst_57 : f32 to vector<8x64xf32>
    %244 = arith.maximumf %242, %243 : vector<8x64xf32>
    %245 = vector.extract_strided_slice %204 {offsets = [0, 64], sizes = [20, 64], strides = [1, 1]} : vector<20x128xf32> to vector<20x64xf32>
    %cst_58 = arith.constant dense<0.000000e+00> : vector<8x128xf32>
    %246 = tpu.matmul %244, %2, %cst_58 {dimension_numbers = #tpu.dot_dimension_numbers<[1], [0], [0], [1], [0, 0, 1, 1], [], []>, precision = #tpu.contract_precision<fp32>} : vector<8x64xf32>, vector<64x128xf32>, vector<8x128xf32> -> vector<8x128xf32>
    %247 = vector.broadcast %3 : vector<1x128xf32> to vector<8x128xf32>
    %248 = arith.addf %246, %247 : vector<8x128xf32>
    %249 = vector.extract_strided_slice %248 {offsets = [0, 0], sizes = [8, 64], strides = [1, 1]} : vector<8x128xf32> to vector<8x64xf32>
    %250 = vector.extract_strided_slice %248 {offsets = [0, 64], sizes = [8, 64], strides = [1, 1]} : vector<8x128xf32> to vector<8x64xf32>
    %cst_59 = arith.constant dense<0.000000e+00> : vector<20x64xf32>
    %251 = tpu.matmul %175, %249, %cst_59 {dimension_numbers = #tpu.dot_dimension_numbers<[1], [0], [0], [1], [0, 0, 1, 1], [], []>, precision = #tpu.contract_precision<fp32>} : vector<20x8xf32>, vector<8x64xf32>, vector<20x64xf32> -> vector<20x64xf32>
    %cst_60 = arith.constant dense<0.000000e+00> : vector<20x64xf32>
    %252 = tpu.matmul %178, %250, %cst_60 {dimension_numbers = #tpu.dot_dimension_numbers<[1], [0], [0], [1], [0, 0, 1, 1], [], []>, precision = #tpu.contract_precision<fp32>} : vector<20x8xf32>, vector<8x64xf32>, vector<20x64xf32> -> vector<20x64xf32>
    %253 = arith.addf %251, %252 : vector<20x64xf32>
    %254 = arith.addf %253, %245 : vector<20x64xf32>
    %cst_61 = arith.constant 0.000000e+00 : f32
    %255 = vector.broadcast %cst_61 : f32 to vector<20x64xf32>
    %256 = arith.cmpf ogt, %254, %255 : vector<20x64xf32>
    %cst_62 = arith.constant 2.000000e-01 : f32
    %257 = vector.broadcast %cst_62 : f32 to vector<20x64xf32>
    %258 = arith.mulf %257, %254 : vector<20x64xf32>
    %259 = arith.select %256, %254, %258 : vector<20x64xi1>, vector<20x64xf32>
    %260 = vector.broadcast %6 : vector<1x64xf32> to vector<20x64xf32>
    %261 = arith.mulf %259, %260 : vector<20x64xf32>
    %cst_63 = arith.constant dense<0.000000e+00> : vector<20xf32>
    %262 = vector.multi_reduction <add>, %261, %cst_63 [1] : vector<20x64xf32> to vector<20xf32>
    %263 = vector.shape_cast %262 : vector<20xf32> to vector<20x1xf32>
    %cst_64 = arith.constant dense<0xFF800000> : vector<1xf32>
    %264 = vector.multi_reduction <maximumf>, %263, %cst_64 [0] : vector<20x1xf32> to vector<1xf32>
    %265 = vector.shape_cast %264 : vector<1xf32> to vector<1x1xf32>
    %266 = vector.broadcast %265 : vector<1x1xf32> to vector<20x1xf32>
    %267 = arith.subf %263, %266 : vector<20x1xf32>
    %268 = math.exp %267 : vector<20x1xf32>
    %269 = vector.broadcast %268 : vector<20x1xf32> to vector<20x8xf32>
    %270 = arith.mulf %178, %269 : vector<20x8xf32>
    %cst_65 = arith.constant dense<0.000000e+00> : vector<8xf32>
    %271 = vector.multi_reduction <add>, %270, %cst_65 [0] : vector<20x8xf32> to vector<8xf32>
    %272 = vector.shape_cast %271 : vector<8xf32> to vector<1x8xf32>
    %273 = vector.broadcast %272 : vector<1x8xf32> to vector<20x8xf32>
    %274 = arith.mulf %178, %273 : vector<20x8xf32>
    %cst_66 = arith.constant dense<0.000000e+00> : vector<20xf32>
    %275 = vector.multi_reduction <add>, %274, %cst_66 [1] : vector<20x8xf32> to vector<20xf32>
    %276 = vector.shape_cast %275 : vector<20xf32> to vector<20x1xf32>
    %277 = arith.divf %268, %276 : vector<20x1xf32>
    %278 = vector.broadcast %277 : vector<20x1xf32> to vector<20x64xf32>
    %279 = arith.mulf %278, %251 : vector<20x64xf32>
    %cst_67 = arith.constant dense<0.000000e+00> : vector<8x64xf32>
    %280 = tpu.matmul %181, %279, %cst_67 {dimension_numbers = #tpu.dot_dimension_numbers<[1], [0], [0], [1], [0, 0, 1, 1], [], []>, precision = #tpu.contract_precision<fp32>} : vector<8x20xf32>, vector<20x64xf32>, vector<8x64xf32> -> vector<8x64xf32>
    %281 = vector.broadcast %8 : vector<1x64xf32> to vector<8x64xf32>
    %282 = arith.addf %280, %281 : vector<8x64xf32>
    %cst_68 = arith.constant 0.000000e+00 : f32
    %283 = vector.broadcast %cst_68 : f32 to vector<8x64xf32>
    %284 = arith.maximumf %282, %283 : vector<8x64xf32>
    %cst_69 = arith.constant dense<0.000000e+00> : vector<2x2xf32>
    %285 = tpu.matmul %18, %9, %cst_69 {dimension_numbers = #tpu.dot_dimension_numbers<[1], [0], [0], [1], [0, 0, 1, 1], [], []>, precision = #tpu.contract_precision<fp32>} : vector<2x2xf32>, vector<2x2xf32>, vector<2x2xf32> -> vector<2x2xf32>
    %286 = vector.broadcast %10 : vector<1x2xf32> to vector<2x2xf32>
    %287 = arith.addf %285, %286 : vector<2x2xf32>
    %cst_70 = arith.constant 0.000000e+00 : f32
    %288 = vector.broadcast %cst_70 : f32 to vector<2x2xf32>
    %289 = arith.maximumf %287, %288 : vector<2x2xf32>
    %290 = tpu.iota {dimensions = array<i32: 0>} : vector<8x2xi32>
    %291 = tpu.iota {dimensions = array<i32: 1>} : vector<8x2xi32>
    %c4_i32_71 = arith.constant 4 : i32
    %292 = vector.broadcast %c4_i32_71 : i32 to vector<8x2xi32>
    %293 = arith.muli %291, %292 : vector<8x2xi32>
    %294 = arith.subi %290, %293 : vector<8x2xi32>
    %c0_i32_72 = arith.constant 0 : i32
    %295 = vector.broadcast %c0_i32_72 : i32 to vector<8x2xi32>
    %296 = arith.cmpi sge, %294, %295 : vector<8x2xi32>
    %c4_i32_73 = arith.constant 4 : i32
    %297 = vector.broadcast %c4_i32_73 : i32 to vector<8x2xi32>
    %298 = arith.cmpi slt, %294, %297 : vector<8x2xi32>
    %299 = arith.andi %296, %298 : vector<8x2xi1>
    %300 = arith.extui %299 : vector<8x2xi1> to vector<8x2xi32>
    %301 = arith.sitofp %300 : vector<8x2xi32> to vector<8x2xf32>
    %cst_74 = arith.constant dense<0.000000e+00> : vector<8x2xf32>
    %302 = tpu.matmul %301, %289, %cst_74 {dimension_numbers = #tpu.dot_dimension_numbers<[1], [0], [0], [1], [0, 0, 1, 1], [], []>, precision = #tpu.contract_precision<fp32>} : vector<8x2xf32>, vector<2x2xf32>, vector<8x2xf32> -> vector<8x2xf32>
    %cst_75 = arith.constant dense<0.000000e+00> : vector<8x32xf32>
    %303 = tpu.matmul %284, %11, %cst_75 {dimension_numbers = #tpu.dot_dimension_numbers<[1], [0], [0], [1], [0, 0, 1, 1], [], []>, precision = #tpu.contract_precision<fp32>} : vector<8x64xf32>, vector<64x32xf32>, vector<8x32xf32> -> vector<8x32xf32>
    %cst_76 = arith.constant dense<0.000000e+00> : vector<8x32xf32>
    %304 = tpu.matmul %302, %12, %cst_76 {dimension_numbers = #tpu.dot_dimension_numbers<[1], [0], [0], [1], [0, 0, 1, 1], [], []>, precision = #tpu.contract_precision<fp32>} : vector<8x2xf32>, vector<2x32xf32>, vector<8x32xf32> -> vector<8x32xf32>
    %305 = arith.addf %303, %304 : vector<8x32xf32>
    %306 = vector.broadcast %13 : vector<1x32xf32> to vector<8x32xf32>
    %307 = arith.addf %305, %306 : vector<8x32xf32>
    %cst_77 = arith.constant 0.000000e+00 : f32
    %308 = vector.broadcast %cst_77 : f32 to vector<8x32xf32>
    %309 = arith.maximumf %307, %308 : vector<8x32xf32>
    %cst_78 = arith.constant dense<0.000000e+00> : vector<8x128xf32>
    %310 = tpu.matmul %309, %14, %cst_78 {dimension_numbers = #tpu.dot_dimension_numbers<[1], [0], [0], [1], [0, 0, 1, 1], [], []>, precision = #tpu.contract_precision<fp32>} : vector<8x32xf32>, vector<32x128xf32>, vector<8x128xf32> -> vector<8x128xf32>
    %311 = vector.broadcast %15 : vector<1x128xf32> to vector<8x128xf32>
    %312 = arith.addf %310, %311 : vector<8x128xf32>
    %c0_79 = arith.constant 0 : index
    %313 = memref.load %arg2[%c0_79] : memref<1xi32, #tpu.memory_space<smem>>
    %314 = tpu.iota {dimensions = array<i32: 1>} : vector<8x8xi32>
    %315 = vector.broadcast %313 : i32 to vector<8x8xi32>
    %316 = arith.cmpi eq, %314, %315 : vector<8x8xi32>
    %317 = tpu.iota {dimensions = array<i32: 0>} : vector<8x8xi32>
    %c0_i32_80 = arith.constant 0 : i32
    %318 = vector.broadcast %c0_i32_80 : i32 to vector<8x8xi32>
    %319 = arith.cmpi eq, %317, %318 : vector<8x8xi32>
    %320 = arith.andi %316, %319 : vector<8x8xi1>
    %321 = arith.extui %320 : vector<8x8xi1> to vector<8x8xi32>
    %322 = arith.sitofp %321 : vector<8x8xi32> to vector<8x8xf32>
    %cst_81 = arith.constant dense<0.000000e+00> : vector<8x128xf32>
    %323 = tpu.matmul %322, %312, %cst_81 {dimension_numbers = #tpu.dot_dimension_numbers<[1], [0], [0], [1], [0, 0, 1, 1], [], []>, precision = #tpu.contract_precision<fp32>} : vector<8x8xf32>, vector<8x128xf32>, vector<8x128xf32> -> vector<8x128xf32>
    %c0_82 = arith.constant 0 : index
    %c0_83 = arith.constant 0 : index
    %324 = vector.load %arg7[%c0_82, %c0_83] : memref<8x128xf32, #tpu.memory_space<vmem>>, vector<8x128xf32>
    tpu.vector_store %arg7[%c0_82, %c0_83], %323 {strides = array<i32>} : memref<8x128xf32, #tpu.memory_space<vmem>>, vector<8x128xf32>,
    return
  }
  func.func @transform_0(%arg0: i32, %arg1: memref<24xi32, #tpu.memory_space<smem>>, %arg2: memref<1xi32, #tpu.memory_space<smem>>) -> (i32, i32) {
    %c0_i32 = arith.constant 0 : i32
    %c0_i32_0 = arith.constant 0 : i32
    %c0_i32_1 = arith.constant 0 : i32
    return %c0_i32, %c0_i32_0 : i32, i32
  }
  func.func @transform_1(%arg0: i32, %arg1: memref<24xi32, #tpu.memory_space<smem>>, %arg2: memref<1xi32, #tpu.memory_space<smem>>) -> (i32, i32) {
    %c0_i32 = arith.constant 0 : i32
    %c0_i32_0 = arith.constant 0 : i32
    %c0_i32_1 = arith.constant 0 : i32
    return %c0_i32, %c0_i32_0 : i32, i32
  }
  func.func @transform_2(%arg0: i32, %arg1: memref<24xi32, #tpu.memory_space<smem>>, %arg2: memref<1xi32, #tpu.memory_space<smem>>) -> (i32, i32) {
    %c0_i32 = arith.constant 0 : i32
    %c0_i32_0 = arith.constant 0 : i32
    %c0_i32_1 = arith.constant 0 : i32
    return %c0_i32, %c0_i32_0 : i32, i32
  }
  func.func @transform_3(%arg0: i32, %arg1: memref<24xi32, #tpu.memory_space<smem>>, %arg2: memref<1xi32, #tpu.memory_space<smem>>) -> (i32, i32) {
    %c0_i32 = arith.constant 0 : i32
    %c0_i32_0 = arith.constant 0 : i32
    %c0_i32_1 = arith.constant 0 : i32
    return %c0_i32, %c0_i32_0 : i32, i32
  }
  func.func @transform_4(%arg0: i32, %arg1: memref<24xi32, #tpu.memory_space<smem>>, %arg2: memref<1xi32, #tpu.memory_space<smem>>) -> (i32, i32) {
    %c0_i32 = arith.constant 0 : i32
    %c0_i32_0 = arith.constant 0 : i32
    %c0_i32_1 = arith.constant 0 : i32
    return %c0_i32, %c0_i32_0 : i32, i32
  }
}

</mosaic_0001>

<bundles_post_ra>
// kernel: tpu_custom_call.1
= control target key start
LH: loop header
LB: loop body
LE: loop exit
PB: predicated region body
PF: predicated region fallthrough
CT: control target
= control target key end

     0   :  { %s13724_s0 = inlined_call_operand.vmem [shape: s32[24], index: 0, kind: input, shape index: {}]   ;;  %s13725_s1 = inlined_call_operand.<no memory space> [shape: s32[1], index: 1, kind: input, shape index: {}]   ;;  %s13726_s2 = inlined_call_operand.hbm [shape: f32[248,128], index: 2, kind: input, shape index: {}]   ;;  %s13727_s3 = inlined_call_operand.vmem [shape: f32[8,6], index: 3, kind: input, shape index: {}]   ;;  %s13728_s4 = inlined_call_operand.vmem [shape: f32[12,3], index: 4, kind: input, shape index: {}]   ;;  %s13729_s5 = inlined_call_operand.vmem [shape: f32[2,2], index: 5, kind: input, shape index: {}]   ;;  %s13730_s6 = inlined_call_operand.hbm [shape: f32[8,128], index: 6, kind: output, shape index: {}]  }
   0x1   :  { %s11_s23 = sshll.u32 %s13724_s0, 4  ;;  %s12_s23 = int_to_ptr.vmem [resolvable:$true] %s11_s23 }
   0x2   :  { %s12153_s24 = scalar_lea.vmem %s12_s23, 16  ;;  %p12158_p1 = scmp.lt.s32.totalorder %s12_s23, %s12_s23 }
   0x3   :  { %p12154_p0 = scmp.ne.s32.totalorder %s12_s23, %s12153_s24  ;;  %p12159_p2 = scmp.lt.s32.totalorder %s12153_s24, %s12153_s24 }
   0x5   :  { %p12160_p3 = por %p12159_p2, %p12158_p1 }
   0x7   :  { %p12161_p4 = pnand %p12160_p3, %p12154_p0 }
   0x9   :  { %12164 = shalt.err (!%p12161_p4)  }
   0xa   :  { %s12215_s25 = smov [#allocation3]  }
   0xb   :  { %14 = dma.vmem_to_smem %s12_s23, 16, %s12215_s25, [#allocation2] }
   0xc   :  { %12209 = dma.done.wait [#allocation2], 16 }
   0xd   :  { %12210 = vsyncadd [#allocation2], 4294967280 }
   0xe   :  { %17 = sfence }
   0xf   :  { %18 = vsyncpa [#allocation6], 0 }
  0x10   :  { %19 = vsyncpa [#allocation7], 0  ;;  %s12216_s26 = smov [#allocation5]   ;;  %s12165_s29 = scalar_lea.hbm %s13726_s2, 3968 }
  0x11   :  { %s25_s27 = sshll.u32 %s12216_s26, 4  ;;  %p12166_p5 = scmp.ne.s32.totalorder %s13726_s2, %s12165_s29  ;;  %s26_s27 = int_to_ptr.vmem [resolvable:$true] %s25_s27 }
  0x12   :  { %p12169_p6 = scmp.lt.u32.totalorder %s12165_s29, %s13726_s2 }
  0x14   :  { %p12171_p7 = pnand %p12169_p6, %p12166_p5 }
  0x16   :  { %12174 = shalt.err (!%p12171_p7)
}
  0x17   :  { %s12175_s10 = scalar_lea.vmem %s26_s27, 3968  ;;  %p12180_p9 = scmp.lt.s32.totalorder %s26_s27, %s26_s27 }
  0x18   :  { %p12176_p8 = scmp.ne.s32.totalorder %s26_s27, %s12175_s10  ;;  %p12181_p10 = scmp.lt.s32.totalorder %s12175_s10, %s12175_s10 }
  0x1a   :  { %p12182_p11 = por %p12181_p10, %p12180_p9 }
  0x1c   :  { %p12183_p12 = pnand %p12182_p11, %p12176_p8 }
  0x1e   :  { %12186 = shalt.err (!%p12183_p12)
}
  0x1f   :  { %s12217_s11 = smov 128   ;;  %s12218_s12 = smov 8  }
  0x20   :  { %31 = dma.hbm_to_vmem [thread:$0]  %s13726_s2, 3968, %s26_s27, [#allocation6], %s12217_s11, %s12217_s11, %s12218_s12  }
  0x21   :  { %12211 = dma.done.wait [#allocation6], 3968  }
  0x22   :  { %12212 = vsyncadd [#allocation6], 4294963328  ;;  %v13734_v0 = vmov 0.0|0.0   ;;  %vm12220_vm0 = vmmov 0   ;;  %v13731_v1 = vmov 0.0   ;;  %v76_v2 = vlaneseq  ;;  %s12277_s15 = sld [smem:[#allocation3 + $0xc]] }
  0x23   :  { %11627 = vmatprep.subr.bf16.mxu0 %v13734_v0  ;;  %10569 = vmatprep.mubr.msk.f32.mxu0 %vm12220_vm0, %v13731_v1  ;;  %s12279_s16 = sld [smem:[#allocation3 + $0xd]]  ;;  %s12281_s17 = sld [smem:[#allocation3 + $0xe]]  ;;  %vm303_vm1 = vcmask 1043456   ;;  %vm775_vm3 = vcmask 1042432   ;;  %vm769_vm6 = vcmask 23552   ;;  %v73_v6 = vld [vmem:[%s13728_s4] sm:$0xff] }
  0x24   :  { %s12283_s18 = sld [smem:[#allocation3 + $0xf]]  ;;  %v12285_v3 = vand.u32 127, %v76_v2  ;;  %s12287_s2 = sld [smem:[#allocation3 + $0x10]]  ;;  %v12299_v5 = vshrl.u32 %v76_v2, 7  ;;  %v74_v7 = vld [vmem:[%s13728_s4 + $0x8] sm:$0xf] }
  0x25   :  { %s12289_s19 = sld [smem:[#allocation3 + $0x11]]  ;;  %s12291_s20 = sld [smem:[#allocation3 + $0x12]]  ;;  %v305_v10 = vsel %vm303_vm1, %v74_v7, 0  ;;  %v308_v11 = vand.u32 4294901760, %v73_v6  ;;  %v52_v27 = vld [vmem:[#allocation5 + $0x58] sm:$0x7] }
  0x26   :  { %s12293_s21 = sld [smem:[#allocation3 + $0x13]]  ;;  %v10010_v4 = vadd.s32 4294967284, %v12285_v3  ;;  %vm99_vm2 = vcmp.eq.s32.totalorder %v12285_v3, 0  ;;  %s12297_s22 = sld [smem:[#allocation3 + $0x14]]  ;;  %vm114_vm4 = vcmp.eq.s32.totalorder %v12285_v3, 1  ;;  %vm129_vm5 = vcmp.eq.s32.totalorder %v12285_v3, 2 }
  0x27   :  { %s12303_s23 = sld [smem:[#allocation3 + $0x15]]  ;;  %vm144_vm7 = vcmp.eq.s32.totalorder %v12285_v3, 3  ;;  %vm159_vm8 = vcmp.eq.s32.totalorder %v12285_v3, 4  ;;  %s12321_s28 = sld [smem:[#allocation3 + $0x16]]  ;;  %v311_v14 = vand.u32 4294901760, %v305_v10  ;;  %vm174_vm9 = vcmp.eq.s32.totalorder %v12285_v3, 5 }
  0x28   :  { %v95_v8 = vstv %s12277_s15  ;;  %s12323_s4 = sld [smem:[#allocation3 + $0x17]]  ;;  %vm189_vm10 = vcmp.eq.s32.totalorder %v12285_v3, 6  ;;  %v12340_v21 = vsub.f32 %v73_v6, %v308_v11  ;;  %vm204_vm11 = vcmp.eq.s32.totalorder %v12285_v3, 7  ;;  %s10012_s30 = sld [smem:[#allocation3 + $0x1]] }
  0x29   :  { %v110_v9 = vstv %s12279_s16  ;;  %v100_v12 = vsel %vm99_vm2, %v95_v8, %v10010_v4  ;;  %v125_v13 = vstv %s12281_s17  ;;  %v12338_v20 = vpack.c.bf16 %v311_v14, %v308_v11  ;;  %s10014_s7 = sld [smem:[#allocation3 + $0x2]]  ;;  %s10016_s8 = sld [smem:[#allocation3 + $0x3]] }
  0x2a   :  { %v115_v15 = vsel %vm114_vm4, %v110_v9, %v100_v12  ;;  %v140_v16 = vstv %s12283_s18  ;;  %v155_v17 = vstv %s12287_s2  ;;  %v12347_v24 = vsub.f32 %v305_v10, %v311_v14  ;;  %s10018_s9 = sld [smem:[#allocation3 + $0x4]]  ;;  %s10020_s10 = sld [smem:[#allocation3 + $0x5]] }
  0x2b   :  { %v130_v18 = vsel %vm129_vm5, %v125_v13, %v115_v15  ;;  %v170_v19 = vstv %s12289_s19  ;;  %v185_v23 = vstv %s12291_s20  ;;  %11629 = vmatpush3.bf16.msra.mxu0 %v12338_v20  ;;  %vm219_vm12 = vcmp.eq.s32.totalorder %v12285_v3, 8  ;;  %s10026_s11 = sld [smem:[#allocation3 + $0x8]]  ;;  %s10022_s12 = sld [smem:[#allocation3 + $0x6]] }
  0x2c   :  { %v145_v22 = vsel %vm144_vm7, %v140_v16, %v130_v18  ;;  %v200_v26 = vstv %s12293_s21  ;;  %v215_v29 = vstv %s12297_s22  ;;  %vm234_vm13 = vcmp.eq.s32.totalorder %v12285_v3, 9  ;;  %11630 = vmatprep.subr.bf16.mxu0 %v13734_v0  ;;  %s10028_s13 = sld [smem:[#allocation3 + $0x9]]  ;;  %s10024_s14 = sld [smem:[#allocation3 + $0x7]] }
  0x2d   :  { %v160_v25 = vsel %vm159_vm8, %v155_v17, %v145_v22  ;;  %v230_v30 = vstv %s12303_s23  ;;  %vm249_vm14 = vcmp.eq.s32.totalorder %v12285_v3, 10  ;;  %vm264_vm15 = vcmp.eq.s32.totalorder %v12285_v3, 11  ;;  %s10030_s15 = sld [smem:[#allocation3 + $0xa]]  ;;  %s10032_s16 = sld [smem:[#allocation3 + $0xb]] }
  0x2e   :  { %v175_v28 = vsel %vm174_vm9, %v170_v19, %v160_v25  ;;  %v245_v33 = vstv %s12321_s28  ;;  %v387_v34 = vand.u32 4294901760, %v12340_v21  ;;  %v777_v35 = vsel %vm775_vm3, %v52_v27, 0  ;;  %s12222_s17 = smov 64  }
  0x2f   :  { %v190_v31 = vsel %vm189_vm10, %v185_v23, %v175_v28  ;;  %v260_v37 = vstv %s12323_s4  ;;  %v394_v38 = vand.u32 4294901760, %v12347_v24  ;;  %v12376_v39 = vand.u32 4294901760, %v777_v35 }
  0x30   :  { %v205_v32 = vsel %vm204_vm11, %v200_v26, %v190_v31  ;;  %v771_v41 = vsel %vm769_vm6, %v73_v6, 0  ;;  %v773_v42 = vsel %vm769_vm6, %v74_v7, 0  ;;  %vm296_vm2 = vcmask 97280  }
  0x31   :  { %v220_v36 = vsel %vm219_vm12, %v215_v29, %v205_v32  ;;  %10607 = vmatprep.subr.mxu1 %v12376_v39  ;;  %v12385_v44 = vand.u32 4294901760, %v771_v41  ;;  %v12387_v45 = vand.u32 4294901760, %v773_v42  ;;  %v388_v47 = vsub.f32 %v12340_v21, %v387_v34 }
  0x32   :  { %v235_v40 = vsel %vm234_vm13, %v230_v30, %v220_v36  ;;  %10608 = vmatpush3.msra.mxu1 %v12376_v39  ;;  %v12398_v48 = vsub.f32 %v777_v35, %v12376_v39  ;;  %v395_v49 = vsub.f32 %v12347_v24, %v394_v38  ;;  %v11634_v14 = vpack.c.bf16 %v12347_v24, %v12340_v21 }
  0x33   :  { %v250_v43 = vsel %vm249_vm14, %v245_v33, %v235_v40  ;;  %v846_v50 = vsub.f32 %v771_v41, %v12385_v44  ;;  %v856_v51 = vsub.f32 %v773_v42, %v12387_v45  ;;  %v389_v60 = vand.u32 4294901760, %v388_v47 }
  0x34   :  { %v265_v46 = vsel %vm264_vm15, %v260_v37, %v250_v43  ;;  %v12410_v53 = vand.u32 4294901760, %v12398_v48  ;;  %v396_v61 = vand.u32 4294901760, %v395_v49  ;;  %v11640_v15 = vpack.c.bf16 %v394_v38, %v387_v34 }
  0x35   :  { %vm284_vm3 = vcmp.eq.s32.totalorder %v265_v46, %v12299_v5  ;;  %v847_v56 = vand.u32 4294901760, %v846_v50  ;;  %v857_v57 = vand.u32 4294901760, %v856_v51  ;;  %vm1726_vm8 = vcmask 64512  }
  0x36   :  { %v12407_v52 = vsel %vm284_vm3, 1.0, %v13731_v1  ;;  %v869_v59 = vsub.f32 %v12398_v48, %v12410_v53  ;;  %v11631_v11 = vpack.c.bf16 %v396_v61, %v389_v60  ;;  %v12537_v60 = vadd.s32 16, %v12299_v5 }
  0x37   :  { %v301_v54 = vsel %vm296_vm2, %v12407_v52, 0  ;;  %v297_v55 = vsel %vm296_vm2, %v12407_v52, 0.0  ;;  %v848_v62 = vsub.f32 %v846_v50, %v847_v56  ;;  %v858_v63 = vsub.f32 %v856_v51, %v857_v57 }
  0x38   :  { %v375_v58 = vsub.f32 %v301_v54, %v301_v54  ;;  %298 = vadd.xlane.f32.xlu0 %v297_v55  ;;  %v12418_v4 = vand.u32 4294901760, %v869_v59  ;;  %v12513_v55 = vadd.s32 8, %v12299_v5  ;;  %vm2829_vm10 = vcmask 48128  }
  0x39   :  { %v849_v6 = vand.u32 4294901760, %v848_v62  ;;  %v859_v7 = vand.u32 4294901760, %v858_v63  ;;  %v72_v62 = vld [vmem:[%s13727_s3] sm:$0xff]  ;;  %vm2833_vm11 = vcmask 1045504   ;;  %vm1717_vm12 = vcmp.eq.s32.totalorder %v12299_v5, %v12285_v3  ;;  %s86_s3 = sld [smem:[#allocation3]] }
  0x3a   :  { %v376_v2 = vand.u32 4294901760, %v375_v58  ;;  %10612 = vmatprep.subr.mxu1 %v12418_v4  ;;  %vm209_vm4 = vcmp.eq.s32.totalorder %v12513_v55, 8  ;;  %vm224_vm5 = vcmp.eq.s32.totalorder %v12513_v55, 9  ;;  %v41_v63 = vld [vmem:[#allocation5] sm:$0x3f]  ;;  %vm1718_vm13 = vcmp.eq.s32.totalorder %v12513_v55, %v12285_v3 }
  0x3b   :  { %10609 = vmatprep.mubr.f32.mxu1 %v849_v6  ;;  %v2831_v6 = vsel %vm2829_vm10, %v72_v62, 0  ;;  %vm1719_vm14 = vcmp.eq.s32.totalorder %v12537_v60, %v12285_v3  ;;  %vm88_vm15 = vcmp.eq.s32.totalorder %v12299_v5, 0  ;;  %vm254_vm3 = vcmp.eq.s32.totalorder %v12513_v55, 11 }
  0x3c   :  { %v377_v10 = vsub.f32 %v375_v58, %v376_v2  ;;  %10610 = vmatmul.mubr.f32.vlgmr.msra.gmra.mrb[0].mxu1 %v859_v7  ;;  %v2835_v7 = vsel %vm2833_vm11, %v41_v63, 0  ;;  %vm148_vm10 = vcmp.eq.s32.totalorder %v12299_v5, 4  ;;  %vm163_vm11 = vcmp.eq.s32.totalorder %v12299_v5, 5 }
  0x3d   :  { %10613 = vmatpush3.msra.mxu1 %v12418_v4  ;;  %10614 = vmatprep.mubr.f32.mxu1 %v12385_v44 }
  0x3e   :  { %v378_v12 = vand.u32 4294901760, %v377_v10  ;;  %10617 = vmatprep.subr.mxu1 %v12398_v48 }
  0x40   :  { %10570 = vmatmul.mubr.f32.vlgmr.msra.gmra.mrb[0].mxu0 %v378_v12  ;;  %v12561_v12 = vand.u32 4294901760, %v2831_v6 }
  0x41   :  { %11632 = vmatpush3.bf16.msra.mxu0 %v11631_v11  ;;  %10576 = vmatprep.mubr.msk.f32.mxu0 %vm12220_vm0, %v13731_v1 }
  0x42   :  { %11633 = vmatprep.subr.bf16.mxu0 %v13734_v0 }
  0x44   :  { %10615 = vmatmul.mubr.f32.vlgmr.msra.gmra.mrb[0].mxu1 %v12387_v45 }
  0x45   :  { %10618 = vmatpush3.msra.mxu1 %v12398_v48  ;;  %10619 = vmatprep.mubr.f32.mxu1 %v846_v50 }
  0x46   :  { %10622 = vmatprep.subr.mxu1 %v12376_v39 }
  0x48   :  { %10577 = vmatmul.mubr.msk.f32.vlgmr.msra.gmra.mrb[0].mxu0 %vm296_vm2, %v12407_v52 }
  0x49   :  { %11635 = vmatpush3.bf16.msra.mxu0 %v11634_v14  ;;  %10583 = vmatprep.mubr.msk.f32.mxu0 %vm12220_vm0, %v13731_v1  ;;  %v12563_v14 = vand.u32 4294901760, %v2835_v7 }
  0x4a   :  { %11636 = vmatprep.subr.bf16.mxu0 %v13734_v0 }
  0x4c   :  { %10620 = vmatmul.mubr.f32.vlgmr.msra.gmra.mrb[0].mxu1 %v856_v51 }
  0x4d   :  { %10623 = vmatpush3.msra.mxu1 %v12376_v39  ;;  %10624 = vmatprep.mubr.f32.mxu1 %v847_v56  ;;  %v12516_v56 = vadd.s32 4294967284, %v12513_v55 }
  0x4e   :  { %10627 = vmatprep.subr.mxu1 %v12410_v53 }
  0x4f   :  { %vm288_vm7 = vcmp.eq.s32.totalorder %v12516_v56, %v12285_v3 }
  0x50   :  { %10584 = vmatmul.mubr.f32.vlgmr.msra.gmra.mrb[0].mxu0 %v375_v58  ;;  %v12543_v61 = vsel %vm288_vm7, 1.0, %v13731_v1  ;;  %vm103_vm7 = vcmp.eq.s32.totalorder %v12299_v5, 1 }
  0x51   :  { %11638 = vmatpush3.bf16.msra.mxu0 %v12338_v20  ;;  %10590 = vmatprep.mubr.msk.f32.mxu0 %vm12220_vm0, %v13731_v1 }
  0x52   :  { %11639 = vmatprep.subr.bf16.mxu0 %v13734_v0 }
  0x54   :  { %10625 = vmatmul.mubr.f32.vlgmr.msra.gmra.mrb[0].mxu1 %v857_v57  ;;  %v217_v57 = vsel %vm209_vm4, %v215_v29, %v12516_v56  ;;  %v10009_v29 = vadd.s32 4294967284, %v12537_v60 }
  0x55   :  { %10628 = vmatpush3.msra.mxu1 %v12410_v53  ;;  %10629 = vmatprep.mubr.f32.mxu1 %v12385_v44  ;;  %v232_v58 = vsel %vm224_vm5, %v230_v30, %v217_v57  ;;  %v1731_v30 = vsel %vm1726_vm8, %v12543_v61, 0 }
  0x56   :  { %10632 = vmatprep.subr.mxu1 %v12376_v39  ;;  %vm268_vm9 = vcmp.eq.s32.totalorder %v10009_v29, %v12285_v3 }
  0x58   :  { %10591 = vmatmul.mubr.f32.vlgmr.msra.gmra.mrb[0].mxu0 %v376_v2  ;;  %v12554_v2 = vsub.f32 %v1731_v30, %v1731_v30 }
  0x59   :  { %11641 = vmatpush3.bf16.msra.mxu0 %v11640_v15  ;;  %10597 = vmatprep.mubr.msk.f32.mxu0 %vm12220_vm0, %v13731_v1 }
  0x5a   :  { %11642 = vmatprep.subr.bf16.mxu0 %v13734_v0  ;;  %v1814_v10 = vand.u32 4294901760, %v12554_v2 }
  0x5c   :  { %10630 = vmatmul.mubr.f32.vlgmr.msra.gmra.mrb[0].mxu1 %v12387_v45 }
  0x5d   :  { %10633 = vmatpush3.msra.mxu1 %v12376_v39  ;;  %10634 = vmatprep.mubr.f32.mxu1 %v12385_v44 }
  0x5e   :  { %10637 = vmatprep.subr.mxu1 %v13731_v1 }
  0x60   :  { %10598 = vmatmul.mubr.msk.f32.vlgmr.msra.gmra.mrb[0].mxu0 %vm296_vm2, %v12407_v52 }
  0x61   :  { %11644 = vmatpush3.bf16.msra.mxu0 %v12338_v20  ;;  %10604 = vmatprep.mubr.msk.f32.mxu0 %vm12220_vm0, %v13731_v1 }
  0x62   :  { %10678 = vmatprep.subr.mxu0 %v13731_v1 }
  0x64   :  { %10635 = vmatmul.mubr.f32.vlgmr.msra.gmra.mrb[0].mxu1 %v12387_v45 }
  0x65   :  { %10638 = vmatpush3.msra.mxu1 %v12376_v39  ;;  %10639 = vmatprep.mubr.msk.f32.mxu1 %vm12220_vm0, %v13731_v1 }
  0x66   :  { %10642 = vmatprep.subr.mxu1 %v13731_v1 }
  0x68   :  { %10605 = vmatmul.mubr.msk.f32.vlgmr.msra.gmra.mrb[0].mxu0 %vm296_vm2, %v12407_v52 }
  0x69   :  { %10680 = vmatprep.mubr.msk.f32.mxu0 %vm12220_vm0, %v13731_v1 }
  0xc5   :  { %v299_v18 = vpop.xlane.xlu0 %298 }
  0xc6   :  { %v766_v20 = vmax.f32 %v299_v18, 1.0  ;;  %v1815_v18 = vsub.f32 %v12554_v2, %v1814_v10 }
  0xc8   :  { %12127 = vrcp.f32 %v766_v20 }
  0xd2   :  { %v12128_v21 = vpop.eup %12127 }
 0x137   :  { %v10636_v22 = vpop.f32.mrb[0].mxu1 }
 0x138   :  { %v2278_v24 = vsel %vm303_vm1, %v10636_v22, 0  ;;  %v1258_v25 = vpop.f32.mrb[1].mxu1 }
 0x139   :  { %v2284_v28 = vand.u32 4294901760, %v2278_v24  ;;  %v2281_v31 = vand.u32 4294901760, %v1258_v25 }
 0x13b   :  { %v762_v27 = vpop.f32.mrb[0].mxu0  ;;  %v12473_v35 = vsub.f32 %v2278_v24, %v2284_v28  ;;  %v12475_v36 = vpack.c.bf16 %v2284_v28, %v2281_v31  ;;  %v12477_v38 = vsub.f32 %v1258_v25, %v2281_v31  ;;  %v2915_v25 = vsub.f32 %v2835_v7, %v12563_v14 }
 0x13c   :  { %v768_v32 = vmul.f32 %v12128_v21, %v762_v27  ;;  %v10606_v34 = vpop.f32.mrb[1].mxu0  ;;  %v2904_v21 = vsub.f32 %v2831_v6, %v12561_v12  ;;  %v1816_v28 = vand.u32 4294901760, %v1815_v18 }
 0x13d   :  { %v11652_v42 = vpack.c.bf16 %v12473_v35, %v12477_v38  ;;  %v2387_v47 = vand.u32 4294901760, %v12473_v35 }
 0x13e   :  { %v1269_v40 = vsel %vm769_vm6, %v768_v32, 0  ;;  %vm239_vm6 = vcmp.eq.s32.totalorder %v12513_v55, 10  ;;  %v2905_v32 = vand.u32 4294901760, %v2904_v21 }
 0x13f   :  { %v1337_v41 = vand.u32 4294901760, %v1269_v40  ;;  %v2388_v49 = vsub.f32 %v12473_v35, %v2387_v47  ;;  %v12534_v59 = vsel %vm239_vm6, %v245_v33, %v232_v58  ;;  %v12549_v33 = vsel %vm268_vm9, 1.0, %v13731_v1 }
 0x140   :  { %v12679_v58 = vsel %vm1719_vm14, 1.0, %v13731_v1  ;;  %v10007_v35 = vadd.s32 4294967284, %v12299_v5  ;;  %vm133_vm9 = vcmp.eq.s32.totalorder %v12299_v5, 3 }
 0x141   :  { %v1338_v43 = vsub.f32 %v1269_v40, %v1337_v41  ;;  %v2916_v40 = vand.u32 4294901760, %v2915_v25  ;;  %v2275_v30 = vsel %vm296_vm2, %v12679_v58, 0 }
 0x143   :  { %v1339_v44 = vand.u32 4294901760, %v1338_v43 }
 0x145   :  { %v1340_v45 = vsub.f32 %v1338_v43, %v1339_v44 }
 0x147   :  { %v1341_v46 = vand.u32 4294901760, %v1340_v45 }
 0x149   :  { %10640 = vmatmul.mubr.f32.vlgmr.msra.gmra.mrb[2].mxu1 %v1341_v46  ;;  %v2917_v46 = vsub.f32 %v2915_v25, %v2916_v40 }
 0x14a   :  { %10643 = vmatpush3.msra.mxu1 %v12418_v4  ;;  %10644 = vmatprep.mubr.msk.f32.mxu1 %vm12220_vm0, %v13731_v1  ;;  %v1734_v4 = vsel %vm1726_vm8, %v12549_v33, 0 }
 0x14b   :  { %10647 = vmatprep.subr.mxu1 %v13731_v1  ;;  %v12559_v11 = vsub.f32 %v1734_v4, %v1734_v4 }
 0x14d   :  { %v12569_v20 = vand.u32 4294901760, %v12559_v11 }
 0x14f   :  { %v1825_v31 = vsub.f32 %v12559_v11, %v12569_v20 }
 0x151   :  { %10645 = vmatmul.mubr.f32.vlgmr.msra.gmra.mrb[2].mxu1 %v1337_v41 }
 0x152   :  { %10648 = vmatpush3.msra.mxu1 %v12398_v48  ;;  %10649 = vmatprep.mubr.msk.f32.mxu1 %vm12220_vm0, %v13731_v1  ;;  %v2380_v48 = vand.u32 4294901760, %v12477_v38 }
 0x153   :  { %10652 = vmatprep.subr.mxu1 %v13731_v1 }
 0x154   :  { %v2381_v50 = vsub.f32 %v12477_v38, %v2380_v48  ;;  %v12775_v38 = vsel %vm254_vm3, %v260_v37, %v12534_v59 }
 0x156   :  { %v2382_v51 = vand.u32 4294901760, %v2381_v50 }
 0x159   :  { %10650 = vmatmul.mubr.f32.vlgmr.msra.gmra.mrb[2].mxu1 %v1338_v43  ;;  %v12585_v43 = vand.u32 4294901760, %v1825_v31 }
 0x15a   :  { %10653 = vmatpush3.msra.mxu1 %v12376_v39  ;;  %10654 = vmatprep.mubr.msk.f32.mxu1 %vm12220_vm0, %v13731_v1 }
 0x15b   :  { %10657 = vmatprep.subr.mxu1 %v13731_v1 }
 0x161   :  { %10655 = vmatmul.mubr.f32.vlgmr.msra.gmra.mrb[2].mxu1 %v1339_v44  ;;  %v2906_v44 = vsub.f32 %v2904_v21, %v2905_v32 }
 0x162   :  { %10658 = vmatpush3.msra.mxu1 %v12410_v53  ;;  %10659 = vmatprep.mubr.msk.f32.mxu1 %vm12220_vm0, %v13731_v1  ;;  %v12508_v53 = vpack.c.bf16 %v2387_v47, %v2380_v48  ;;  %v2918_v48 = vand.u32 4294901760, %v2917_v46 }
 0x163   :  { %10662 = vmatprep.subr.mxu1 %v13731_v1  ;;  %v2907_v47 = vand.u32 4294901760, %v2906_v44 }
 0x169   :  { %10660 = vmatmul.mubr.f32.vlgmr.msra.gmra.mrb[2].mxu1 %v1337_v41 }
 0x16a   :  { %10663 = vmatpush3.msra.mxu1 %v12376_v39  ;;  %10664 = vmatprep.mubr.msk.f32.mxu1 %vm12220_vm0, %v13731_v1  ;;  %v2389_v39 = vand.u32 4294901760, %v2388_v49  ;;  %v12652_v49 = vsel %vm1717_vm12, 1.0, %v13731_v1  ;;  %vm178_vm12 = vcmp.eq.s32.totalorder %v12299_v5, 6 }
 0x16b   :  { %10667 = vmatprep.subr.mxu1 %v13731_v1  ;;  %v2269_v50 = vsel %vm296_vm2, %v12652_v49, 0 }
 0x16c   :  { %v12510_v54 = vpack.c.bf16 %v2389_v39, %v2382_v51  ;;  %v12665_v39 = vsel %vm1718_vm13, 1.0, %v13731_v1  ;;  %v2348_v51 = vsub.f32 %v2269_v50, %v2269_v50  ;;  %vm193_vm13 = vcmp.eq.s32.totalorder %v12299_v5, 7 }
 0x16d   :  { %v2272_v57 = vsel %vm296_vm2, %v12665_v39, 0 }
 0x16e   :  { %v2349_v60 = vand.u32 4294901760, %v2348_v51  ;;  %v2358_v29 = vsub.f32 %v2272_v57, %v2272_v57 }
 0x170   :  { %v2350_v62 = vsub.f32 %v2348_v51, %v2349_v60  ;;  %v2359_v63 = vand.u32 4294901760, %v2358_v29 }
 0x171   :  { %10665 = vmatmul.mubr.f32.vlgmr.msra.gmra.mrb[2].mxu1 %v1337_v41 }
 0x172   :  { %10669 = vmatprep.mubr.msk.f32.mxu1 %vm12220_vm0, %v13731_v1  ;;  %v2351_v4 = vand.u32 4294901760, %v2350_v62  ;;  %v2360_v6 = vsub.f32 %v2358_v29, %v2359_v63 }
 0x244   :  { %v1713_v15 = vpop.f32.mrb[2].mxu1 }
 0x245   :  { %v12572_v22 = vand.u32 4294901760, %v1713_v15  ;;  %v10666_v24 = vpop.f32.mrb[3].mxu1 }
 0x247   :  { %v1834_v27 = vsub.f32 %v1713_v15, %v12572_v22  ;;  %10668 = vmatpush3.msra.mxu1 %v12572_v22 }
 0x248   :  { %10670 = vmatmul.mubr.f32.vlgmr.msra.gmra.mrb[4].mxu1 %v13731_v1  ;;  %10811 = vmatprep.subr.mxu1 %v13731_v1 }
 0x249   :  { %v1835_v34 = vand.u32 4294901760, %v1834_v27  ;;  %10672 = vmatprep.mubr.msk.f32.mxu1 %vm12220_vm0, %v13731_v1  ;;  %10812 = vmatpush3.msra.mxu1 %v12563_v14 }
 0x24a   :  { %10816 = vmatprep.subr.mxu1 %v13731_v1 }
 0x24b   :  { %v1836_v41 = vsub.f32 %v1834_v27, %v1835_v34 }
 0x24c   :  { %10673 = vmatmul.mubr.f32.gmra.mrb[6].mxu1 %v1816_v28  ;;  %v151_v28 = vstv %s10018_s9 }
 0x24d   :  { %v1837_v45 = vand.u32 4294901760, %v1836_v41  ;;  %10675 = vmatprep.mubr.msk.f32.mxu1 %vm12220_vm0, %v13731_v1  ;;  %v181_v41 = vstv %s10022_s12 }
 0x24f   :  { %10679 = vmatpush3.msra.mxu0 %v1837_v45  ;;  %v226_v45 = vstv %s10028_s13 }
 0x250   :  { %10676 = vmatmul.mubr.f32.gmra.mrb[8].mxu1 %v12585_v43  ;;  %10681 = vmatmul.mubr.f32.vlgmr.msra.gmra.mrb[2].mxu0 %v13731_v1 }
 0x251   :  { %10689 = vmatprep.subr.mxu0 %v13731_v1  ;;  %10683 = vmatprep.mubr.msk.f32.mxu0 %vm12220_vm0, %v13731_v1 }
 0x252   :  { %10690 = vmatpush3.msra.mxu0 %v1834_v27  ;;  %10813 = vmatprep.mubr.msk.f32.mxu1 %vm12220_vm0, %v13731_v1 }
 0x253   :  { %10700 = vmatprep.subr.mxu0 %v13731_v1 }
 0x254   :  { %10684 = vmatmul.mubr.msk.f32.gmra.mrb[4].mxu0 %vm1726_vm8, %v12543_v61  ;;  %10814 = vmatmul.mubr.f32.vlgmr.msra.gmra.mrb[10].mxu1 %v2907_v47  ;;  %v196_v47 = vstv %s10024_s14 }
 0x255   :  { %10686 = vmatprep.mubr.msk.f32.mxu0 %vm12220_vm0, %v13731_v1  ;;  %10817 = vmatpush3.msra.mxu1 %v2918_v48 }
 0x256   :  { %10818 = vmatprep.mubr.msk.f32.mxu1 %vm12220_vm0, %v13731_v1  ;;  %10821 = vmatprep.subr.mxu1 %v13731_v1 }
 0x258   :  { %10687 = vmatmul.mubr.msk.f32.gmra.mrb[6].mxu0 %vm1726_vm8, %v12549_v33 }
 0x259   :  { %10691 = vmatprep.mubr.msk.f32.mxu0 %vm12220_vm0, %v13731_v1 }
 0x25c   :  { %10692 = vmatmul.mubr.f32.vlgmr.msra.gmra.mrb[2].mxu0 %v13731_v1  ;;  %10819 = vmatmul.mubr.f32.vlgmr.msra.gmra.mrb[10].mxu1 %v12561_v12 }
 0x25d   :  { %10701 = vmatpush3.msra.mxu0 %v12572_v22  ;;  %10694 = vmatprep.mubr.msk.f32.mxu0 %vm12220_vm0, %v13731_v1 }
 0x25e   :  { %10822 = vmatpush3.msra.mxu1 %v2915_v25  ;;  %10823 = vmatprep.mubr.msk.f32.mxu1 %vm12220_vm0, %v13731_v1  ;;  %v136_v25 = vstv %s10016_s8 }
 0x25f   :  { %10711 = vmatprep.subr.mxu0 %v13731_v1  ;;  %10826 = vmatprep.subr.mxu1 %v13731_v1 }
 0x260   :  { %10695 = vmatmul.mubr.f32.gmra.mrb[4].mxu0 %v12554_v2  ;;  %v2368_v2 = vsub.f32 %v2275_v30, %v2275_v30 }
 0x261   :  { %10697 = vmatprep.mubr.msk.f32.mxu0 %vm12220_vm0, %v13731_v1 }
 0x262   :  { %v2369_v7 = vand.u32 4294901760, %v2368_v2 }
 0x264   :  { %10698 = vmatmul.mubr.f32.gmra.mrb[6].mxu0 %v12559_v11  ;;  %10824 = vmatmul.mubr.f32.vlgmr.msra.gmra.mrb[10].mxu1 %v2904_v21  ;;  %v106_v21 = vstv %s10012_s30 }
 0x265   :  { %10702 = vmatprep.mubr.msk.f32.mxu0 %vm12220_vm0, %v13731_v1  ;;  %10827 = vmatpush3.msra.mxu1 %v12563_v14 }
 0x266   :  { %10828 = vmatprep.mubr.msk.f32.mxu1 %vm12220_vm0, %v13731_v1  ;;  %10831 = vmatprep.subr.mxu1 %v13731_v1 }
 0x268   :  { %10703 = vmatmul.mubr.f32.vlgmr.msra.gmra.mrb[2].mxu0 %v13731_v1 }
 0x269   :  { %10712 = vmatpush3.msra.mxu0 %v1835_v34  ;;  %10705 = vmatprep.mubr.msk.f32.mxu0 %vm12220_vm0, %v13731_v1  ;;  %v211_v34 = vstv %s10026_s11 }
 0x26a   :  { %10722 = vmatprep.subr.mxu0 %v13731_v1  ;;  %v213_v44 = vsel %vm209_vm4, %v211_v34, %v12516_v56 }
 0x26b   :  { %v228_v48 = vsel %vm224_vm5, %v226_v45, %v213_v44 }
 0x26c   :  { %10706 = vmatmul.mubr.f32.gmra.mrb[4].mxu0 %v1814_v10  ;;  %10829 = vmatmul.mubr.f32.vlgmr.msra.gmra.mrb[10].mxu1 %v2905_v32  ;;  %v2361_v10 = vand.u32 4294901760, %v2360_v6  ;;  %v166_v32 = vstv %s10020_s10 }
 0x26d   :  { %10708 = vmatprep.mubr.msk.f32.mxu0 %vm12220_vm0, %v13731_v1  ;;  %10832 = vmatpush3.msra.mxu1 %v2916_v40 }
 0x26e   :  { %10833 = vmatprep.mubr.msk.f32.mxu1 %vm12220_vm0, %v13731_v1  ;;  %10836 = vmatprep.subr.mxu1 %v13731_v1 }
 0x270   :  { %10709 = vmatmul.mubr.f32.gmra.mrb[6].mxu0 %v12569_v20 }
 0x271   :  { %10713 = vmatprep.mubr.msk.f32.mxu0 %vm12220_vm0, %v13731_v1 }
 0x274   :  { %10714 = vmatmul.mubr.f32.vlgmr.msra.gmra.mrb[2].mxu0 %v13731_v1  ;;  %10834 = vmatmul.mubr.f32.vlgmr.msra.gmra.mrb[10].mxu1 %v12561_v12 }
 0x275   :  { %10723 = vmatpush3.msra.mxu0 %v12572_v22  ;;  %10716 = vmatprep.mubr.msk.f32.mxu0 %vm12220_vm0, %v13731_v1  ;;  %v121_v22 = vstv %s10014_s7 }
 0x276   :  { %10837 = vmatpush3.msra.mxu1 %v12563_v14  ;;  %10838 = vmatprep.mubr.msk.f32.mxu1 %vm12220_vm0, %v13731_v1  ;;  %v91_v14 = vstv %s86_s3 }
 0x277   :  { %11645 = vmatprep.subr.bf16.mxu0 %v13734_v0  ;;  %10841 = vmatprep.subr.mxu1 %v13731_v1  ;;  %v92_v18 = vsel %vm88_vm15, %v91_v14, %v10007_v35 }
 0x278   :  { %10717 = vmatmul.mubr.msk.f32.gmra.mrb[4].mxu0 %vm1726_vm8, %v12543_v61 }
 0x279   :  { %10719 = vmatprep.mubr.msk.f32.mxu0 %vm12220_vm0, %v13731_v1 }
 0x27c   :  { %10720 = vmatmul.mubr.msk.f32.gmra.mrb[6].mxu0 %vm1726_vm8, %v12549_v33  ;;  %10839 = vmatmul.mubr.f32.vlgmr.msra.gmra.mrb[10].mxu1 %v12561_v12  ;;  %v2370_v12 = vsub.f32 %v2368_v2, %v2369_v7 }
 0x27d   :  { %10724 = vmatprep.mubr.msk.f32.mxu0 %vm12220_vm0, %v13731_v1  ;;  %10843 = vmatprep.mubr.msk.f32.mxu1 %vm12220_vm0, %v13731_v1 }
 0x280   :  { %10725 = vmatmul.mubr.f32.vlgmr.msra.gmra.mrb[2].mxu0 %v13731_v1 }
 0x281   :  { %11647 = vmatpush3.bf16.msra.mxu0 %v12475_v36  ;;  %10727 = vmatprep.mubr.msk.f32.mxu0 %vm12220_vm0, %v13731_v1 }
 0x282   :  { %11648 = vmatprep.subr.bf16.mxu0 %v13734_v0 }
 0x284   :  { %10728 = vmatmul.mubr.msk.f32.gmra.mrb[4].mxu0 %vm1726_vm8, %v12543_v61  ;;  %v2371_v61 = vand.u32 4294901760, %v2370_v12 }
 0x285   :  { %10730 = vmatprep.mubr.msk.f32.mxu0 %vm12220_vm0, %v13731_v1 }
 0x288   :  { %10731 = vmatmul.mubr.msk.f32.gmra.mrb[6].mxu0 %vm1726_vm8, %v12549_v33 }
 0x289   :  { %10737 = vmatprep.mubr.msk.f32.mxu0 %vm12220_vm0, %v13731_v1 }
 0x28c   :  { %10738 = vmatmul.mubr.f32.vlgmr.msra.gmra.mrb[2].mxu0 %v2351_v4 }
 0x28d   :  { %11650 = vmatpush3.bf16.msra.mxu0 %v12510_v54  ;;  %10740 = vmatprep.mubr.msk.f32.mxu0 %vm12220_vm0, %v13731_v1 }
 0x28e   :  { %11651 = vmatprep.subr.bf16.mxu0 %v13734_v0 }
 0x290   :  { %10741 = vmatmul.mubr.f32.gmra.mrb[4].mxu0 %v2361_v10 }
 0x291   :  { %10743 = vmatprep.mubr.msk.f32.mxu0 %vm12220_vm0, %v13731_v1 }
 0x294   :  { %10744 = vmatmul.mubr.f32.gmra.mrb[6].mxu0 %v2371_v61 }
 0x295   :  { %10750 = vmatprep.mubr.msk.f32.mxu0 %vm12220_vm0, %v13731_v1 }
 0x298   :  { %10751 = vmatmul.mubr.msk.f32.vlgmr.msra.gmra.mrb[2].mxu0 %vm296_vm2, %v12652_v49 }
 0x299   :  { %11653 = vmatpush3.bf16.msra.mxu0 %v11652_v42  ;;  %10753 = vmatprep.mubr.msk.f32.mxu0 %vm12220_vm0, %v13731_v1 }
 0x29a   :  { %11654 = vmatprep.subr.bf16.mxu0 %v13734_v0 }
 0x29c   :  { %10754 = vmatmul.mubr.msk.f32.gmra.mrb[4].mxu0 %vm296_vm2, %v12665_v39 }
 0x29d   :  { %10756 = vmatprep.mubr.msk.f32.mxu0 %vm12220_vm0, %v13731_v1 }
 0x2a0   :  { %10757 = vmatmul.mubr.msk.f32.gmra.mrb[6].mxu0 %vm296_vm2, %v12679_v58 }
 0x2a1   :  { %10763 = vmatprep.mubr.msk.f32.mxu0 %vm12220_vm0, %v13731_v1 }
 0x2a4   :  { %10764 = vmatmul.mubr.f32.vlgmr.msra.gmra.mrb[2].mxu0 %v2348_v51  ;;  %v256_v51 = vstv %s10032_s16 }
 0x2a5   :  { %11656 = vmatpush3.bf16.msra.mxu0 %v12475_v36  ;;  %10766 = vmatprep.mubr.msk.f32.mxu0 %vm12220_vm0, %v13731_v1 }
 0x2a6   :  { %11657 = vmatprep.subr.bf16.mxu0 %v13734_v0 }
 0x2a8   :  { %10767 = vmatmul.mubr.f32.gmra.mrb[4].mxu0 %v2358_v29 }
 0x2a9   :  { %10769 = vmatprep.mubr.msk.f32.mxu0 %vm12220_vm0, %v13731_v1 }
 0x2ac   :  { %10770 = vmatmul.mubr.f32.gmra.mrb[6].mxu0 %v2368_v2 }
 0x2ad   :  { %10776 = vmatprep.mubr.msk.f32.mxu0 %vm12220_vm0, %v13731_v1 }
 0x2b0   :  { %10777 = vmatmul.mubr.f32.vlgmr.msra.gmra.mrb[2].mxu0 %v2349_v60 }
 0x2b1   :  { %11659 = vmatpush3.bf16.msra.mxu0 %v12508_v53  ;;  %10779 = vmatprep.mubr.msk.f32.mxu0 %vm12220_vm0, %v13731_v1 }
 0x2b2   :  { %11660 = vmatprep.subr.bf16.mxu0 %v13734_v0 }
 0x2b4   :  { %10780 = vmatmul.mubr.f32.gmra.mrb[4].mxu0 %v2359_v63  ;;  %v10064_v63 = vld [vmem:[#allocation5 + $0x8] ss:$0 sm:$0xff] }
 0x2b5   :  { %10782 = vmatprep.mubr.msk.f32.mxu0 %vm12220_vm0, %v13731_v1 }
 0x2b8   :  { %10783 = vmatmul.mubr.f32.gmra.mrb[6].mxu0 %v2369_v7 }
 0x2b9   :  { %10789 = vmatprep.mubr.msk.f32.mxu0 %vm12220_vm0, %v13731_v1 }
 0x2bc   :  { %10790 = vmatmul.mubr.msk.f32.vlgmr.msra.gmra.mrb[2].mxu0 %vm296_vm2, %v12652_v49 }
 0x2bd   :  { %11662 = vmatpush3.bf16.msra.mxu0 %v12475_v36  ;;  %10792 = vmatprep.mubr.msk.f32.mxu0 %vm12220_vm0, %v13731_v1  ;;  %v96_v36 = vsel %vm88_vm15, %v95_v8, %v10007_v35 }
 0x2be   :  { %10940 = vmatprep.subr.mxu0 %v13731_v1  ;;  %v111_v42 = vsel %vm103_vm7, %v110_v9, %v96_v36 }
 0x2c0   :  { %10793 = vmatmul.mubr.msk.f32.gmra.mrb[4].mxu0 %vm296_vm2, %v12665_v39 }
 0x2c1   :  { %10795 = vmatprep.mubr.msk.f32.mxu0 %vm12220_vm0, %v13731_v1 }
 0x2c4   :  { %10796 = vmatmul.mubr.msk.f32.gmra.mrb[6].mxu0 %vm296_vm2, %v12679_v58 }
 0x2c5   :  { %10802 = vmatprep.mubr.msk.f32.mxu0 %vm12220_vm0, %v13731_v1 }
 0x2c8   :  { %10803 = vmatmul.mubr.msk.f32.vlgmr.msra.gmra.mrb[2].mxu0 %vm296_vm2, %v12652_v49  ;;  %v241_v49 = vstv %s10030_s15 }
 0x2c9   :  { %10805 = vmatprep.mubr.msk.f32.mxu0 %vm12220_vm0, %v13731_v1 }
 0x2cc   :  { %10806 = vmatmul.mubr.msk.f32.gmra.mrb[4].mxu0 %vm296_vm2, %v12665_v39  ;;  %v243_v39 = vsel %vm239_vm6, %v241_v49, %v228_v48  ;;  %vm276_vm6 = vcmp.eq.s32.totalorder %v12775_v38, %v12285_v3 }
 0x2cd   :  { %10808 = vmatprep.mubr.msk.f32.mxu0 %vm12220_vm0, %v13731_v1  ;;  %v258_v56 = vsel %vm254_vm3, %v256_v51, %v243_v39 }
 0x2ce   :  { %vm267_vm4 = vcmp.eq.s32.totalorder %v258_v56, %v12285_v3 }
 0x2cf   :  { %v12852_v60 = vsel %vm267_vm4, 1.0, %v13731_v1 }
 0x2d0   :  { %10809 = vmatmul.mubr.msk.f32.gmra.mrb[6].mxu0 %vm296_vm2, %v12679_v58  ;;  %vm118_vm2 = vcmp.eq.s32.totalorder %v12299_v5, 2  ;;  %v3287_v30 = vsel %vm1726_vm8, %v12852_v60, 0 }
 0x2d1   :  { %10942 = vmatprep.mubr.msk.f32.mxu0 %vm12220_vm0, %v13731_v1  ;;  %v126_v53 = vsel %vm118_vm2, %v125_v13, %v111_v42  ;;  %v12861_v55 = vsub.f32 %v3287_v30, %v3287_v30 }
 0x2d2   :  { %v141_v8 = vsel %vm133_vm9, %v140_v16, %v126_v53 }
 0x2d3   :  { %v156_v37 = vsel %vm148_vm10, %v155_v17, %v141_v8  ;;  %v12866_v4 = vand.u32 4294901760, %v12861_v55 }
 0x2d4   :  { %v171_v9 = vsel %vm163_vm11, %v170_v19, %v156_v37 }
 0x2d5   :  { %v186_v13 = vsel %vm178_vm12, %v185_v23, %v171_v9  ;;  %v3371_v61 = vsub.f32 %v12861_v55, %v12866_v4 }
 0x2d6   :  { %v12811_v16 = vsel %vm193_vm13, %v200_v26, %v186_v13  ;;  %v107_v26 = vsel %vm103_vm7, %v106_v21, %v92_v18  ;;  %vm4391_vm7 = vcmask 523264  }
 0x2d7   :  { %v122_v24 = vsel %vm118_vm2, %v121_v22, %v107_v26  ;;  %v12874_v42 = vand.u32 4294901760, %v3371_v61  ;;  %vm275_vm5 = vcmp.eq.s32.totalorder %v12811_v16, %v12285_v3  ;;  %v12969_v22 = vsel %vm276_vm6, 1.0, %v13731_v1 }
 0x2d8   :  { %v137_v27 = vsel %vm133_vm9, %v136_v25, %v122_v24  ;;  %v3832_v24 = vsel %vm1726_vm8, %v12969_v22, 0 }
 0x2d9   :  { %v152_v31 = vsel %vm148_vm10, %v151_v28, %v137_v27  ;;  %v12978_v16 = vsub.f32 %v3832_v24, %v3832_v24  ;;  %vm4398_vm10 = vcmask 519168  }
 0x2da   :  { %v167_v40 = vsel %vm163_vm11, %v166_v32, %v152_v31  ;;  %vm4426_vm11 = vcmask 60416  }
 0x2db   :  { %v182_v46 = vsel %vm178_vm12, %v181_v41, %v167_v40  ;;  %v12983_v38 = vand.u32 4294901760, %v12978_v16  ;;  %vm4460_vm12 = vcmask 162816  }
 0x2dc   :  { %v197_v50 = vsel %vm193_vm13, %v196_v47, %v182_v46  ;;  %v13060_v47 = vld [vmem:[#allocation5 + $0x60] ss:$0 sm:$0xff]  ;;  %vm7131_vm13 = vcmask 15360  }
 0x2dd   :  { %vm266_vm14 = vcmp.eq.s32.totalorder %v197_v50, %v12285_v3  ;;  %v3916_v32 = vsub.f32 %v12978_v16, %v12983_v38 }
 0x2de   :  { %v12846_v57 = vsel %vm266_vm14, 1.0, %v13731_v1  ;;  %vm7135_vm14 = vcmask 1041408  }
 0x2df   :  { %v3284_v58 = vsel %vm1726_vm8, %v12846_v57, 0  ;;  %v12991_v41 = vand.u32 4294901760, %v3916_v32 }
 0x2e0   :  { %v12854_v29 = vsub.f32 %v3284_v58, %v3284_v58 }
 0x2e2   :  { %v12859_v62 = vand.u32 4294901760, %v12854_v29 }
 0x2e4   :  { %v3361_v2 = vsub.f32 %v12854_v29, %v12859_v62 }
 0x2e6   :  { %v12868_v12 = vand.u32 4294901760, %v3361_v2 }
 0x31b   :  { %v12813_v17 = vpop.f32.mrb[4].mxu1 }
 0x31c   :  { %v10671_v54 = vpop.f32.mrb[5].mxu1 }
 0x31f   :  { %v12815_v59 = vpop.f32.mrb[6].mxu1 }
 0x320   :  { %v10674_v19 = vpop.f32.mrb[7].mxu1 }
 0x323   :  { %v12817_v15 = vpop.f32.mrb[8].mxu1 }
 0x324   :  { %v10677_v23 = vpop.f32.mrb[9].mxu1 }
 0x34f   :  { %v3279_v6 = vpop.f32.mrb[10].mxu1 }
 0x350   :  { %v11882_v7 = vadd.f32 %v10064_v63, %v3279_v6  ;;  %v10840_v10 = vpop.f32.mrb[11].mxu1 }
 0x352   :  { %v3293_v35 = vand.u32 4294901760, %v11882_v7  ;;  %3825 = vrot.lane.b32.xlu0 %v11882_v7, %s12222_s17 }
 0x354   :  { %v3390_v36 = vsub.f32 %v11882_v7, %v3293_v35  ;;  %10842 = vmatpush3.msra.mxu1 %v3293_v35 }
 0x355   :  { %10844 = vmatmul.mubr.f32.vlgmr.msra.gmra.mrb[12].mxu1 %v12868_v12  ;;  %10852 = vmatprep.subr.mxu1 %v13731_v1 }
 0x356   :  { %v3391_v53 = vand.u32 4294901760, %v3390_v36  ;;  %10846 = vmatprep.mubr.msk.f32.mxu1 %vm12220_vm0, %v13731_v1 }
 0x358   :  { %v3392_v8 = vsub.f32 %v3390_v36, %v3391_v53 }
 0x359   :  { %10847 = vmatmul.mubr.f32.gmra.mrb[14].mxu1 %v12874_v42 }
 0x35a   :  { %10849 = vmatprep.mubr.msk.f32.mxu1 %vm12220_vm0, %v13731_v1  ;;  %v3393_v37 = vand.u32 4294901760, %v3392_v8 }
 0x35c   :  { %10853 = vmatpush3.msra.mxu1 %v3393_v37 }
 0x35d   :  { %10850 = vmatmul.mubr.f32.gmra.mrb[16].mxu1 %v12585_v43  ;;  %10863 = vmatprep.subr.mxu1 %v13731_v1 }
 0x35e   :  { %10854 = vmatprep.mubr.msk.f32.mxu1 %vm12220_vm0, %v13731_v1 }
 0x361   :  { %10855 = vmatmul.mubr.msk.f32.vlgmr.msra.gmra.mrb[12].mxu1 %vm1726_vm8, %v12846_v57 }
 0x362   :  { %10864 = vmatpush3.msra.mxu1 %v3390_v36  ;;  %10857 = vmatprep.mubr.msk.f32.mxu1 %vm12220_vm0, %v13731_v1 }
 0x363   :  { %10874 = vmatprep.subr.mxu1 %v13731_v1 }
 0x365   :  { %10858 = vmatmul.mubr.msk.f32.gmra.mrb[14].mxu1 %vm1726_vm8, %v12852_v60 }
 0x366   :  { %10860 = vmatprep.mubr.msk.f32.mxu1 %vm12220_vm0, %v13731_v1 }
 0x369   :  { %10861 = vmatmul.mubr.msk.f32.gmra.mrb[16].mxu1 %vm1726_vm8, %v12549_v33 }
 0x36a   :  { %10865 = vmatprep.mubr.msk.f32.mxu1 %vm12220_vm0, %v13731_v1 }
 0x36d   :  { %10866 = vmatmul.mubr.f32.vlgmr.msra.gmra.mrb[12].mxu1 %v12854_v29 }
 0x36e   :  { %10875 = vmatpush3.msra.mxu1 %v3293_v35  ;;  %10868 = vmatprep.mubr.msk.f32.mxu1 %vm12220_vm0, %v13731_v1 }
 0x36f   :  { %10885 = vmatprep.subr.mxu1 %v13731_v1 }
 0x371   :  { %10869 = vmatmul.mubr.f32.gmra.mrb[14].mxu1 %v12861_v55 }
 0x372   :  { %10871 = vmatprep.mubr.msk.f32.mxu1 %vm12220_vm0, %v13731_v1 }
 0x375   :  { %10872 = vmatmul.mubr.f32.gmra.mrb[16].mxu1 %v12559_v11 }
 0x376   :  { %10876 = vmatprep.mubr.msk.f32.mxu1 %vm12220_vm0, %v13731_v1 }
 0x379   :  { %10877 = vmatmul.mubr.f32.vlgmr.msra.gmra.mrb[12].mxu1 %v12859_v62 }
 0x37a   :  { %10886 = vmatpush3.msra.mxu1 %v3391_v53  ;;  %10879 = vmatprep.mubr.msk.f32.mxu1 %vm12220_vm0, %v13731_v1 }
 0x37b   :  { %10896 = vmatprep.subr.mxu1 %v13731_v1 }
 0x37d   :  { %10880 = vmatmul.mubr.f32.gmra.mrb[14].mxu1 %v12866_v4 }
 0x37e   :  { %10882 = vmatprep.mubr.msk.f32.mxu1 %vm12220_vm0, %v13731_v1 }
 0x381   :  { %10883 = vmatmul.mubr.f32.gmra.mrb[16].mxu1 %v12569_v20 }
 0x382   :  { %10887 = vmatprep.mubr.msk.f32.mxu1 %vm12220_vm0, %v13731_v1 }
 0x385   :  { %10888 = vmatmul.mubr.msk.f32.vlgmr.msra.gmra.mrb[12].mxu1 %vm1726_vm8, %v12846_v57 }
 0x386   :  { %10897 = vmatpush3.msra.mxu1 %v3293_v35  ;;  %10890 = vmatprep.mubr.msk.f32.mxu1 %vm12220_vm0, %v13731_v1 }
 0x387   :  { %10907 = vmatprep.subr.mxu1 %v13731_v1 }
 0x389   :  { %10891 = vmatmul.mubr.msk.f32.gmra.mrb[14].mxu1 %vm1726_vm8, %v12852_v60 }
 0x38a   :  { %10893 = vmatprep.mubr.msk.f32.mxu1 %vm12220_vm0, %v13731_v1 }
 0x38d   :  { %10894 = vmatmul.mubr.msk.f32.gmra.mrb[16].mxu1 %vm1726_vm8, %v12549_v33 }
 0x38e   :  { %10898 = vmatprep.mubr.msk.f32.mxu1 %vm12220_vm0, %v13731_v1 }
 0x391   :  { %10899 = vmatmul.mubr.msk.f32.vlgmr.msra.gmra.mrb[12].mxu1 %vm1726_vm8, %v12846_v57 }
 0x392   :  { %10901 = vmatprep.mubr.msk.f32.mxu1 %vm12220_vm0, %v13731_v1 }
 0x395   :  { %10902 = vmatmul.mubr.msk.f32.gmra.mrb[14].mxu1 %vm1726_vm8, %v12852_v60 }
 0x396   :  { %10904 = vmatprep.mubr.msk.f32.mxu1 %vm12220_vm0, %v13731_v1 }
 0x399   :  { %10905 = vmatmul.mubr.msk.f32.gmra.mrb[16].mxu1 %vm1726_vm8, %v12549_v33 }
 0x39a   :  { %10909 = vmatprep.mubr.msk.f32.mxu1 %vm12220_vm0, %v13731_v1 }
 0x39b   :  { %v2809_v9 = vpop.f32.mrb[2].mxu0 }
 0x39c   :  { %v12945_v13 = vadd.f32 %v2809_v9, %v12813_v17  ;;  %v10804_v54 = vpop.f32.mrb[3].mxu0  ;;  %v12962_v17 = vsel %vm275_vm5, 1.0, %v13731_v1 }
 0x39e   :  { %6557 = vrot.lane.b32.xlu0 %v12945_v13, %s12222_s17 }
 0x39f   :  { %v2815_v19 = vpop.f32.mrb[4].mxu0 }
 0x3a0   :  { %v12950_v14 = vadd.f32 %v2815_v19, %v12815_v59  ;;  %v10807_v23 = vpop.f32.mrb[5].mxu0  ;;  %v3829_v59 = vsel %vm1726_vm8, %v12962_v17, 0 }
 0x3a2   :  { %6559 = vrot.lane.b32.xlu0 %v12950_v14, %s12222_s17 }
 0x3a3   :  { %v2821_v18 = vpop.f32.mrb[6].mxu0 }
 0x3a4   :  { %v12955_v21 = vadd.f32 %v2821_v18, %v12817_v15  ;;  %v10810_v26 = vpop.f32.mrb[7].mxu0  ;;  %v12971_v15 = vsub.f32 %v3829_v59, %v3829_v59 }
 0x3a6   :  { %6561 = vrot.lane.b32.xlu0 %v12955_v21, %s12222_s17  ;;  %v12976_v25 = vand.u32 4294901760, %v12971_v15 }
 0x3a8   :  { %v3906_v27 = vsub.f32 %v12971_v15, %v12976_v25 }
 0x3aa   :  { %v12985_v31 = vand.u32 4294901760, %v3906_v27  ;;  %6579 = vrot.lane.b32.xlu0 %v13060_v47, %s12222_s17 }
 0x3c4   :  { %v3826_v28 = vpop.permute.xlu0 %3825 }
 0x3c5   :  { %v3838_v34 = vand.u32 4294901760, %v3826_v28 }
 0x3c7   :  { %v3935_v40 = vsub.f32 %v3826_v28, %v3838_v34  ;;  %10908 = vmatpush3.msra.mxu1 %v3838_v34  ;;  %10941 = vmatpush3.msra.mxu0 %v3838_v34 }
 0x3c8   :  { %10910 = vmatmul.mubr.f32.vlgmr.msra.gmra.mrb[18].mxu1 %v12985_v31  ;;  %10962 = vmatprep.subr.mxu0 %v13731_v1 }
 0x3c9   :  { %v3936_v44 = vand.u32 4294901760, %v3935_v40  ;;  %10943 = vmatmul.mubr.f32.vlgmr.msra.gmra.mrb[8].mxu0 %v12976_v25  ;;  %10912 = vmatprep.mubr.msk.f32.mxu1 %vm12220_vm0, %v13731_v1 }
 0x3ca   :  { %10963 = vmatpush3.msra.mxu0 %v3838_v34  ;;  %10918 = vmatprep.subr.mxu1 %v13731_v1 }
 0x3cb   :  { %v3937_v45 = vsub.f32 %v3935_v40, %v3936_v44  ;;  %10945 = vmatprep.mubr.msk.f32.mxu0 %vm12220_vm0, %v13731_v1  ;;  %11681 = vmatprep.subr.bf16.mxu0 %v13734_v0 }
 0x3cc   :  { %10913 = vmatmul.mubr.f32.gmra.mrb[20].mxu1 %v12991_v41 }
 0x3cd   :  { %v3938_v46 = vand.u32 4294901760, %v3937_v45  ;;  %10915 = vmatprep.mubr.msk.f32.mxu1 %vm12220_vm0, %v13731_v1  ;;  %10946 = vmatmul.mubr.f32.gmra.mrb[10].mxu0 %v12983_v38 }
 0x3ce   :  { %10948 = vmatprep.mubr.msk.f32.mxu0 %vm12220_vm0, %v13731_v1 }
 0x3cf   :  { %10919 = vmatpush3.msra.mxu1 %v3938_v46 }
 0x3d0   :  { %10916 = vmatmul.mubr.f32.gmra.mrb[22].mxu1 %v12585_v43  ;;  %10929 = vmatprep.subr.mxu1 %v13731_v1 }
 0x3d1   :  { %10920 = vmatprep.mubr.msk.f32.mxu1 %vm12220_vm0, %v13731_v1  ;;  %10949 = vmatmul.mubr.f32.gmra.mrb[12].mxu0 %v12569_v20 }
 0x3d2   :  { %10964 = vmatprep.mubr.msk.f32.mxu0 %vm12220_vm0, %v13731_v1 }
 0x3d4   :  { %10921 = vmatmul.mubr.msk.f32.vlgmr.msra.gmra.mrb[24].mxu1 %vm1726_vm8, %v12962_v17 }
 0x3d5   :  { %10930 = vmatpush3.msra.mxu1 %v3935_v40  ;;  %10923 = vmatprep.mubr.msk.f32.mxu1 %vm12220_vm0, %v13731_v1 }
 0x3d6   :  { %10951 = vmatprep.subr.mxu1 %v13731_v1  ;;  %10965 = vmatmul.mubr.msk.f32.vlgmr.msra.gmra.mrb[14].mxu0 %vm1726_vm8, %v12962_v17 }
 0x3d7   :  { %10967 = vmatprep.mubr.msk.f32.mxu0 %vm12220_vm0, %v13731_v1 }
 0x3d8   :  { %10924 = vmatmul.mubr.msk.f32.gmra.mrb[26].mxu1 %vm1726_vm8, %v12969_v22 }
 0x3d9   :  { %10926 = vmatprep.mubr.msk.f32.mxu1 %vm12220_vm0, %v13731_v1 }
 0x3da   :  { %10968 = vmatmul.mubr.msk.f32.gmra.mrb[16].mxu0 %vm1726_vm8, %v12969_v22 }
 0x3db   :  { %10970 = vmatprep.mubr.msk.f32.mxu0 %vm12220_vm0, %v13731_v1 }
 0x3dc   :  { %10927 = vmatmul.mubr.msk.f32.gmra.mrb[28].mxu1 %vm1726_vm8, %v12549_v33 }
 0x3dd   :  { %10931 = vmatprep.mubr.msk.f32.mxu1 %vm12220_vm0, %v13731_v1 }
 0x3de   :  { %10971 = vmatmul.mubr.msk.f32.gmra.mrb[18].mxu0 %vm1726_vm8, %v12549_v33 }
 0x3df   :  { %11043 = vmatprep.mubr.msk.f32.mxu0 %vm12220_vm0, %v13731_v1 }
 0x3e0   :  { %10932 = vmatmul.mubr.f32.vlgmr.msra.gmra.mrb[30].mxu1 %v12971_v15 }
 0x3e1   :  { %10952 = vmatpush3.msra.mxu1 %v3936_v44  ;;  %10934 = vmatprep.mubr.msk.f32.mxu1 %vm12220_vm0, %v13731_v1 }
 0x3e2   :  { %11663 = vmatprep.subr.bf16.mxu1 %v13734_v0 }
 0x3e4   :  { %10935 = vmatmul.mubr.f32.gmra.mrb[32].mxu1 %v12978_v16 }
 0x3e5   :  { %10937 = vmatprep.mubr.msk.f32.mxu1 %vm12220_vm0, %v13731_v1 }
 0x3e8   :  { %10938 = vmatmul.mubr.f32.gmra.mrb[34].mxu1 %v12559_v11 }
 0x3e9   :  { %10953 = vmatprep.mubr.msk.f32.mxu1 %vm12220_vm0, %v13731_v1 }
 0x3ec   :  { %10954 = vmatmul.mubr.msk.f32.vlgmr.msra.gmra.mrb[36].mxu1 %vm1726_vm8, %v12962_v17 }
 0x3ed   :  { %10956 = vmatprep.mubr.msk.f32.mxu1 %vm12220_vm0, %v13731_v1 }
 0x3f0   :  { %10957 = vmatmul.mubr.msk.f32.gmra.mrb[38].mxu1 %vm1726_vm8, %v12969_v22 }
 0x3f1   :  { %10959 = vmatprep.mubr.msk.f32.mxu1 %vm12220_vm0, %v13731_v1 }
 0x3f4   :  { %10960 = vmatmul.mubr.msk.f32.gmra.mrb[40].mxu1 %vm1726_vm8, %v12549_v33 }
 0x3f5   :  { %10979 = vmatprep.mubr.msk.f32.mxu1 %vm12220_vm0, %v13731_v1 }
 0x464   :  { %v13064_v48 = vpop.f32.mrb[12].mxu1 }
 0x465   :  { %v10900_v49 = vpop.f32.mrb[13].mxu1 }
 0x468   :  { %v13066_v50 = vpop.f32.mrb[14].mxu1 }
 0x469   :  { %v10903_v39 = vpop.f32.mrb[15].mxu1 }
 0x46c   :  { %v13068_v51 = vpop.f32.mrb[16].mxu1 }
 0x46d   :  { %v10906_v56 = vpop.f32.mrb[17].mxu1 }
 0x49b   :  { %v3909_v58 = vpop.f32.mrb[18].mxu1 }
 0x49c   :  { %v10911_v30 = vpop.f32.mrb[19].mxu1  ;;  %v4179_v63 = vpop.f32.mrb[8].mxu0 }
 0x49d   :  { %v10944_v2 = vpop.f32.mrb[9].mxu0 }
 0x49f   :  { %v3919_v6 = vpop.f32.mrb[20].mxu1 }
 0x4a0   :  { %v10914_v7 = vpop.f32.mrb[21].mxu1  ;;  %v4187_v10 = vpop.f32.mrb[10].mxu0 }
 0x4a1   :  { %v10947_v61 = vpop.f32.mrb[11].mxu0 }
 0x4a3   :  { %v3929_v35 = vpop.f32.mrb[22].mxu1 }
 0x4a4   :  { %v10917_v36 = vpop.f32.mrb[23].mxu1  ;;  %v4195_v53 = vpop.f32.mrb[12].mxu0 }
 0x4a5   :  { %v10950_v8 = vpop.f32.mrb[13].mxu0 }
 0x4a7   :  { %v4005_v37 = vpop.f32.mrb[24].mxu1 }
 0x4a8   :  { %v4006_v9 = vadd.f32 %v4005_v37, %v3909_v58  ;;  %v10922_v54 = vpop.f32.mrb[25].mxu1 }
 0x4a9   :  { %v4353_v19 = vpop.f32.mrb[14].mxu0 }
 0x4aa   :  { %v10966_v23 = vpop.f32.mrb[15].mxu0 }
 0x4ab   :  { %v4011_v18 = vpop.f32.mrb[26].mxu1 }
 0x4ac   :  { %v4012_v26 = vadd.f32 %v4011_v18, %v3919_v6  ;;  %v10925_v59 = vpop.f32.mrb[27].mxu1 }
 0x4ad   :  { %v4359_v24 = vpop.f32.mrb[16].mxu0 }
 0x4ae   :  { %v10969_v27 = vpop.f32.mrb[17].mxu0 }
 0x4af   :  { %v4017_v28 = vpop.f32.mrb[28].mxu1 }
 0x4b0   :  { %v4018_v32 = vadd.f32 %v4017_v28, %v3929_v35  ;;  %v10928_v34 = vpop.f32.mrb[29].mxu1 }
 0x4b1   :  { %v4365_v40 = vpop.f32.mrb[18].mxu0 }
 0x4b2   :  { %v10972_v44 = vpop.f32.mrb[19].mxu0 }
 0x4b3   :  { %v4091_v45 = vpop.f32.mrb[30].mxu1 }
 0x4b4   :  { %v4092_v46 = vadd.f32 %v4091_v45, %v4006_v9  ;;  %v10933_v49 = vpop.f32.mrb[31].mxu1 }
 0x4b6   :  { %v4180_v39 = vadd.f32 %v4179_v63, %v4092_v46 }
 0x4b7   :  { %v4098_v56 = vpop.f32.mrb[32].mxu1 }
 0x4b8   :  { %v4099_v30 = vadd.f32 %v4098_v56, %v4012_v26  ;;  %v10936_v58 = vpop.f32.mrb[33].mxu1 }
 0x4ba   :  { %v4188_v2 = vadd.f32 %v4187_v10, %v4099_v30 }
 0x4bb   :  { %v4105_v7 = vpop.f32.mrb[34].mxu1 }
 0x4bc   :  { %v4106_v61 = vadd.f32 %v4105_v7, %v4018_v32  ;;  %v10939_v36 = vpop.f32.mrb[35].mxu1 }
 0x4be   :  { %v4196_v6 = vadd.f32 %v4195_v53, %v4106_v61 }
 0x4bf   :  { %v4269_v8 = vpop.f32.mrb[36].mxu1 }
 0x4c0   :  { %v4270_v37 = vadd.f32 %v4269_v8, %v4180_v39  ;;  %v10955_v54 = vpop.f32.mrb[37].mxu1 }
 0x4c2   :  { %v4354_v23 = vadd.f32 %v4353_v19, %v4270_v37 }
 0x4c3   :  { %v4275_v35 = vpop.f32.mrb[38].mxu1 }
 0x4c4   :  { %v4369_v18 = vadd.f32 %v4354_v23, %v13064_v48  ;;  %v4276_v59 = vadd.f32 %v4275_v35, %v4188_v2  ;;  %v10958_v27 = vpop.f32.mrb[39].mxu1 }
 0x4c6   :  { %v4372_v9 = vadd.f32 %v12945_v13, %v4369_v18  ;;  %v4360_v63 = vadd.f32 %v4359_v24, %v4276_v59 }
 0x4c7   :  { %v4281_v28 = vpop.f32.mrb[40].mxu1 }
 0x4c8   :  { %v4370_v26 = vadd.f32 %v4360_v63, %v13066_v50  ;;  %v4282_v10 = vadd.f32 %v4281_v28, %v4196_v6  ;;  %v10961_v34 = vpop.f32.mrb[41].mxu1  ;;  %vm4375_vm3 = vcmp.gt.f32.partialorder %v4372_v9, 0.0  ;;  %v4378_v32 = vmul.f32 0.2, %v4372_v9 }
 0x4ca   :  { %v4373_v53 = vadd.f32 %v12950_v14, %v4370_v26  ;;  %v4366_v44 = vadd.f32 %v4365_v40, %v4282_v10  ;;  %v4381_v45 = vsel %vm4375_vm3, %v4372_v9, %v4378_v32 }
 0x4cb   :  { %v4388_v19 = vmul.f32 %v13060_v47, %v4381_v45 }
 0x4cc   :  { %v4371_v46 = vadd.f32 %v4366_v44, %v13068_v51  ;;  %vm4376_vm2 = vcmp.gt.f32.partialorder %v4373_v53, 0.0  ;;  %v4379_v49 = vmul.f32 0.2, %v4373_v53 }
 0x4cd   :  { %v4392_v13 = vsel %vm4391_vm7, %v4388_v19, 0.0 }
 0x4ce   :  { %v4374_v24 = vadd.f32 %v12955_v21, %v4371_v46  ;;  %4393 = vadd.xlane.f32.xlu1 %v4392_v13  ;;  %v4382_v39 = vsel %vm4376_vm2, %v4373_v53, %v4379_v49 }
 0x4cf   :  { %v4389_v56 = vmul.f32 %v13060_v47, %v4382_v39 }
 0x4d0   :  { %vm4377_vm9 = vcmp.gt.f32.partialorder %v4374_v24, 0.0  ;;  %v4380_v30 = vmul.f32 0.2, %v4374_v24 }
 0x4d1   :  { %v4395_v14 = vsel %vm4391_vm7, %v4389_v56, 0.0 }
 0x4d2   :  { %4396 = vadd.xlane.f32.xlu1 %v4395_v14  ;;  %v4383_v40 = vsel %vm4377_vm9, %v4374_v24, %v4380_v30 }
 0x4d3   :  { %v4390_v58 = vmul.f32 %v13060_v47, %v4383_v40 }
 0x4d5   :  { %v4399_v2 = vsel %vm4398_vm10, %v4390_v58, 0.0 }
 0x4d6   :  { %4400 = vadd.xlane.f32.xlu1 %v4399_v2 }
 0x55b   :  { %v4394_v7 = vpop.xlane.xlu1 %4393 }
 0x55f   :  { %v4397_v61 = vpop.xlane.xlu1 %4396 }
 0x560   :  { %v4403_v36 = vmax.f32 %v4394_v7, %v4397_v61 }
 0x563   :  { %v4401_v21 = vpop.xlane.xlu1 %4400 }
 0x564   :  { %v4402_v6 = vsel %vm303_vm1, %v4401_v21, -inf }
 0x565   :  { %v4404_v8 = vmax.f32 %v4403_v36, %v4402_v6 }
 0x567   :  { %v4405_v37 = vrot.slane %v4404_v8, 4 }
 0x569   :  { %v4406_v54 = vmax.f32 %v4404_v8, %v4405_v37 }
 0x56b   :  { %v4407_v23 = vrot.slane %v4406_v54, 2 }
 0x56d   :  { %v4408_v35 = vmax.f32 %v4406_v54, %v4407_v23  ;;  %v4461_v23 = vsel %vm4460_vm12, %v12407_v52, 0 }
 0x56f   :  { %v4409_v18 = vrot.slane %v4408_v35, 1 }
 0x571   :  { %v4410_v59 = vmax.f32 %v4408_v35, %v4409_v18 }
 0x573   :  { %v4411_v27 = vsub.f32 %v4394_v7, %v4410_v59  ;;  %v4412_v9 = vsub.f32 %v4397_v61, %v4410_v59  ;;  %v4413_v63 = vsub.f32 %v4401_v21, %v4410_v59  ;;  %v13097_v59 = vsub.f32 %v4461_v23, %v4461_v23  ;;  %v45_v23 = vld [vmem:[#allocation5 + $0x20] sm:$0xff] }
 0x575   :  { %v4414_v47 = vmul.f32 1.442695, %v4411_v27  ;;  %v4416_v28 = vmul.f32 1.442695, %v4412_v9  ;;  %v4418_v26 = vmul.f32 1.442695, %v4413_v63 }
 0x576   :  { %13737 = vst [vmem:[#allocation12_spill] sm:$0xff] %v13097_v59 }
 0x577   :  { %12129 = vpow2.f32 %v4414_v47 }
 0x578   :  { %12131 = vpow2.f32 %v4416_v28  ;;  %v13101_v28 = vand.u32 4294901760, %v13097_v59 }
 0x579   :  { %12133 = vpow2.f32 %v4418_v26 }
 0x57a   :  { %13738 = vst [vmem:[#allocation13_spill] sm:$0xff] %v13101_v28 }
 0x581   :  { %v12130_v10 = vpop.eup %12129 }
 0x582   :  { %v12132_v34 = vpop.eup %12131  ;;  %v4420_v32 = vmul.f32 %v12130_v10, %v12962_v17 }
 0x583   :  { %v12134_v53 = vpop.eup %12133  ;;  %v4421_v44 = vmul.f32 %v12132_v34, %v12969_v22 }
 0x584   :  { %v4422_v45 = vmul.f32 %v12134_v53, %v12549_v33  ;;  %v4423_v19 = vsel %vm1726_vm8, %v4420_v32, 0.0 }
 0x585   :  { %v4424_v46 = vsel %vm1726_vm8, %v4421_v44, 0.0 }
 0x586   :  { %v4425_v49 = vadd.f32 %v4424_v46, %v4423_v19  ;;  %v4427_v13 = vsel %vm4426_vm11, %v4422_v45, 0.0 }
 0x588   :  { %v4428_v24 = vadd.f32 %v4427_v13, %v4425_v49 }
 0x58a   :  { %v4429_v39 = vrot.slane %v4428_v24, 4 }
 0x58c   :  { %v4430_v56 = vadd.f32 %v4429_v39, %v4428_v24 }
 0x58e   :  { %v4431_v30 = vrot.slane %v4430_v56, 2 }
 0x590   :  { %v4432_v14 = vadd.f32 %v4431_v30, %v4430_v56 }
 0x592   :  { %v4433_v40 = vrot.slane %v4432_v14, 1 }
 0x594   :  { %v4434_v58 = vadd.f32 %v4433_v40, %v4432_v14 }
 0x596   :  { %v4435_v2 = vmul.f32 %v12962_v17, %v4434_v58  ;;  %v4436_v61 = vmul.f32 %v12969_v22, %v4434_v58  ;;  %v4437_v21 = vmul.f32 %v12549_v33, %v4434_v58 }
 0x598   :  { %v4438_v7 = vsel %vm1726_vm8, %v4435_v2, 0.0  ;;  %v4441_v36 = vsel %vm1726_vm8, %v4436_v61, 0.0  ;;  %v4444_v6 = vsel %vm4426_vm11, %v4437_v21, 0.0  ;;  %v43_v21 = vld [vmem:[#allocation5 + $0x10] sm:$0xff] }
 0x599   :  { %4439 = vadd.xlane.f32.xlu1 %v4438_v7 }
 0x59d   :  { %4442 = vadd.xlane.f32.xlu1 %v4441_v36 }
 0x5a1   :  { %4445 = vadd.xlane.f32.xlu1 %v4444_v6  ;;  %v44_v6 = vld [vmem:[#allocation5 + $0x18] sm:$0xff] }
 0x626   :  { %v4440_v8 = vpop.xlane.xlu1 %4439 }
 0x627   :  { %12135 = vrcp.f32 %v4440_v8  ;;  %v4947_v8 = vand.u32 4294901760, %v43_v21 }
 0x62a   :  { %v4443_v37 = vpop.xlane.xlu1 %4442 }
 0x62b   :  { %12137 = vrcp.f32 %v4443_v37  ;;  %v4950_v37 = vand.u32 4294901760, %v44_v6 }
 0x62e   :  { %v4446_v54 = vpop.xlane.xlu1 %4445 }
 0x62f   :  { %12139 = vrcp.f32 %v4446_v54  ;;  %v13143_v54 = vpack.c.bf16 %v4950_v37, %v4947_v8 }
 0x631   :  { %v12136_v35 = vpop.eup %12135  ;;  %11683 = vmatpush3.bf16.msra.mxu0 %v13143_v54 }
 0x632   :  { %v4448_v18 = vmul.f32 %v12136_v35, %v12130_v10  ;;  %v4537_v10 = vsub.f32 %v13097_v59, %v13101_v28  ;;  %v46_v35 = vld [vmem:[#allocation5 + $0x28] sm:$0xff]  ;;  %11684 = vmatprep.subr.bf16.mxu0 %v13734_v0 }
 0x634   :  { %v4453_v27 = vmul.f32 %v4448_v18, %v13064_v48  ;;  %v13109_v30 = vand.u32 4294901760, %v4537_v10  ;;  %v4953_v18 = vand.u32 4294901760, %v45_v23  ;;  %v50_v10 = vld [vmem:[#allocation5 + $0x48] sm:$0xff] }
 0x635   :  { %v12138_v9 = vpop.eup %12137 }
 0x636   :  { %v4450_v63 = vmul.f32 %v12138_v9, %v12132_v34  ;;  %v4467_v47 = vand.u32 4294901760, %v4453_v27 }
 0x638   :  { %v4454_v26 = vmul.f32 %v4450_v63, %v13066_v50  ;;  %v4546_v32 = vsub.f32 %v4453_v27, %v4467_v47  ;;  %v4956_v27 = vand.u32 4294901760, %v46_v35  ;;  %v47_v63 = vld [vmem:[#allocation5 + $0x30] sm:$0xff] }
 0x639   :  { %v12140_v44 = vpop.eup %12139 }
 0x63a   :  { %v4452_v45 = vmul.f32 %v12140_v44, %v12134_v53  ;;  %v4470_v19 = vand.u32 4294901760, %v4454_v26  ;;  %v4547_v46 = vand.u32 4294901760, %v4546_v32  ;;  %v13147_v9 = vpack.c.bf16 %v4956_v27, %v4953_v18 }
 0x63b   :  { %v13151_v44 = vsub.f32 %v43_v21, %v4947_v8 }
 0x63c   :  { %v11664_v49 = vpack.c.bf16 %v4470_v19, %v4467_v47  ;;  %v4553_v13 = vsub.f32 %v4454_v26, %v4470_v19  ;;  %v4455_v48 = vmul.f32 %v4452_v45, %v13068_v51  ;;  %v4548_v24 = vsub.f32 %v4546_v32, %v4547_v46  ;;  %v48_v47 = vld [vmem:[#allocation5 + $0x38] sm:$0xff]  ;;  %11686 = vmatpush3.bf16.msra.mxu0 %v13147_v9 }
 0x63d   :  { %v4959_v26 = vand.u32 4294901760, %v47_v63  ;;  %11687 = vmatprep.subr.bf16.mxu0 %v13734_v0  ;;  %v13153_v45 = vsub.f32 %v44_v6, %v4950_v37 }
 0x63e   :  { %11665 = vmatpush3.bf16.msra.mxu1 %v11664_v49  ;;  %v4464_v34 = vsel %vm303_vm1, %v4455_v48, 0  ;;  %v4554_v39 = vand.u32 4294901760, %v4553_v13  ;;  %v11670_v56 = vpack.c.bf16 %v4553_v13, %v4546_v32  ;;  %v4549_v58 = vand.u32 4294901760, %v4548_v24 }
 0x63f   :  { %10977 = vmatprep.subr.mxu1 %v13731_v1  ;;  %v4473_v50 = vand.u32 4294901760, %v4464_v34  ;;  %v4962_v32 = vand.u32 4294901760, %v48_v47  ;;  %v5032_v48 = vand.u32 4294901760, %v13151_v44  ;;  %v13161_v24 = vsub.f32 %v45_v23, %v4953_v18 }
 0x640   :  { %v4555_v53 = vsub.f32 %v4553_v13, %v4554_v39  ;;  %v11676_v14 = vpack.c.bf16 %v4554_v39, %v4547_v46  ;;  %v49_v46 = vld [vmem:[#allocation5 + $0x40] sm:$0xff]  ;;  %v4968_v13 = vand.u32 4294901760, %v50_v10  ;;  %v13163_v39 = vsub.f32 %v46_v35, %v4956_v27 }
 0x641   :  { %v4560_v40 = vsub.f32 %v4464_v34, %v4473_v50  ;;  %v13155_v19 = vpack.c.bf16 %v4962_v32, %v4959_v26  ;;  %v5039_v34 = vand.u32 4294901760, %v13153_v45 }
 0x642   :  { %10978 = vmatpush3.msra.mxu1 %v4473_v50  ;;  %v4556_v2 = vand.u32 4294901760, %v4555_v53 }
 0x643   :  { %10980 = vmatmul.mubr.f32.vlgmr.msra.gmra.mrb[42].mxu1 %v13109_v30  ;;  %11666 = vmatprep.subr.bf16.mxu1 %v13734_v0  ;;  %v4561_v51 = vand.u32 4294901760, %v4560_v40  ;;  %v5040_v53 = vsub.f32 %v13153_v45, %v5039_v34 }
 0x644   :  { %v11667_v7 = vpack.c.bf16 %v4556_v2, %v4549_v58  ;;  %10988 = vmatprep.mubr.msk.f32.mxu1 %vm12220_vm0, %v13731_v1  ;;  %11689 = vmatpush3.bf16.msra.mxu0 %v13155_v19  ;;  %v5053_v58 = vand.u32 4294901760, %v13163_v39  ;;  %v5059_v2 = vsub.f32 %v47_v63, %v4959_v26 }
 0x645   :  { %v4562_v61 = vsub.f32 %v4560_v40, %v4561_v51  ;;  %11690 = vmatprep.subr.bf16.mxu0 %v13734_v0 }
 0x646   :  { %11668 = vmatpush3.bf16.msra.mxu1 %v11667_v7  ;;  %v5054_v6 = vsub.f32 %v13163_v39, %v5053_v58  ;;  %v5060_v35 = vand.u32 4294901760, %v5059_v2 }
 0x647   :  { %10986 = vmatprep.subr.mxu1 %v13731_v1  ;;  %v4563_v36 = vand.u32 4294901760, %v4562_v61  ;;  %v5080_v61 = vsub.f32 %v50_v10, %v4968_v13 }
 0x648   :  { %v5055_v23 = vand.u32 4294901760, %v5054_v6 }
 0x64a   :  { %10987 = vmatpush3.msra.mxu1 %v4563_v36  ;;  %v5041_v36 = vand.u32 4294901760, %v5040_v53 }
 0x64b   :  { %10989 = vmatmul.mubr.msk.f32.vlgmr.msra.gmra.mrb[42].mxu1 %vm4460_vm12, %v12407_v52  ;;  %11669 = vmatprep.subr.bf16.mxu1 %v13734_v0 }
 0x64c   :  { %11671 = vmatpush3.bf16.msra.mxu1 %v11670_v56  ;;  %10997 = vmatprep.mubr.msk.f32.mxu1 %vm12220_vm0, %v13731_v1 }
 0x64d   :  { %10995 = vmatprep.subr.mxu1 %v13731_v1 }
 0x650   :  { %10996 = vmatpush3.msra.mxu1 %v4560_v40  ;;  %v5046_v40 = vand.u32 4294901760, %v13161_v24 }
 0x651   :  { %11672 = vmatprep.subr.bf16.mxu1 %v13734_v0 }
 0x652   :  { %v5047_v21 = vsub.f32 %v13161_v24, %v5046_v40 }
 0x653   :  { %10998 = vmatmul.mubr.f32.vlgmr.msra.gmra.mrb[42].mxu1 %v13097_v59  ;;  %v13179_v59 = vld [vmem:[#allocation5 + $0x68] ss:$0 sm:$0xff] }
 0x654   :  { %11674 = vmatpush3.bf16.msra.mxu1 %v11664_v49  ;;  %11006 = vmatprep.mubr.msk.f32.mxu1 %vm12220_vm0, %v13731_v1  ;;  %v5048_v37 = vand.u32 4294901760, %v5047_v21 }
 0x655   :  { %11004 = vmatprep.subr.mxu1 %v13731_v1 }
 0x656   :  { %v11697_v27 = vpack.c.bf16 %v5055_v23, %v5048_v37  ;;  %v11730_v37 = vpack.c.bf16 %v5039_v34, %v5032_v48  ;;  %v11733_v23 = vpack.c.bf16 %v5053_v58, %v5046_v40  ;;  %v13740_v34 = vmov 0.0|0.0  }
 0x658   :  { %11005 = vmatpush3.msra.mxu1 %v4473_v50 }
 0x659   :  { %11675 = vmatprep.subr.bf16.mxu1 %v13734_v0 }
 0x65b   :  { %11007 = vmatmul.mubr.f32.vlgmr.msra.gmra.mrb[42].mxu1 %v13101_v28 }
 0x65c   :  { %11677 = vmatpush3.bf16.msra.mxu1 %v11676_v14  ;;  %11015 = vmatprep.mubr.msk.f32.mxu1 %vm12220_vm0, %v13731_v1 }
 0x65d   :  { %11013 = vmatprep.subr.mxu1 %v13731_v1 }
 0x660   :  { %11014 = vmatpush3.msra.mxu1 %v4561_v51  ;;  %v5066_v51 = vsub.f32 %v48_v47, %v4962_v32  ;;  %v5081_v47 = vand.u32 4294901760, %v5080_v61 }
 0x661   :  { %11678 = vmatprep.subr.bf16.mxu1 %v13734_v0 }
 0x662   :  { %v5067_v18 = vand.u32 4294901760, %v5066_v51  ;;  %v11712_v21 = vpack.c.bf16 %v5066_v51, %v5059_v2 }
 0x663   :  { %11016 = vmatmul.mubr.msk.f32.vlgmr.msra.gmra.mrb[42].mxu1 %vm4460_vm12, %v12407_v52 }
 0x664   :  { %11680 = vmatpush3.bf16.msra.mxu1 %v11664_v49  ;;  %11024 = vmatprep.mubr.msk.f32.mxu1 %vm12220_vm0, %v13731_v1  ;;  %v4965_v49 = vand.u32 4294901760, %v49_v46 }
 0x665   :  { %11022 = vmatprep.subr.mxu1 %v13731_v1 }
 0x666   :  { %v13165_v56 = vpack.c.bf16 %v4968_v13, %v4965_v49  ;;  %v5073_v7 = vsub.f32 %v49_v46, %v4965_v49  ;;  %v5082_v46 = vsub.f32 %v5080_v61, %v5081_v47 }
 0x668   :  { %11023 = vmatpush3.msra.mxu1 %v4473_v50  ;;  %v5033_v50 = vsub.f32 %v13151_v44, %v5032_v48  ;;  %11692 = vmatpush3.bf16.msra.mxu0 %v13165_v56  ;;  %v5074_v63 = vand.u32 4294901760, %v5073_v7  ;;  %v5083_v13 = vand.u32 4294901760, %v5082_v46  ;;  %v11715_v6 = vpack.c.bf16 %v5080_v61, %v5073_v7 }
 0x669   :  { %11141 = vmatprep.subr.mxu1 %v13731_v1  ;;  %11693 = vmatprep.subr.bf16.mxu0 %v13734_v0  ;;  %v13739_v48 = vmov 0.0  }
 0x66a   :  { %v5034_v14 = vand.u32 4294901760, %v5033_v50  ;;  %v5061_v50 = vsub.f32 %v5059_v2, %v5060_v35  ;;  %v5075_v32 = vsub.f32 %v5073_v7, %v5074_v63  ;;  %v11739_v0 = vpack.c.bf16 %v5081_v47, %v5074_v63 }
 0x66b   :  { %11025 = vmatmul.mubr.msk.f32.vlgmr.msra.gmra.mrb[42].mxu1 %vm4460_vm12, %v12407_v52 }
 0x66c   :  { %11143 = vmatprep.mubr.msk.f32.mxu1 %vm12220_vm0, %v13731_v1  ;;  %v11694_v8 = vpack.c.bf16 %v5041_v36, %v5034_v14  ;;  %v5068_v1 = vsub.f32 %v5066_v51, %v5067_v18  ;;  %v5062_v28 = vand.u32 4294901760, %v5061_v50  ;;  %v5076_v49 = vand.u32 4294901760, %v5075_v32 }
 0x66d   :  { %v11706_v14 = vpack.c.bf16 %v13153_v45, %v13151_v44  ;;  %v11709_v36 = vpack.c.bf16 %v13163_v39, %v13161_v24  ;;  %v11736_v50 = vpack.c.bf16 %v5067_v18, %v5060_v35 }
 0x66e   :  { %v5069_v26 = vand.u32 4294901760, %v5068_v1  ;;  %v11703_v53 = vpack.c.bf16 %v5083_v13, %v5076_v49 }
 0x670   :  { %v11700_v10 = vpack.c.bf16 %v5069_v26, %v5062_v28 }
 0x73e   :  { %v4934_v1 = vpop.f32.mrb[42].mxu1 }
 0x73f   :  { %v11883_v28 = vadd.f32 %v13179_v59, %v4934_v1  ;;  %v11026_v26 = vpop.f32.mrb[43].mxu1 }
 0x741   :  { %v4938_v32 = vmax.f32 %v11883_v28, 0.0 }
 0x743   :  { %v4944_v46 = vsel %vm4391_vm7, %v4938_v32, 0 }
 0x744   :  { %v5019_v49 = vand.u32 4294901760, %v4944_v46 }
 0x746   :  { %v5020_v44 = vsub.f32 %v4944_v46, %v5019_v49 }
 0x748   :  { %v5021_v45 = vand.u32 4294901760, %v5020_v44 }
 0x74a   :  { %v5022_v13 = vsub.f32 %v5020_v44, %v5021_v45 }
 0x74c   :  { %v5023_v24 = vand.u32 4294901760, %v5022_v13 }
 0x74e   :  { %11044 = vmatmul.mubr.f32.vlgmr.msra.gmra.mrb[20].mxu0 %v5023_v24 }
 0x74f   :  { %11695 = vmatpush3.bf16.msra.mxu0 %v11694_v8  ;;  %11062 = vmatprep.mubr.msk.f32.mxu0 %vm12220_vm0, %v13739_v48 }
 0x750   :  { %11696 = vmatprep.subr.bf16.mxu0 %v13740_v34 }
 0x753   :  { %11698 = vmatpush3.bf16.msra.mxu0 %v11697_v27 }
 0x754   :  { %11699 = vmatprep.subr.bf16.mxu0 %v13740_v34 }
 0x757   :  { %11701 = vmatpush3.bf16.msra.mxu0 %v11700_v10 }
 0x758   :  { %11702 = vmatprep.subr.bf16.mxu0 %v13740_v34 }
 0x75b   :  { %11704 = vmatpush3.bf16.msra.mxu0 %v11703_v53 }
 0x75c   :  { %11705 = vmatprep.subr.bf16.mxu0 %v13740_v34 }
 0x75e   :  { %11063 = vmatmul.mubr.f32.vlgmr.msra.gmra.mrb[20].mxu0 %v5019_v49 }
 0x75f   :  { %11707 = vmatpush3.bf16.msra.mxu0 %v11706_v14  ;;  %11081 = vmatprep.mubr.msk.f32.mxu0 %vm12220_vm0, %v13739_v48 }
 0x760   :  { %11708 = vmatprep.subr.bf16.mxu0 %v13740_v34 }
 0x763   :  { %11710 = vmatpush3.bf16.msra.mxu0 %v11709_v36 }
 0x764   :  { %11711 = vmatprep.subr.bf16.mxu0 %v13740_v34 }
 0x767   :  { %11713 = vmatpush3.bf16.msra.mxu0 %v11712_v21 }
 0x768   :  { %11714 = vmatprep.subr.bf16.mxu0 %v13740_v34 }
 0x76b   :  { %11716 = vmatpush3.bf16.msra.mxu0 %v11715_v6 }
 0x76c   :  { %11717 = vmatprep.subr.bf16.mxu0 %v13740_v34 }
 0x76e   :  { %11082 = vmatmul.mubr.f32.vlgmr.msra.gmra.mrb[20].mxu0 %v5020_v44 }
 0x76f   :  { %11719 = vmatpush3.bf16.msra.mxu0 %v13143_v54  ;;  %11100 = vmatprep.mubr.msk.f32.mxu0 %vm12220_vm0, %v13739_v48 }
 0x770   :  { %11720 = vmatprep.subr.bf16.mxu0 %v13740_v34 }
 0x773   :  { %11722 = vmatpush3.bf16.msra.mxu0 %v13147_v9 }
 0x774   :  { %11723 = vmatprep.subr.bf16.mxu0 %v13740_v34 }
 0x777   :  { %11725 = vmatpush3.bf16.msra.mxu0 %v13155_v19 }
 0x778   :  { %11726 = vmatprep.subr.bf16.mxu0 %v13740_v34 }
 0x77b   :  { %11728 = vmatpush3.bf16.msra.mxu0 %v13165_v56 }
 0x77c   :  { %11729 = vmatprep.subr.bf16.mxu0 %v13740_v34 }
 0x77e   :  { %11101 = vmatmul.mubr.f32.vlgmr.msra.gmra.mrb[20].mxu0 %v5021_v45 }
 0x77f   :  { %11731 = vmatpush3.bf16.msra.mxu0 %v11730_v37  ;;  %11119 = vmatprep.mubr.msk.f32.mxu0 %vm12220_vm0, %v13739_v48 }
 0x780   :  { %11732 = vmatprep.subr.bf16.mxu0 %v13740_v34 }
 0x783   :  { %11734 = vmatpush3.bf16.msra.mxu0 %v11733_v23 }
 0x784   :  { %11735 = vmatprep.subr.bf16.mxu0 %v13740_v34 }
 0x787   :  { %11737 = vmatpush3.bf16.msra.mxu0 %v11736_v50 }
 0x788   :  { %11738 = vmatprep.subr.bf16.mxu0 %v13740_v34 }
 0x78b   :  { %11740 = vmatpush3.bf16.msra.mxu0 %v11739_v0  ;;  %v10088_v0 = vld [vmem:[#allocation5 + $0x50] ss:$0 sm:$0xff] }
 0x78c   :  { %11741 = vmatprep.subr.bf16.mxu0 %v13740_v34 }
 0x78e   :  { %11120 = vmatmul.mubr.f32.vlgmr.msra.gmra.mrb[20].mxu0 %v5019_v49 }
 0x78f   :  { %11743 = vmatpush3.bf16.msra.mxu0 %v13143_v54  ;;  %11138 = vmatprep.mubr.msk.f32.mxu0 %vm12220_vm0, %v13739_v48 }
 0x790   :  { %11744 = vmatprep.subr.bf16.mxu0 %v13740_v34 }
 0x793   :  { %11746 = vmatpush3.bf16.msra.mxu0 %v13147_v9 }
 0x794   :  { %11747 = vmatprep.subr.bf16.mxu0 %v13740_v34 }
 0x797   :  { %11749 = vmatpush3.bf16.msra.mxu0 %v13155_v19 }
 0x798   :  { %11750 = vmatprep.subr.bf16.mxu0 %v13740_v34 }
 0x79b   :  { %11752 = vmatpush3.bf16.msra.mxu0 %v13165_v56 }
 0x79c   :  { %11207 = vmatprep.subr.mxu0 %v13739_v48 }
 0x79e   :  { %11139 = vmatmul.mubr.f32.vlgmr.msra.gmra.mrb[20].mxu0 %v5019_v49 }
 0x79f   :  { %11209 = vmatprep.mubr.msk.f32.mxu0 %vm12220_vm0, %v13739_v48 }
 0x871   :  { %v5479_v54 = vpop.f32.mrb[20].mxu0 }
 0x872   :  { %v11884_v39 = vadd.f32 %v10088_v0, %v5479_v54  ;;  %v11140_v40 = vpop.f32.mrb[21].mxu0 }
 0x874   :  { %v5484_v58 = vand.u32 4294901760, %v11884_v39  ;;  %6016 = vrot.lane.b32.xlu1 %v11884_v39, %s12222_s17 }
 0x876   :  { %v5581_v9 = vsub.f32 %v11884_v39, %v5484_v58  ;;  %11142 = vmatpush3.msra.mxu1 %v5484_v58 }
 0x877   :  { %11144 = vmatmul.mubr.f32.vlgmr.msra.gmra.mrb[44].mxu1 %v12868_v12  ;;  %11152 = vmatprep.subr.mxu1 %v13739_v48 }
 0x878   :  { %v5582_v19 = vand.u32 4294901760, %v5581_v9  ;;  %11146 = vmatprep.mubr.msk.f32.mxu1 %vm12220_vm0, %v13739_v48 }
 0x87a   :  { %v5583_v56 = vsub.f32 %v5581_v9, %v5582_v19 }
 0x87b   :  { %11147 = vmatmul.mubr.f32.gmra.mrb[46].mxu1 %v12874_v42 }
 0x87c   :  { %11149 = vmatprep.mubr.msk.f32.mxu1 %vm12220_vm0, %v13739_v48  ;;  %v5584_v2 = vand.u32 4294901760, %v5583_v56 }
 0x87e   :  { %11153 = vmatpush3.msra.mxu1 %v5584_v2 }
 0x87f   :  { %11150 = vmatmul.mubr.f32.gmra.mrb[48].mxu1 %v12585_v43  ;;  %11163 = vmatprep.subr.mxu1 %v13739_v48 }
 0x880   :  { %11154 = vmatprep.mubr.msk.f32.mxu1 %vm12220_vm0, %v13739_v48 }
 0x883   :  { %11155 = vmatmul.mubr.msk.f32.vlgmr.msra.gmra.mrb[44].mxu1 %vm1726_vm8, %v12846_v57 }
 0x884   :  { %11164 = vmatpush3.msra.mxu1 %v5581_v9  ;;  %11157 = vmatprep.mubr.msk.f32.mxu1 %vm12220_vm0, %v13739_v48 }
 0x885   :  { %11174 = vmatprep.subr.mxu1 %v13739_v48 }
 0x887   :  { %11158 = vmatmul.mubr.msk.f32.gmra.mrb[46].mxu1 %vm1726_vm8, %v12852_v60 }
 0x888   :  { %11160 = vmatprep.mubr.msk.f32.mxu1 %vm12220_vm0, %v13739_v48 }
 0x88b   :  { %11161 = vmatmul.mubr.msk.f32.gmra.mrb[48].mxu1 %vm1726_vm8, %v12549_v33 }
 0x88c   :  { %11165 = vmatprep.mubr.msk.f32.mxu1 %vm12220_vm0, %v13739_v48 }
 0x88f   :  { %11166 = vmatmul.mubr.f32.vlgmr.msra.gmra.mrb[44].mxu1 %v12854_v29 }
 0x890   :  { %11175 = vmatpush3.msra.mxu1 %v5484_v58  ;;  %11168 = vmatprep.mubr.msk.f32.mxu1 %vm12220_vm0, %v13739_v48 }
 0x891   :  { %11185 = vmatprep.subr.mxu1 %v13739_v48 }
 0x893   :  { %11169 = vmatmul.mubr.f32.gmra.mrb[46].mxu1 %v12861_v55 }
 0x894   :  { %11171 = vmatprep.mubr.msk.f32.mxu1 %vm12220_vm0, %v13739_v48 }
 0x897   :  { %11172 = vmatmul.mubr.f32.gmra.mrb[48].mxu1 %v12559_v11 }
 0x898   :  { %11176 = vmatprep.mubr.msk.f32.mxu1 %vm12220_vm0, %v13739_v48 }
 0x89b   :  { %11177 = vmatmul.mubr.f32.vlgmr.msra.gmra.mrb[44].mxu1 %v12859_v62 }
 0x89c   :  { %11186 = vmatpush3.msra.mxu1 %v5582_v19  ;;  %11179 = vmatprep.mubr.msk.f32.mxu1 %vm12220_vm0, %v13739_v48 }
 0x89d   :  { %11196 = vmatprep.subr.mxu1 %v13739_v48 }
 0x89f   :  { %11180 = vmatmul.mubr.f32.gmra.mrb[46].mxu1 %v12866_v4 }
 0x8a0   :  { %11182 = vmatprep.mubr.msk.f32.mxu1 %vm12220_vm0, %v13739_v48 }
 0x8a3   :  { %11183 = vmatmul.mubr.f32.gmra.mrb[48].mxu1 %v12569_v20 }
 0x8a4   :  { %11187 = vmatprep.mubr.msk.f32.mxu1 %vm12220_vm0, %v13739_v48 }
 0x8a7   :  { %11188 = vmatmul.mubr.msk.f32.vlgmr.msra.gmra.mrb[44].mxu1 %vm1726_vm8, %v12846_v57 }
 0x8a8   :  { %11197 = vmatpush3.msra.mxu1 %v5484_v58  ;;  %11190 = vmatprep.mubr.msk.f32.mxu1 %vm12220_vm0, %v13739_v48 }
 0x8a9   :  { %11229 = vmatprep.subr.mxu1 %v13739_v48 }
 0x8ab   :  { %11191 = vmatmul.mubr.msk.f32.gmra.mrb[46].mxu1 %vm1726_vm8, %v12852_v60 }
 0x8ac   :  { %11193 = vmatprep.mubr.msk.f32.mxu1 %vm12220_vm0, %v13739_v48 }
 0x8af   :  { %11194 = vmatmul.mubr.msk.f32.gmra.mrb[48].mxu1 %vm1726_vm8, %v12549_v33 }
 0x8b0   :  { %11198 = vmatprep.mubr.msk.f32.mxu1 %vm12220_vm0, %v13739_v48 }
 0x8b3   :  { %11199 = vmatmul.mubr.msk.f32.vlgmr.msra.gmra.mrb[44].mxu1 %vm1726_vm8, %v12846_v57 }
 0x8b4   :  { %11201 = vmatprep.mubr.msk.f32.mxu1 %vm12220_vm0, %v13739_v48 }
 0x8b7   :  { %11202 = vmatmul.mubr.msk.f32.gmra.mrb[46].mxu1 %vm1726_vm8, %v12852_v60 }
 0x8b8   :  { %11204 = vmatprep.mubr.msk.f32.mxu1 %vm12220_vm0, %v13739_v48 }
 0x8bb   :  { %11205 = vmatmul.mubr.msk.f32.gmra.mrb[48].mxu1 %vm1726_vm8, %v12549_v33 }
 0x8bc   :  { %11231 = vmatprep.mubr.msk.f32.mxu1 %vm12220_vm0, %v13739_v48 }
 0x8e6   :  { %v6017_v29 = vpop.permute.xlu1 %6016 }
 0x8e7   :  { %v6020_v62 = vand.u32 4294901760, %v6017_v29 }
 0x8e9   :  { %v6117_v55 = vsub.f32 %v6017_v29, %v6020_v62  ;;  %11208 = vmatpush3.msra.mxu0 %v6020_v62 }
 0x8ea   :  { %11210 = vmatmul.mubr.f32.vlgmr.msra.gmra.mrb[22].mxu0 %v12985_v31  ;;  %11218 = vmatprep.subr.mxu0 %v13739_v48 }
 0x8eb   :  { %v6118_v57 = vand.u32 4294901760, %v6117_v55  ;;  %11230 = vmatpush3.msra.mxu1 %v6117_v55  ;;  %11212 = vmatprep.mubr.msk.f32.mxu0 %vm12220_vm0, %v13739_v48 }
 0x8ec   :  { %11251 = vmatprep.subr.mxu1 %v13739_v48  ;;  %11232 = vmatmul.mubr.f32.vlgmr.msra.gmra.mrb[50].mxu1 %v12971_v15  ;;  %v55_v15 = vld [vmem:[#allocation5 + $0x70] sm:$0x3] }
 0x8ed   :  { %v6119_v60 = vsub.f32 %v6117_v55, %v6118_v57  ;;  %11252 = vmatpush3.msra.mxu1 %v6118_v57  ;;  %11234 = vmatprep.mubr.msk.f32.mxu1 %vm12220_vm0, %v13739_v48 }
 0x8ee   :  { %11213 = vmatmul.mubr.f32.gmra.mrb[24].mxu0 %v12991_v41  ;;  %11753 = vmatprep.subr.bf16.mxu1 %v13740_v34 }
 0x8ef   :  { %v6120_v4 = vand.u32 4294901760, %v6119_v60  ;;  %11215 = vmatprep.mubr.msk.f32.mxu0 %vm12220_vm0, %v13739_v48 }
 0x8f0   :  { %11235 = vmatmul.mubr.f32.gmra.mrb[52].mxu1 %v12978_v16 }
 0x8f1   :  { %11219 = vmatpush3.msra.mxu0 %v6120_v4  ;;  %11237 = vmatprep.mubr.msk.f32.mxu1 %vm12220_vm0, %v13739_v48  ;;  %v6558_v4 = vpop.permute.xlu0 %6557 }
 0x8f2   :  { %11216 = vmatmul.mubr.f32.gmra.mrb[26].mxu0 %v12585_v43  ;;  %11240 = vmatprep.subr.mxu0 %v13739_v48 }
 0x8f3   :  { %11220 = vmatprep.mubr.msk.f32.mxu0 %vm12220_vm0, %v13739_v48 }
 0x8f4   :  { %11238 = vmatmul.mubr.f32.gmra.mrb[54].mxu1 %v12559_v11  ;;  %v75_v11 = vld [vmem:[%s13729_s5] sm:$0x3] }
 0x8f5   :  { %11253 = vmatprep.mubr.msk.f32.mxu1 %vm12220_vm0, %v13739_v48 }
 0x8f6   :  { %11221 = vmatmul.mubr.msk.f32.vlgmr.msra.gmra.mrb[28].mxu0 %vm1726_vm8, %v12962_v17 }
 0x8f7   :  { %11241 = vmatpush3.msra.mxu0 %v6020_v62  ;;  %11223 = vmatprep.mubr.msk.f32.mxu0 %vm12220_vm0, %v13739_v48 }
 0x8f8   :  { %11262 = vmatprep.subr.mxu0 %v13739_v48  ;;  %11254 = vmatmul.mubr.msk.f32.vlgmr.msra.gmra.mrb[56].mxu1 %vm1726_vm8, %v12962_v17 }
 0x8f9   :  { %11256 = vmatprep.mubr.msk.f32.mxu1 %vm12220_vm0, %v13739_v48 }
 0x8fa   :  { %11224 = vmatmul.mubr.msk.f32.gmra.mrb[30].mxu0 %vm1726_vm8, %v12969_v22 }
 0x8fb   :  { %11226 = vmatprep.mubr.msk.f32.mxu0 %vm12220_vm0, %v13739_v48 }
 0x8fc   :  { %11257 = vmatmul.mubr.msk.f32.gmra.mrb[58].mxu1 %vm1726_vm8, %v12969_v22 }
 0x8fd   :  { %11259 = vmatprep.mubr.msk.f32.mxu1 %vm12220_vm0, %v13739_v48 }
 0x8fe   :  { %11227 = vmatmul.mubr.msk.f32.gmra.mrb[32].mxu0 %vm1726_vm8, %v12549_v33 }
 0x8ff   :  { %11242 = vmatprep.mubr.msk.f32.mxu0 %vm12220_vm0, %v13739_v48 }
 0x900   :  { %11260 = vmatmul.mubr.msk.f32.gmra.mrb[60].mxu1 %vm1726_vm8, %v12549_v33 }
 0x901   :  { %11279 = vmatprep.mubr.msk.f32.mxu1 %vm12220_vm0, %v13739_v48 }
 0x902   :  { %11243 = vmatmul.mubr.f32.vlgmr.msra.gmra.mrb[34].mxu0 %v12976_v25  ;;  %v7137_v25 = vsel %vm7135_vm14, %v55_v15, 0 }
 0x903   :  { %11263 = vmatpush3.msra.mxu0 %v6020_v62  ;;  %11245 = vmatprep.mubr.msk.f32.mxu0 %vm12220_vm0, %v13739_v48 }
 0x904   :  { %11327 = vmatprep.subr.mxu0 %v13739_v48 }
 0x906   :  { %11246 = vmatmul.mubr.f32.gmra.mrb[36].mxu0 %v12983_v38  ;;  %v7140_v38 = vand.u32 4294901760, %v7137_v25 }
 0x907   :  { %11248 = vmatprep.mubr.msk.f32.mxu0 %vm12220_vm0, %v13739_v48 }
 0x908   :  { %v7217_v41 = vsub.f32 %v7137_v25, %v7140_v38  ;;  %v6560_v25 = vpop.permute.xlu0 %6559 }
 0x90a   :  { %11249 = vmatmul.mubr.f32.gmra.mrb[38].mxu0 %v12569_v20  ;;  %v7133_v20 = vsel %vm7131_vm13, %v75_v11, 0  ;;  %v7218_v51 = vand.u32 4294901760, %v7217_v41 }
 0x90b   :  { %11264 = vmatprep.mubr.msk.f32.mxu0 %vm12220_vm0, %v13739_v48  ;;  %v7205_v43 = vand.u32 4294901760, %v7133_v20 }
 0x90c   :  { %v7219_v7 = vsub.f32 %v7217_v41, %v7218_v51 }
 0x90d   :  { %v7206_v12 = vsub.f32 %v7133_v20, %v7205_v43 }
 0x90e   :  { %11265 = vmatmul.mubr.msk.f32.vlgmr.msra.gmra.mrb[40].mxu0 %vm1726_vm8, %v12962_v17  ;;  %v7220_v61 = vand.u32 4294901760, %v7219_v7 }
 0x90f   :  { %11267 = vmatprep.mubr.msk.f32.mxu0 %vm12220_vm0, %v13739_v48  ;;  %v7207_v42 = vand.u32 4294901760, %v7206_v12  ;;  %11328 = vmatpush3.msra.mxu0 %v7140_v38 }
 0x910   :  { %11332 = vmatprep.subr.mxu0 %v13739_v48 }
 0x911   :  { %v7208_v16 = vsub.f32 %v7206_v12, %v7207_v42 }
 0x912   :  { %11268 = vmatmul.mubr.msk.f32.gmra.mrb[42].mxu0 %vm1726_vm8, %v12969_v22 }
 0x913   :  { %11270 = vmatprep.mubr.msk.f32.mxu0 %vm12220_vm0, %v13739_v48  ;;  %v7209_v31 = vand.u32 4294901760, %v7208_v16 }
 0x916   :  { %11271 = vmatmul.mubr.msk.f32.gmra.mrb[44].mxu0 %vm1726_vm8, %v12549_v33 }
 0x917   :  { %11329 = vmatprep.mubr.msk.f32.mxu0 %vm12220_vm0, %v13739_v48 }
 0x91a   :  { %11330 = vmatmul.mubr.f32.vlgmr.msra.gmra.mrb[46].mxu0 %v7209_v31 }
 0x91b   :  { %11334 = vmatprep.mubr.msk.f32.mxu0 %vm12220_vm0, %v13739_v48  ;;  %11333 = vmatpush3.msra.mxu0 %v7220_v61  ;;  %v6562_v61 = vpop.permute.xlu0 %6561 }
 0x91c   :  { %11337 = vmatprep.subr.mxu0 %v13739_v48 }
 0x922   :  { %11335 = vmatmul.mubr.f32.vlgmr.msra.gmra.mrb[46].mxu0 %v7205_v43 }
 0x923   :  { %11338 = vmatpush3.msra.mxu0 %v7217_v41  ;;  %11339 = vmatprep.mubr.msk.f32.mxu0 %vm12220_vm0, %v13739_v48 }
 0x924   :  { %11342 = vmatprep.subr.mxu0 %v13739_v48 }
 0x92a   :  { %11340 = vmatmul.mubr.f32.vlgmr.msra.gmra.mrb[46].mxu0 %v7206_v12 }
 0x92b   :  { %11343 = vmatpush3.msra.mxu0 %v7140_v38  ;;  %11344 = vmatprep.mubr.msk.f32.mxu0 %vm12220_vm0, %v13739_v48 }
 0x92c   :  { %11347 = vmatprep.subr.mxu0 %v13739_v48 }
 0x932   :  { %11345 = vmatmul.mubr.f32.vlgmr.msra.gmra.mrb[46].mxu0 %v7207_v42 }
 0x933   :  { %11348 = vmatpush3.msra.mxu0 %v7218_v51  ;;  %11349 = vmatprep.mubr.msk.f32.mxu0 %vm12220_vm0, %v13739_v48 }
 0x934   :  { %11352 = vmatprep.subr.mxu0 %v13739_v48 }
 0x93a   :  { %11350 = vmatmul.mubr.f32.vlgmr.msra.gmra.mrb[46].mxu0 %v7205_v43 }
 0x93b   :  { %11353 = vmatpush3.msra.mxu0 %v7140_v38  ;;  %11354 = vmatprep.mubr.msk.f32.mxu0 %vm12220_vm0, %v13739_v48 }
 0x93c   :  { %11357 = vmatprep.subr.mxu0 %v13739_v48 }
 0x942   :  { %11355 = vmatmul.mubr.f32.vlgmr.msra.gmra.mrb[46].mxu0 %v7205_v43 }
 0x943   :  { %11359 = vmatprep.mubr.msk.f32.mxu0 %vm12220_vm0, %v13739_v48 }
 0x986   :  { %v13376_v8 = vpop.f32.mrb[44].mxu1 }
 0x987   :  { %v11200_v35 = vpop.f32.mrb[45].mxu1 }
 0x98a   :  { %v13379_v18 = vpop.f32.mrb[46].mxu1 }
 0x98b   :  { %v11203_v27 = vpop.f32.mrb[47].mxu1 }
 0x98e   :  { %v13383_v63 = vpop.f32.mrb[48].mxu1 }
 0x98f   :  { %v11206_v47 = vpop.f32.mrb[49].mxu1 }
 0x9bd   :  { %v6091_v10 = vpop.f32.mrb[22].mxu0 }
 0x9be   :  { %v11211_v53 = vpop.f32.mrb[23].mxu0 }
 0x9bf   :  { %v6273_v14 = vpop.f32.mrb[50].mxu1 }
 0x9c0   :  { %v11233_v36 = vpop.f32.mrb[51].mxu1 }
 0x9c1   :  { %v6101_v21 = vpop.f32.mrb[24].mxu0  ;;  %v6580_v36 = vpop.permute.xlu0 %6579 }
 0x9c2   :  { %v11214_v6 = vpop.f32.mrb[25].mxu0 }
 0x9c3   :  { %v6280_v37 = vpop.f32.mrb[52].mxu1 }
 0x9c4   :  { %v11236_v23 = vpop.f32.mrb[53].mxu1 }
 0x9c5   :  { %v6111_v50 = vpop.f32.mrb[26].mxu0 }
 0x9c6   :  { %v11217_v1 = vpop.f32.mrb[27].mxu0 }
 0x9c7   :  { %v6287_v28 = vpop.f32.mrb[54].mxu1 }
 0x9c8   :  { %v11239_v26 = vpop.f32.mrb[55].mxu1 }
 0x9c9   :  { %v6187_v32 = vpop.f32.mrb[28].mxu0 }
 0x9ca   :  { %v6188_v46 = vadd.f32 %v6187_v32, %v6091_v10  ;;  %v11222_v49 = vpop.f32.mrb[29].mxu0 }
 0x9cb   :  { %v6451_v44 = vpop.f32.mrb[56].mxu1 }
 0x9cc   :  { %v6274_v45 = vadd.f32 %v6273_v14, %v6188_v46  ;;  %v11255_v13 = vpop.f32.mrb[57].mxu1 }
 0x9cd   :  { %v6193_v24 = vpop.f32.mrb[30].mxu0 }
 0x9ce   :  { %v6194_v0 = vadd.f32 %v6193_v24, %v6101_v21  ;;  %v11225_v54 = vpop.f32.mrb[31].mxu0 }
 0x9cf   :  { %v6457_v39 = vpop.f32.mrb[58].mxu1 }
 0x9d0   :  { %v6281_v40 = vadd.f32 %v6280_v37, %v6194_v0  ;;  %v11258_v58 = vpop.f32.mrb[59].mxu1 }
 0x9d1   :  { %v6199_v9 = vpop.f32.mrb[32].mxu0 }
 0x9d2   :  { %v6200_v19 = vadd.f32 %v6199_v9, %v6111_v50  ;;  %v11228_v56 = vpop.f32.mrb[33].mxu0 }
 0x9d3   :  { %v6463_v2 = vpop.f32.mrb[60].mxu1 }
 0x9d4   :  { %v6288_v29 = vadd.f32 %v6287_v28, %v6200_v19  ;;  %v11261_v62 = vpop.f32.mrb[61].mxu1 }
 0x9d5   :  { %v6361_v55 = vpop.f32.mrb[34].mxu0 }
 0x9d6   :  { %v6362_v57 = vadd.f32 %v6361_v55, %v6274_v45  ;;  %v11244_v60 = vpop.f32.mrb[35].mxu0 }
 0x9d8   :  { %v6452_v11 = vadd.f32 %v6451_v44, %v6362_v57 }
 0x9d9   :  { %v6369_v20 = vpop.f32.mrb[36].mxu0 }
 0x9da   :  { %v6370_v43 = vadd.f32 %v6369_v20, %v6281_v40  ;;  %v11247_v12 = vpop.f32.mrb[37].mxu0  ;;  %v7586_v40 = vmul.u32 4, %v12285_v3 }
 0x9dc   :  { %v6458_v42 = vadd.f32 %v6457_v39, %v6370_v43  ;;  %v7587_v58 = vsub.s32 %v12299_v5, %v7586_v40 }
 0x9dd   :  { %v6377_v15 = vpop.f32.mrb[38].mxu0 }
 0x9de   :  { %v6378_v16 = vadd.f32 %v6377_v15, %v6288_v29  ;;  %v11250_v38 = vpop.f32.mrb[39].mxu0  ;;  %vm7588_vm3 = vcmp.ge.s32.totalorder %v7587_v58, 0  ;;  %vm7589_vm2 = vcmp.lt.s32.totalorder %v7587_v58, 4  ;;  %v10110_v29 = vld [vmem:[#allocation5 + $0x78] ss:$0 sm:$0xff] }
 0x9df   :  { %vm7590_vm9 = vmand %vm7588_vm3, %vm7589_vm2 }
 0x9e0   :  { %v6464_v31 = vadd.f32 %v6463_v2, %v6378_v16  ;;  %v10111_v9 = vsel %vm7590_vm9, 1.0, %v13739_v48 }
 0x9e1   :  { %v6535_v41 = vpop.f32.mrb[40].mxu0  ;;  %v7594_v19 = vsel %vm7131_vm13, %v10111_v9, 0 }
 0x9e2   :  { %v6536_v51 = vadd.f32 %v6535_v41, %v6452_v11  ;;  %v11266_v7 = vpop.f32.mrb[41].mxu0  ;;  %v7666_v56 = vsub.f32 %v7594_v19, %v7594_v19 }
 0x9e4   :  { %v6551_v35 = vadd.f32 %v6536_v51, %v13376_v8  ;;  %v7667_v2 = vand.u32 4294901760, %v7666_v56 }
 0x9e5   :  { %v6541_v27 = vpop.f32.mrb[42].mxu0 }
 0x9e6   :  { %v6566_v47 = vadd.f32 %v6558_v4, %v6551_v35  ;;  %v6542_v10 = vadd.f32 %v6541_v27, %v6458_v42  ;;  %v11269_v53 = vpop.f32.mrb[43].mxu0  ;;  %v7668_v57 = vsub.f32 %v7666_v56, %v7667_v2 }
 0x9e8   :  { %v6552_v14 = vadd.f32 %v6542_v10, %v13379_v18  ;;  %vm6569_vm4 = vcmp.gt.f32.partialorder %v6566_v47, 0.0  ;;  %v6572_v21 = vmul.f32 0.2, %v6566_v47  ;;  %v7669_v20 = vand.u32 4294901760, %v7668_v57  ;;  %v57_v57 = vld [vmem:[#allocation5 + $0x80] sm:$0xff] }
 0x9e9   :  { %v6547_v6 = vpop.f32.mrb[44].mxu0 }
 0x9ea   :  { %v6567_v37 = vadd.f32 %v6560_v25, %v6552_v14  ;;  %v6548_v23 = vadd.f32 %v6547_v6, %v6464_v31  ;;  %v11272_v50 = vpop.f32.mrb[45].mxu0  ;;  %v6575_v1 = vsel %vm6569_vm4, %v6566_v47, %v6572_v21 }
 0x9eb   :  { %v6582_v28 = vmul.f32 %v6580_v36, %v6575_v1 }
 0x9ec   :  { %v6553_v26 = vadd.f32 %v6548_v23, %v13383_v63  ;;  %vm6570_vm5 = vcmp.gt.f32.partialorder %v6567_v37, 0.0  ;;  %v6573_v32 = vmul.f32 0.2, %v6567_v37 }
 0x9ed   :  { %v6585_v46 = vsel %vm4391_vm7, %v6582_v28, 0.0 }
 0x9ee   :  { %v6568_v49 = vadd.f32 %v6562_v61, %v6553_v26  ;;  %6586 = vadd.xlane.f32.xlu1 %v6585_v46  ;;  %v6576_v44 = vsel %vm6570_vm5, %v6567_v37, %v6573_v32 }
 0x9ef   :  { %v6583_v45 = vmul.f32 %v6580_v36, %v6576_v44 }
 0x9f0   :  { %vm6571_vm6 = vcmp.gt.f32.partialorder %v6568_v49, 0.0  ;;  %v6574_v13 = vmul.f32 0.2, %v6568_v49 }
 0x9f1   :  { %v6588_v24 = vsel %vm4391_vm7, %v6583_v45, 0.0 }
 0x9f2   :  { %6589 = vadd.xlane.f32.xlu0 %v6588_v24  ;;  %v6577_v0 = vsel %vm6571_vm6, %v6568_v49, %v6574_v13 }
 0x9f3   :  { %v6584_v54 = vmul.f32 %v6580_v36, %v6577_v0 }
 0x9f5   :  { %v6591_v39 = vsel %vm4398_vm10, %v6584_v54, 0.0 }
 0x9f6   :  { %6592 = vadd.xlane.f32.xlu0 %v6591_v39 }
 0xa15   :  { %v7581_v62 = vpop.f32.mrb[46].mxu0 }
 0xa16   :  { %v11886_v55 = vadd.f32 %v10110_v29, %v7581_v62  ;;  %v11356_v60 = vpop.f32.mrb[47].mxu0 }
 0xa17   :  { %v58_v60 = vld [vmem:[#allocation5 + $0x88] sm:$0xff] }
 0xa18   :  { %v7585_v4 = vmax.f32 %v11886_v55, 0.0 }
 0xa1a   :  { %v7597_v11 = vsel %vm7135_vm14, %v7585_v4, 0  ;;  %v8501_v4 = vand.u32 4294901760, %v57_v57 }
 0xa1b   :  { %v7600_v43 = vand.u32 4294901760, %v7597_v11 }
 0xa1d   :  { %v7677_v12 = vsub.f32 %v7597_v11, %v7600_v43  ;;  %11358 = vmatpush3.msra.mxu0 %v7600_v43  ;;  %v13438_v11 = vsub.f32 %v57_v57, %v8501_v4 }
 0xa1e   :  { %11360 = vmatmul.mubr.f32.vlgmr.msra.gmra.mrb[48].mxu0 %v7669_v20  ;;  %11362 = vmatprep.subr.mxu0 %v13739_v48 }
 0xa1f   :  { %v7678_v42 = vand.u32 4294901760, %v7677_v12  ;;  %11364 = vmatprep.mubr.msk.f32.mxu0 %vm12220_vm0, %v13739_v48  ;;  %v8586_v57 = vand.u32 4294901760, %v13438_v11 }
 0xa21   :  { %v7679_v15 = vsub.f32 %v7677_v12, %v7678_v42 }
 0xa23   :  { %v7680_v25 = vand.u32 4294901760, %v7679_v15 }
 0xa25   :  { %11363 = vmatpush3.msra.mxu0 %v7680_v25 }
 0xa26   :  { %11365 = vmatmul.mubr.msk.f32.vlgmr.msra.gmra.mrb[48].mxu0 %vm7131_vm13, %v10111_v9  ;;  %11367 = vmatprep.subr.mxu0 %v13739_v48 }
 0xa27   :  { %11368 = vmatpush3.msra.mxu0 %v7677_v12  ;;  %11369 = vmatprep.mubr.msk.f32.mxu0 %vm12220_vm0, %v13739_v48 }
 0xa28   :  { %11372 = vmatprep.subr.mxu0 %v13739_v48 }
 0xa2e   :  { %11370 = vmatmul.mubr.f32.vlgmr.msra.gmra.mrb[48].mxu0 %v7666_v56 }
 0xa2f   :  { %11373 = vmatpush3.msra.mxu0 %v7600_v43  ;;  %11374 = vmatprep.mubr.msk.f32.mxu0 %vm12220_vm0, %v13739_v48 }
 0xa30   :  { %11377 = vmatprep.subr.mxu0 %v13739_v48 }
 0xa36   :  { %11375 = vmatmul.mubr.f32.vlgmr.msra.gmra.mrb[48].mxu0 %v7667_v2 }
 0xa37   :  { %11378 = vmatpush3.msra.mxu0 %v7678_v42  ;;  %11379 = vmatprep.mubr.msk.f32.mxu0 %vm12220_vm0, %v13739_v48 }
 0xa38   :  { %11382 = vmatprep.subr.mxu0 %v13739_v48 }
 0xa3e   :  { %11380 = vmatmul.mubr.msk.f32.vlgmr.msra.gmra.mrb[48].mxu0 %vm7131_vm13, %v10111_v9 }
 0xa3f   :  { %11383 = vmatpush3.msra.mxu0 %v7600_v43  ;;  %11384 = vmatprep.mubr.msk.f32.mxu0 %vm12220_vm0, %v13739_v48 }
 0xa40   :  { %11771 = vmatprep.subr.bf16.mxu0 %v13740_v34 }
 0xa46   :  { %11385 = vmatmul.mubr.msk.f32.vlgmr.msra.gmra.mrb[48].mxu0 %vm7131_vm13, %v10111_v9 }
 0xa47   :  { %11433 = vmatprep.mubr.msk.f32.mxu0 %vm12220_vm0, %v13739_v48 }
 0xa7b   :  { %v6587_v38 = vpop.xlane.xlu1 %6586 }
 0xa7f   :  { %v6590_v16 = vpop.xlane.xlu0 %6589 }
 0xa80   :  { %v6595_v31 = vmax.f32 %v6587_v38, %v6590_v16 }
 0xa83   :  { %v6593_v41 = vpop.xlane.xlu0 %6592 }
 0xa84   :  { %v6594_v51 = vsel %vm303_vm1, %v6593_v41, -inf }
 0xa85   :  { %v6596_v7 = vmax.f32 %v6595_v31, %v6594_v51 }
 0xa87   :  { %v6597_v61 = vrot.slane %v6596_v7, 4 }
 0xa89   :  { %v6598_v35 = vmax.f32 %v6596_v7, %v6597_v61 }
 0xa8b   :  { %v6599_v27 = vrot.slane %v6598_v35, 2 }
 0xa8d   :  { %v6600_v47 = vmax.f32 %v6598_v35, %v6599_v27 }
 0xa8f   :  { %v6601_v10 = vrot.slane %v6600_v47, 1 }
 0xa91   :  { %v6602_v53 = vmax.f32 %v6600_v47, %v6601_v10 }
 0xa93   :  { %v6603_v14 = vsub.f32 %v6587_v38, %v6602_v53  ;;  %v6604_v36 = vsub.f32 %v6590_v16, %v6602_v53  ;;  %v6605_v21 = vsub.f32 %v6593_v41, %v6602_v53 }
 0xa95   :  { %v6606_v6 = vmul.f32 1.442695, %v6603_v14  ;;  %v6608_v37 = vmul.f32 1.442695, %v6604_v36  ;;  %v6610_v23 = vmul.f32 1.442695, %v6605_v21 }
 0xa97   :  { %12141 = vpow2.f32 %v6606_v6 }
 0xa98   :  { %12143 = vpow2.f32 %v6608_v37 }
 0xa99   :  { %12145 = vpow2.f32 %v6610_v23 }
 0xaa1   :  { %v12142_v50 = vpop.eup %12141 }
 0xaa2   :  { %v12144_v1 = vpop.eup %12143  ;;  %v6612_v28 = vmul.f32 %v12142_v50, %v12962_v17 }
 0xaa3   :  { %v12146_v26 = vpop.eup %12145  ;;  %v6613_v32 = vmul.f32 %v12144_v1, %v12969_v22 }
 0xaa4   :  { %v6614_v46 = vmul.f32 %v12146_v26, %v12549_v33  ;;  %v6615_v49 = vsel %vm1726_vm8, %v6612_v28, 0.0 }
 0xaa5   :  { %v6616_v44 = vsel %vm1726_vm8, %v6613_v32, 0.0 }
 0xaa6   :  { %v6617_v45 = vadd.f32 %v6616_v44, %v6615_v49  ;;  %v6618_v13 = vsel %vm4426_vm11, %v6614_v46, 0.0  ;;  %v65_v46 = vld [vmem:[#allocation5 + $0xc0] sm:$0x3] }
 0xaa8   :  { %v6619_v24 = vadd.f32 %v6618_v13, %v6617_v45  ;;  %v8049_v45 = vsel %vm7135_vm14, %v65_v46, 0  ;;  %v13742_v13 = vld [vmem:[#allocation13_spill] sm:$0xff] }
 0xaaa   :  { %v6620_v0 = vrot.slane %v6619_v24, 4 }
 0xaac   :  { %v6621_v54 = vadd.f32 %v6620_v0, %v6619_v24  ;;  %v8052_v0 = vand.u32 4294901760, %v8049_v45 }
 0xaae   :  { %v6622_v39 = vrot.slane %v6621_v54, 2 }
 0xab0   :  { %v6623_v40 = vadd.f32 %v6622_v39, %v6621_v54  ;;  %v8129_v39 = vsub.f32 %v8049_v45, %v8052_v0 }
 0xab2   :  { %v6624_v58 = vrot.slane %v6623_v40, 1 }
 0xab4   :  { %v6625_v9 = vadd.f32 %v6624_v58, %v6623_v40  ;;  %v8130_v58 = vand.u32 4294901760, %v8129_v39 }
 0xab6   :  { %v6627_v19 = vmul.f32 %v12969_v22, %v6625_v9  ;;  %v6626_v56 = vmul.f32 %v12962_v17, %v6625_v9  ;;  %v6628_v62 = vmul.f32 %v12549_v33, %v6625_v9  ;;  %v8504_v22 = vand.u32 4294901760, %v58_v60 }
 0xab8   :  { %v6632_v2 = vsel %vm1726_vm8, %v6627_v19, 0.0  ;;  %v6629_v29 = vsel %vm1726_vm8, %v6626_v56, 0.0  ;;  %v6635_v55 = vsel %vm4426_vm11, %v6628_v62, 0.0  ;;  %v13440_v17 = vsub.f32 %v58_v60, %v8504_v22  ;;  %v13491_v62 = vld [vmem:[#allocation5 + $0x98] sm:$0xff] }
 0xab9   :  { %6633 = vadd.xlane.f32.xlu1 %v6632_v2  ;;  %6630 = vadd.xlane.f32.xlu0 %v6629_v29  ;;  %v13442_v20 = vpack.c.bf16 %v8504_v22, %v8501_v4  ;;  %v8131_v19 = vsub.f32 %v8129_v39, %v8130_v58  ;;  %v13489_v29 = vld [vmem:[#allocation5 + $0x90] sm:$0xff] }
 0xaba   :  { %v8593_v60 = vand.u32 4294901760, %v13440_v17 }
 0xabb   :  { %11773 = vmatpush3.bf16.msra.mxu0 %v13442_v20  ;;  %v8132_v2 = vand.u32 4294901760, %v8131_v19 }
 0xabc   :  { %11774 = vmatprep.subr.bf16.mxu0 %v13740_v34 }
 0xabd   :  { %6636 = vadd.xlane.f32.xlu0 %v6635_v55  ;;  %v8507_v55 = vand.u32 4294901760, %v13489_v29 }
 0xabf   :  { %v13506_v4 = vsub.f32 %v13489_v29, %v8507_v55 }
 0xaca   :  { %6648 = vrot.lane.b32.xlu1 %v13179_v59, %s12222_s17 }
 0xb19   :  { %v8041_v32 = vpop.f32.mrb[48].mxu0 }
 0xb1a   :  { %v11386_v49 = vpop.f32.mrb[49].mxu0  ;;  %v8046_v44 = vsel %vm7131_vm13, %v8041_v32, 0 }
 0xb1b   :  { %v13471_v24 = vand.u32 4294901760, %v8046_v44 }
 0xb1d   :  { %v8118_v54 = vsub.f32 %v8046_v44, %v13471_v24 }
 0xb1f   :  { %v8119_v40 = vand.u32 4294901760, %v8118_v54 }
 0xb21   :  { %v8120_v9 = vsub.f32 %v8118_v54, %v8119_v40 }
 0xb23   :  { %v8121_v56 = vand.u32 4294901760, %v8120_v9 }
 0xb46   :  { %v6634_v33 = vpop.xlane.xlu1 %6633  ;;  %v6631_v43 = vpop.xlane.xlu0 %6630 }
 0xb47   :  { %12147 = vrcp.f32 %v6634_v33  ;;  %v8587_v33 = vsub.f32 %v13438_v11, %v8586_v57 }
 0xb48   :  { %12149 = vrcp.f32 %v6631_v43  ;;  %v8594_v43 = vsub.f32 %v13440_v17, %v8593_v60 }
 0xb4a   :  { %v6637_v12 = vpop.xlane.xlu0 %6636  ;;  %v6649_v9 = vpop.permute.xlu1 %6648 }
 0xb4b   :  { %12151 = vrcp.f32 %v6637_v12  ;;  %v8600_v12 = vand.u32 4294901760, %v13506_v4 }
 0xb51   :  { %v12148_v59 = vpop.eup %12147 }
 0xb52   :  { %v12150_v42 = vpop.eup %12149  ;;  %v6641_v15 = vmul.f32 %v12148_v59, %v12144_v1 }
 0xb53   :  { %v6639_v25 = vmul.f32 %v12150_v42, %v12142_v50  ;;  %v8588_v42 = vand.u32 4294901760, %v8587_v33 }
 0xb54   :  { %v6645_v16 = vmul.f32 %v6641_v15, %v13379_v18  ;;  %v8595_v15 = vand.u32 4294901760, %v8594_v43 }
 0xb55   :  { %v12152_v38 = vpop.eup %12151  ;;  %v6644_v31 = vmul.f32 %v6639_v25, %v13376_v8  ;;  %v8601_v25 = vsub.f32 %v13506_v4, %v8600_v12 }
 0xb56   :  { %v6643_v41 = vmul.f32 %v12152_v38, %v12146_v26  ;;  %v6658_v51 = vand.u32 4294901760, %v6645_v16  ;;  %v11784_v38 = vpack.c.bf16 %v8595_v15, %v8588_v42 }
 0xb57   :  { %v6655_v7 = vand.u32 4294901760, %v6644_v31 }
 0xb58   :  { %v6741_v61 = vsub.f32 %v6645_v16, %v6658_v51  ;;  %v6646_v35 = vmul.f32 %v6643_v41, %v13383_v63 }
 0xb59   :  { %v11754_v27 = vpack.c.bf16 %v6658_v51, %v6655_v7  ;;  %v6734_v47 = vsub.f32 %v6644_v31, %v6655_v7  ;;  %v8602_v31 = vand.u32 4294901760, %v8601_v25  ;;  %v61_v7 = vld [vmem:[#allocation5 + $0xa0] sm:$0xff] }
 0xb5a   :  { %v6652_v10 = vsel %vm303_vm1, %v6646_v35, 0  ;;  %v6742_v53 = vand.u32 4294901760, %v6741_v61  ;;  %v8513_v35 = vand.u32 4294901760, %v61_v7  ;;  %vm9047_vm1 = vcmask 261120  }
 0xb5b   :  { %11755 = vmatpush3.bf16.msra.mxu1 %v11754_v27  ;;  %v6661_v14 = vand.u32 4294901760, %v6652_v10  ;;  %v6735_v36 = vand.u32 4294901760, %v6734_v47  ;;  %v11760_v21 = vpack.c.bf16 %v6741_v61, %v6734_v47 }
 0xb5c   :  { %11277 = vmatprep.subr.mxu1 %v13739_v48  ;;  %v6743_v18 = vsub.f32 %v6741_v61, %v6742_v53  ;;  %v62_v61 = vld [vmem:[#allocation5 + $0xa8] sm:$0xff] }
 0xb5d   :  { %v6748_v6 = vsub.f32 %v6652_v10, %v6661_v14  ;;  %v6736_v8 = vsub.f32 %v6734_v47, %v6735_v36  ;;  %v11766_v37 = vpack.c.bf16 %v6742_v53, %v6735_v36  ;;  %v13543_v47 = vsub.f32 %v61_v7, %v8513_v35  ;;  %v63_v53 = vld [vmem:[#allocation5 + $0xb0] sm:$0xff] }
 0xb5e   :  { %v6744_v23 = vand.u32 4294901760, %v6743_v18  ;;  %v8519_v18 = vand.u32 4294901760, %v63_v53 }
 0xb5f   :  { %11278 = vmatpush3.msra.mxu1 %v6661_v14  ;;  %v6737_v50 = vand.u32 4294901760, %v6736_v8  ;;  %v6749_v1 = vand.u32 4294901760, %v6748_v6  ;;  %v8614_v36 = vand.u32 4294901760, %v13543_v47 }
 0xb60   :  { %11280 = vmatmul.mubr.f32.vlgmr.msra.gmra.mrb[62].mxu1 %v13109_v30  ;;  %11756 = vmatprep.subr.bf16.mxu1 %v13740_v34  ;;  %v13741_v30 = vld [vmem:[#allocation12_spill] sm:$0xff] }
 0xb61   :  { %v11757_v63 = vpack.c.bf16 %v6744_v23, %v6737_v50  ;;  %v6750_v28 = vsub.f32 %v6748_v6, %v6749_v1  ;;  %11288 = vmatprep.mubr.msk.f32.mxu1 %vm12220_vm0, %v13739_v48  ;;  %v8615_v8 = vsub.f32 %v13543_v47, %v8614_v36  ;;  %v13551_v23 = vsub.f32 %v63_v53, %v8519_v18 }
 0xb63   :  { %11758 = vmatpush3.bf16.msra.mxu1 %v11757_v63  ;;  %v6751_v26 = vand.u32 4294901760, %v6750_v28  ;;  %v8628_v28 = vand.u32 4294901760, %v13551_v23 }
 0xb64   :  { %11286 = vmatprep.subr.mxu1 %v13739_v48 }
 0xb65   :  { %v8629_v32 = vsub.f32 %v13551_v23, %v8628_v28 }
 0xb67   :  { %11287 = vmatpush3.msra.mxu1 %v6751_v26  ;;  %v8630_v49 = vand.u32 4294901760, %v8629_v32 }
 0xb68   :  { %11289 = vmatmul.mubr.msk.f32.vlgmr.msra.gmra.mrb[62].mxu1 %vm4460_vm12, %v12407_v52  ;;  %11759 = vmatprep.subr.bf16.mxu1 %v13740_v34 }
 0xb69   :  { %11761 = vmatpush3.bf16.msra.mxu1 %v11760_v21  ;;  %11297 = vmatprep.mubr.msk.f32.mxu1 %vm12220_vm0, %v13739_v48 }
 0xb6a   :  { %11295 = vmatprep.subr.mxu1 %v13739_v48 }
 0xb6d   :  { %11296 = vmatpush3.msra.mxu1 %v6748_v6 }
 0xb6e   :  { %11762 = vmatprep.subr.bf16.mxu1 %v13740_v34 }
 0xb70   :  { %11298 = vmatmul.mubr.f32.vlgmr.msra.gmra.mrb[62].mxu1 %v13741_v30 }
 0xb71   :  { %11764 = vmatpush3.bf16.msra.mxu1 %v11754_v27  ;;  %11306 = vmatprep.mubr.msk.f32.mxu1 %vm12220_vm0, %v13739_v48 }
 0xb72   :  { %11304 = vmatprep.subr.mxu1 %v13739_v48 }
 0xb75   :  { %11305 = vmatpush3.msra.mxu1 %v6661_v14 }
 0xb76   :  { %11765 = vmatprep.subr.bf16.mxu1 %v13740_v34 }
 0xb78   :  { %11307 = vmatmul.mubr.f32.vlgmr.msra.gmra.mrb[62].mxu1 %v13742_v13 }
 0xb79   :  { %11767 = vmatpush3.bf16.msra.mxu1 %v11766_v37  ;;  %11315 = vmatprep.mubr.msk.f32.mxu1 %vm12220_vm0, %v13739_v48 }
 0xb7a   :  { %11313 = vmatprep.subr.mxu1 %v13739_v48 }
 0xb7d   :  { %11314 = vmatpush3.msra.mxu1 %v6749_v1  ;;  %v8616_v1 = vand.u32 4294901760, %v8615_v8  ;;  %v11820_v8 = vpack.c.bf16 %v8593_v60, %v8586_v57 }
 0xb7e   :  { %11768 = vmatprep.subr.bf16.mxu1 %v13740_v34 }
 0xb80   :  { %11316 = vmatmul.mubr.msk.f32.vlgmr.msra.gmra.mrb[62].mxu1 %vm4460_vm12, %v12407_v52 }
 0xb81   :  { %11770 = vmatpush3.bf16.msra.mxu1 %v11754_v27  ;;  %11324 = vmatprep.mubr.msk.f32.mxu1 %vm12220_vm0, %v13739_v48  ;;  %v8516_v27 = vand.u32 4294901760, %v62_v61 }
 0xb82   :  { %11322 = vmatprep.subr.mxu1 %v13739_v48 }
 0xb83   :  { %v13545_v10 = vsub.f32 %v62_v61, %v8516_v27 }
 0xb85   :  { %11323 = vmatpush3.msra.mxu1 %v6661_v14  ;;  %v64_v14 = vld [vmem:[#allocation5 + $0xb8] sm:$0xff]  ;;  %v8621_v21 = vand.u32 4294901760, %v13545_v10 }
 0xb86   :  { %11387 = vmatprep.subr.mxu1 %v13739_v48  ;;  %v8522_v6 = vand.u32 4294901760, %v64_v14 }
 0xb87   :  { %v8622_v37 = vsub.f32 %v13545_v10, %v8621_v21 }
 0xb88   :  { %11325 = vmatmul.mubr.msk.f32.vlgmr.msra.gmra.mrb[62].mxu1 %vm4460_vm12, %v12407_v52  ;;  %v8510_v52 = vand.u32 4294901760, %v13491_v62  ;;  %v13553_v50 = vsub.f32 %v64_v14, %v8522_v6 }
 0xb89   :  { %11388 = vmatpush3.msra.mxu1 %v8052_v0  ;;  %11389 = vmatprep.mubr.msk.f32.mxu1 %vm12220_vm0, %v13739_v48  ;;  %v8623_v63 = vand.u32 4294901760, %v8622_v37  ;;  %v70_v37 = vld [vmem:[#allocation5 + $0xe8] sm:$0xff] }
 0xb8a   :  { %11392 = vmatprep.subr.mxu1 %v13739_v48  ;;  %v13511_v22 = vsub.f32 %v13491_v62, %v8510_v52  ;;  %v8635_v26 = vand.u32 4294901760, %v13553_v50  ;;  %v13564_v45 = vpack.c.bf16 %v8510_v52, %v8507_v55 }
 0xb8b   :  { %v11790_v30 = vpack.c.bf16 %v8623_v63, %v8616_v1 }
 0xb8c   :  { %11390 = vmatmul.mubr.f32.vlgmr.msra.gmra.mrb[64].mxu1 %v8121_v56  ;;  %v8607_v59 = vand.u32 4294901760, %v13511_v22  ;;  %v8636_v46 = vsub.f32 %v13553_v50, %v8635_v26  ;;  %11776 = vmatpush3.bf16.msra.mxu0 %v13564_v45 }
 0xb8d   :  { %11393 = vmatpush3.msra.mxu1 %v8132_v2  ;;  %11394 = vmatprep.mubr.msk.f32.mxu1 %vm12220_vm0, %v13739_v48 }
 0xb8e   :  { %11397 = vmatprep.subr.mxu1 %v13739_v48  ;;  %v8608_v16 = vsub.f32 %v13511_v22, %v8607_v59  ;;  %v8637_v44 = vand.u32 4294901760, %v8636_v46  ;;  %11777 = vmatprep.subr.bf16.mxu0 %v13740_v34 }
 0xb90   :  { %11395 = vmatmul.mubr.f32.vlgmr.msra.gmra.mrb[66].mxu1 %v13471_v24  ;;  %v8609_v41 = vand.u32 4294901760, %v8608_v16  ;;  %v11793_v13 = vpack.c.bf16 %v8637_v44, %v8630_v49 }
 0xb91   :  { %11398 = vmatpush3.msra.mxu1 %v8129_v39  ;;  %11399 = vmatprep.mubr.msk.f32.mxu1 %vm12220_vm0, %v13739_v48  ;;  %v11805_v39 = vpack.c.bf16 %v13553_v50, %v13551_v23  ;;  %v9061_v50 = vand.u32 4294901760, %v70_v37 }
 0xb92   :  { %11402 = vmatprep.subr.mxu1 %v13739_v48  ;;  %v11787_v51 = vpack.c.bf16 %v8609_v41, %v8602_v31  ;;  %v11796_v41 = vpack.c.bf16 %v13440_v17, %v13438_v11  ;;  %v67_v11 = vld [vmem:[#allocation5 + $0xd0] sm:$0xff]  ;;  %v68_v17 = vld [vmem:[#allocation5 + $0xd8] sm:$0xff] }
 0xb93   :  { %v9052_v57 = vand.u32 4294901760, %v67_v11  ;;  %v9055_v60 = vand.u32 4294901760, %v68_v17 }
 0xb94   :  { %11400 = vmatmul.mubr.f32.vlgmr.msra.gmra.mrb[68].mxu1 %v8118_v54  ;;  %v11802_v54 = vpack.c.bf16 %v13545_v10, %v13543_v47 }
 0xb95   :  { %11403 = vmatpush3.msra.mxu1 %v8052_v0  ;;  %11404 = vmatprep.mubr.msk.f32.mxu1 %vm12220_vm0, %v13739_v48 }
 0xb96   :  { %11407 = vmatprep.subr.mxu1 %v13739_v48 }
 0xb98   :  { %11405 = vmatmul.mubr.f32.vlgmr.msra.gmra.mrb[70].mxu1 %v8119_v40  ;;  %v13581_v40 = vpack.c.bf16 %v8621_v21, %v8614_v36 }
 0xb99   :  { %11408 = vmatpush3.msra.mxu1 %v8130_v58  ;;  %11409 = vmatprep.mubr.msk.f32.mxu1 %vm12220_vm0, %v13739_v48  ;;  %v13583_v58 = vpack.c.bf16 %v8635_v26, %v8628_v28 }
 0xb9a   :  { %11412 = vmatprep.subr.mxu1 %v13739_v48 }
 0xb9c   :  { %11410 = vmatmul.mubr.f32.vlgmr.msra.gmra.mrb[72].mxu1 %v13471_v24 }
 0xb9d   :  { %11413 = vmatpush3.msra.mxu1 %v8052_v0  ;;  %11414 = vmatprep.mubr.msk.f32.mxu1 %vm12220_vm0, %v13739_v48  ;;  %v13573_v0 = vpack.c.bf16 %v8522_v6, %v8519_v18 }
 0xb9e   :  { %11783 = vmatprep.subr.bf16.mxu1 %v13740_v34 }
 0xba0   :  { %11415 = vmatmul.mubr.f32.vlgmr.msra.gmra.mrb[74].mxu1 %v13471_v24  ;;  %v13569_v24 = vpack.c.bf16 %v8516_v27, %v8513_v35  ;;  %v11799_v27 = vpack.c.bf16 %v13511_v22, %v13506_v4  ;;  %v13644_v4 = vpack.c.bf16 %v9055_v60, %v9052_v57  ;;  %v13646_v22 = vsub.f32 %v67_v11, %v9052_v57 }
 0xba1   :  { %11785 = vmatpush3.bf16.msra.mxu1 %v11784_v38  ;;  %11452 = vmatprep.mubr.msk.f32.mxu1 %vm12220_vm0, %v13739_v48 }
 0xba2   :  { %11786 = vmatprep.subr.bf16.mxu1 %v13740_v34  ;;  %11779 = vmatpush3.bf16.msra.mxu0 %v13569_v24  ;;  %v9133_v1 = vand.u32 4294901760, %v13646_v22 }
 0xba3   :  { %11780 = vmatprep.subr.bf16.mxu0 %v13740_v34 }
 0xba4   :  { %v9134_v32 = vsub.f32 %v13646_v22, %v9133_v1 }
 0xba5   :  { %11788 = vmatpush3.bf16.msra.mxu1 %v11787_v51 }
 0xba6   :  { %11789 = vmatprep.subr.bf16.mxu1 %v13740_v34  ;;  %11782 = vmatpush3.bf16.msra.mxu0 %v13573_v0  ;;  %v9135_v49 = vand.u32 4294901760, %v9134_v32 }
 0xba7   :  { %11795 = vmatprep.subr.bf16.mxu0 %v13740_v34 }
 0xba9   :  { %11791 = vmatpush3.bf16.msra.mxu1 %v11790_v30  ;;  %v9153_v30 = vsub.f32 %v70_v37, %v9061_v50 }
 0xbaa   :  { %11792 = vmatprep.subr.bf16.mxu1 %v13740_v34 }
 0xbad   :  { %11794 = vmatpush3.bf16.msra.mxu1 %v11793_v13 }
 0xbae   :  { %11807 = vmatprep.subr.bf16.mxu1 %v13740_v34 }
 0xc5b   :  { %v7122_v19 = vpop.f32.mrb[62].mxu1 }
 0xc5c   :  { %v11885_v56 = vadd.f32 %v7122_v19, %v6649_v9  ;;  %v11326_v2 = vpop.f32.mrb[63].mxu1 }
 0xc5e   :  { %v7126_v29 = vmax.f32 %v11885_v56, 0.0 }
 0xc5f   :  { %v8123_v62 = vpop.f32.mrb[64].mxu1 }
 0xc60   :  { %v8498_v55 = vsel %vm4391_vm7, %v7126_v29, 0  ;;  %v11391_v52 = vpop.f32.mrb[65].mxu1 }
 0xc61   :  { %v13586_v33 = vand.u32 4294901760, %v8498_v55 }
 0xc63   :  { %v8574_v43 = vsub.f32 %v8498_v55, %v13586_v33  ;;  %11453 = vmatmul.mubr.f32.vlgmr.msra.gmra.mrb[76].mxu1 %v13586_v33  ;;  %v8199_v42 = vpop.f32.mrb[66].mxu1 }
 0xc64   :  { %11809 = vmatpush3.bf16.msra.mxu1 %v13442_v20  ;;  %11490 = vmatprep.mubr.msk.f32.mxu1 %vm12220_vm0, %v13739_v48  ;;  %v8200_v15 = vadd.f32 %v8199_v42, %v8123_v62  ;;  %v11396_v25 = vpop.f32.mrb[67].mxu1 }
 0xc65   :  { %v8575_v16 = vand.u32 4294901760, %v8574_v43  ;;  %11810 = vmatprep.subr.bf16.mxu1 %v13740_v34 }
 0xc67   :  { %v8576_v38 = vsub.f32 %v8574_v43, %v8575_v16  ;;  %v8273_v31 = vpop.f32.mrb[68].mxu1 }
 0xc68   :  { %11812 = vmatpush3.bf16.msra.mxu1 %v13564_v45  ;;  %v8274_v51 = vadd.f32 %v8273_v31, %v8200_v15  ;;  %v11401_v7 = vpop.f32.mrb[69].mxu1 }
 0xc69   :  { %11813 = vmatprep.subr.bf16.mxu1 %v13740_v34  ;;  %v8577_v61 = vand.u32 4294901760, %v8576_v38 }
 0xc6b   :  { %11434 = vmatmul.mubr.f32.vlgmr.msra.gmra.mrb[50].mxu0 %v8577_v61  ;;  %v8347_v35 = vpop.f32.mrb[70].mxu1 }
 0xc6c   :  { %11797 = vmatpush3.bf16.msra.mxu0 %v11796_v41  ;;  %11815 = vmatpush3.bf16.msra.mxu1 %v13569_v24  ;;  %v8348_v47 = vadd.f32 %v8347_v35, %v8274_v51  ;;  %v11406_v10 = vpop.f32.mrb[71].mxu1 }
 0xc6d   :  { %11798 = vmatprep.subr.bf16.mxu0 %v13740_v34  ;;  %11816 = vmatprep.subr.bf16.mxu1 %v13740_v34 }
 0xc6e   :  { %11471 = vmatprep.mubr.msk.f32.mxu0 %vm12220_vm0, %v13739_v48 }
 0xc6f   :  { %v8421_v53 = vpop.f32.mrb[72].mxu1 }
 0xc70   :  { %11800 = vmatpush3.bf16.msra.mxu0 %v11799_v27  ;;  %11818 = vmatpush3.bf16.msra.mxu1 %v13573_v0  ;;  %v8422_v14 = vadd.f32 %v8421_v53, %v8348_v47  ;;  %v11411_v36 = vpop.f32.mrb[73].mxu1  ;;  %v10115_v27 = vld [vmem:[#allocation5 + $0xc8] ss:$0 sm:$0xff] }
 0xc71   :  { %11801 = vmatprep.subr.bf16.mxu0 %v13740_v34  ;;  %11831 = vmatprep.subr.bf16.mxu1 %v13740_v34 }
 0xc73   :  { %11491 = vmatmul.mubr.f32.vlgmr.msra.gmra.mrb[78].mxu1 %v8575_v16  ;;  %v8493_v21 = vpop.f32.mrb[74].mxu1 }
 0xc74   :  { %11803 = vmatpush3.bf16.msra.mxu0 %v11802_v54  ;;  %11833 = vmatpush3.bf16.msra.mxu1 %v13442_v20  ;;  %v13609_v18 = vadd.f32 %v8493_v21, %v8422_v14  ;;  %v11416_v6 = vpop.f32.mrb[75].mxu1  ;;  %v11823_v20 = vpack.c.bf16 %v8607_v59, %v8600_v12  ;;  %v13648_v12 = vsub.f32 %v68_v17, %v9055_v60  ;;  %v69_v59 = vld [vmem:[#allocation5 + $0xe0] sm:$0xff] }
 0xc75   :  { %11804 = vmatprep.subr.bf16.mxu0 %v13740_v34  ;;  %11834 = vmatprep.subr.bf16.mxu1 %v13740_v34  ;;  %v9058_v23 = vand.u32 4294901760, %v69_v59 }
 0xc76   :  { %11528 = vmatprep.mubr.msk.f32.mxu1 %vm12220_vm0, %v13739_v48  ;;  %v9140_v63 = vand.u32 4294901760, %v13648_v12  ;;  %v11856_v9 = vpack.c.bf16 %v13648_v12, %v13646_v22 }
 0xc77   :  { %v13654_v28 = vpack.c.bf16 %v9061_v50, %v9058_v23  ;;  %v9146_v26 = vsub.f32 %v69_v59, %v9058_v23 }
 0xc78   :  { %11806 = vmatpush3.bf16.msra.mxu0 %v11805_v39  ;;  %11836 = vmatpush3.bf16.msra.mxu1 %v13564_v45  ;;  %v9141_v46 = vsub.f32 %v13648_v12, %v9140_v63  ;;  %v9154_v45 = vand.u32 4294901760, %v9153_v30  ;;  %v11868_v56 = vpack.c.bf16 %v9140_v63, %v9133_v1 }
 0xc79   :  { %11819 = vmatprep.subr.bf16.mxu0 %v13740_v34  ;;  %11837 = vmatprep.subr.bf16.mxu1 %v13740_v34  ;;  %v9147_v44 = vand.u32 4294901760, %v9146_v26  ;;  %v11859_v19 = vpack.c.bf16 %v9153_v30, %v9146_v26 }
 0xc7a   :  { %v9142_v13 = vand.u32 4294901760, %v9141_v46 }
 0xc7b   :  { %11472 = vmatmul.mubr.f32.vlgmr.msra.gmra.mrb[52].mxu0 %v8574_v43  ;;  %v11871_v2 = vpack.c.bf16 %v9154_v45, %v9147_v44 }
 0xc7c   :  { %11821 = vmatpush3.bf16.msra.mxu0 %v11820_v8  ;;  %11839 = vmatpush3.bf16.msra.mxu1 %v13569_v24  ;;  %v9148_v24 = vsub.f32 %v9146_v26, %v9147_v44  ;;  %v11850_v54 = vpack.c.bf16 %v9142_v13, %v9135_v49 }
 0xc7d   :  { %11822 = vmatprep.subr.bf16.mxu0 %v13740_v34  ;;  %11840 = vmatprep.subr.bf16.mxu1 %v13740_v34 }
 0xc7e   :  { %11509 = vmatprep.mubr.msk.f32.mxu0 %vm12220_vm0, %v13739_v48  ;;  %v9149_v39 = vand.u32 4294901760, %v9148_v24 }
 0xc80   :  { %11824 = vmatpush3.bf16.msra.mxu0 %v11823_v20  ;;  %11842 = vmatpush3.bf16.msra.mxu1 %v13573_v0  ;;  %v9155_v0 = vsub.f32 %v9153_v30, %v9154_v45  ;;  %v9537_v20 = vstv %s13725_s1  ;;  %s12223_s1 = smov [#allocation8]  }
 0xc81   :  { %11825 = vmatprep.subr.bf16.mxu0 %v13740_v34  ;;  %11597 = vmatprep.subr.mxu1 %v13739_v48  ;;  %vm9538_vm7 = vcmp.eq.s32.totalorder %v12285_v3, %v9537_v20  ;;  %s9998_s20 = sshll.u32 %s12223_s1, 4  ;;  %s9999_s20 = int_to_ptr.vmem [resolvable:$true] %s9998_s20 }
 0xc82   :  { %vm9539_vm10 = vmand %vm9538_vm7, %vm88_vm15  ;;  %s12187_s21 = scalar_lea.vmem %s9999_s20, 128  ;;  %p12192_p0 = scmp.lt.s32.totalorder %s9999_s20, %s9999_s20 }
 0xc83   :  { %11529 = vmatmul.mubr.f32.vlgmr.msra.gmra.mrb[80].mxu1 %v13586_v33  ;;  %v10117_v11 = vsel %vm9539_vm10, 1.0, %v13739_v48  ;;  %p12188_p13 = scmp.ne.s32.totalorder %s9999_s20, %s12187_s21  ;;  %p12193_p1 = scmp.lt.s32.totalorder %s12187_s21, %s12187_s21 }
 0xc84   :  { %11827 = vmatpush3.bf16.msra.mxu0 %v13581_v40  ;;  %11599 = vmatprep.mubr.msk.f32.mxu1 %vm12220_vm0, %v13739_v48  ;;  %v9156_v40 = vand.u32 4294901760, %v9155_v0  ;;  %v9543_v17 = vsel %vm1726_vm8, %v10117_v11, 0 }
 0xc85   :  { %11828 = vmatprep.subr.bf16.mxu0 %v13740_v34  ;;  %v9612_v57 = vsub.f32 %v9543_v17, %v9543_v17  ;;  %p12194_p2 = por %p12193_p1, %p12192_p0 }
 0xc87   :  { %v9613_v60 = vand.u32 4294901760, %v9612_v57  ;;  %p12195_p3 = pnand %p12194_p2, %p12188_p13 }
 0xc88   :  { %11830 = vmatpush3.bf16.msra.mxu0 %v13583_v58  ;;  %v11853_v58 = vpack.c.bf16 %v9156_v40, %v9149_v39 }
 0xc89   :  { %11843 = vmatprep.subr.bf16.mxu0 %v13740_v34 }
 0xc8b   :  { %11510 = vmatmul.mubr.f32.vlgmr.msra.gmra.mrb[54].mxu0 %v13586_v33 }
 0xc8c   :  { %11539 = vmatprep.mubr.msk.f32.mxu0 %vm12220_vm0, %v13739_v48  ;;  %11845 = vmatpush3.bf16.msra.mxu0 %v13644_v4 }
 0xc8d   :  { %11846 = vmatprep.subr.bf16.mxu0 %v13740_v34 }
 0xc90   :  { %11848 = vmatpush3.bf16.msra.mxu0 %v13654_v28 }
 0xc91   :  { %11849 = vmatprep.subr.bf16.mxu0 %v13740_v34 }
 0xd36   :  { %v8690_v29 = vpop.f32.mrb[76].mxu1 }
 0xd37   :  { %v11454_v62 = vpop.f32.mrb[77].mxu1 }
 0xd3e   :  { %v8579_v55 = vpop.f32.mrb[50].mxu0 }
 0xd3f   :  { %v8580_v52 = vadd.f32 %v8579_v55, %v13609_v18  ;;  %v11435_v33 = vpop.f32.mrb[51].mxu0 }
 0xd41   :  { %v8691_v43 = vadd.f32 %v8690_v29, %v8580_v52 }
 0xd46   :  { %v8859_v42 = vpop.f32.mrb[78].mxu1 }
 0xd47   :  { %v11492_v15 = vpop.f32.mrb[79].mxu1 }
 0xd4e   :  { %v8778_v25 = vpop.f32.mrb[52].mxu0 }
 0xd4f   :  { %v8779_v16 = vadd.f32 %v8778_v25, %v8691_v43  ;;  %v11473_v38 = vpop.f32.mrb[53].mxu0 }
 0xd51   :  { %v8860_v31 = vadd.f32 %v8859_v42, %v8779_v16 }
 0xd56   :  { %v9033_v41 = vpop.f32.mrb[80].mxu1 }
 0xd57   :  { %v11530_v51 = vpop.f32.mrb[81].mxu1 }
 0xd5e   :  { %v8954_v7 = vpop.f32.mrb[54].mxu0 }
 0xd5f   :  { %v8955_v61 = vadd.f32 %v8954_v7, %v8860_v31  ;;  %v11511_v35 = vpop.f32.mrb[55].mxu0 }
 0xd61   :  { %v9034_v47 = vadd.f32 %v9033_v41, %v8955_v61 }
 0xd63   :  { %v9041_v10 = vadd.f32 %v10115_v27, %v9034_v47 }
 0xd65   :  { %v9042_v53 = vmax.f32 %v9041_v10, 0.0 }
 0xd67   :  { %v9049_v14 = vsel %vm9047_vm1, %v9042_v53, 0 }
 0xd68   :  { %v9120_v36 = vand.u32 4294901760, %v9049_v14 }
 0xd6a   :  { %v9121_v21 = vsub.f32 %v9049_v14, %v9120_v36 }
 0xd6c   :  { %v9122_v18 = vand.u32 4294901760, %v9121_v21 }
 0xd6e   :  { %v9123_v6 = vsub.f32 %v9121_v21, %v9122_v18 }
 0xd70   :  { %v9124_v8 = vand.u32 4294901760, %v9123_v6 }
 0xd72   :  { %11540 = vmatmul.mubr.f32.vlgmr.msra.gmra.mrb[56].mxu0 %v9124_v8 }
 0xd73   :  { %11851 = vmatpush3.bf16.msra.mxu0 %v11850_v54  ;;  %11550 = vmatprep.mubr.msk.f32.mxu0 %vm12220_vm0, %v13739_v48 }
 0xd74   :  { %11852 = vmatprep.subr.bf16.mxu0 %v13740_v34 }
 0xd77   :  { %11854 = vmatpush3.bf16.msra.mxu0 %v11853_v58 }
 0xd78   :  { %11855 = vmatprep.subr.bf16.mxu0 %v13740_v34 }
 0xd7a   :  { %11551 = vmatmul.mubr.f32.vlgmr.msra.gmra.mrb[56].mxu0 %v9120_v36 }
 0xd7b   :  { %11857 = vmatpush3.bf16.msra.mxu0 %v11856_v9  ;;  %11561 = vmatprep.mubr.msk.f32.mxu0 %vm12220_vm0, %v13739_v48 }
 0xd7c   :  { %11858 = vmatprep.subr.bf16.mxu0 %v13740_v34 }
 0xd7f   :  { %11860 = vmatpush3.bf16.msra.mxu0 %v11859_v19 }
 0xd80   :  { %11861 = vmatprep.subr.bf16.mxu0 %v13740_v34 }
 0xd82   :  { %11562 = vmatmul.mubr.f32.vlgmr.msra.gmra.mrb[56].mxu0 %v9121_v21 }
 0xd83   :  { %11863 = vmatpush3.bf16.msra.mxu0 %v13644_v4  ;;  %11572 = vmatprep.mubr.msk.f32.mxu0 %vm12220_vm0, %v13739_v48 }
 0xd84   :  { %11864 = vmatprep.subr.bf16.mxu0 %v13740_v34 }
 0xd87   :  { %11866 = vmatpush3.bf16.msra.mxu0 %v13654_v28 }
 0xd88   :  { %11867 = vmatprep.subr.bf16.mxu0 %v13740_v34 }
 0xd8a   :  { %11573 = vmatmul.mubr.f32.vlgmr.msra.gmra.mrb[56].mxu0 %v9122_v18 }
 0xd8b   :  { %11869 = vmatpush3.bf16.msra.mxu0 %v11868_v56  ;;  %11583 = vmatprep.mubr.msk.f32.mxu0 %vm12220_vm0, %v13739_v48 }
 0xd8c   :  { %11870 = vmatprep.subr.bf16.mxu0 %v13740_v34 }
 0xd8f   :  { %11872 = vmatpush3.bf16.msra.mxu0 %v11871_v2 }
 0xd90   :  { %11873 = vmatprep.subr.bf16.mxu0 %v13740_v34 }
 0xd92   :  { %11584 = vmatmul.mubr.f32.vlgmr.msra.gmra.mrb[56].mxu0 %v9120_v36 }
 0xd93   :  { %11875 = vmatpush3.bf16.msra.mxu0 %v13644_v4  ;;  %11594 = vmatprep.mubr.msk.f32.mxu0 %vm12220_vm0, %v13739_v48  ;;  %v10116_v4 = vld [vmem:[#allocation5 + $0xf0] ss:$0 sm:$0xff] }
 0xd94   :  { %11876 = vmatprep.subr.bf16.mxu0 %v13740_v34  ;;  %v9614_v34 = vsub.f32 %v9612_v57, %v9613_v60 }
 0xd96   :  { %v9615_v37 = vand.u32 4294901760, %v9614_v34 }
 0xd97   :  { %11878 = vmatpush3.bf16.msra.mxu0 %v13654_v28 }
 0xd9a   :  { %11595 = vmatmul.mubr.f32.vlgmr.msra.gmra.mrb[56].mxu0 %v9120_v36 }
 0xe6d   :  { %v9532_v22 = vpop.f32.mrb[56].mxu0 }
 0xe6e   :  { %v11887_v12 = vadd.f32 %v10116_v4, %v9532_v22  ;;  %v11596_v59 = vpop.f32.mrb[57].mxu0 }
 0xe70   :  { %v9546_v23 = vand.u32 4294901760, %v11887_v12 }
 0xe72   :  { %v9623_v50 = vsub.f32 %v11887_v12, %v9546_v23  ;;  %11598 = vmatpush3.msra.mxu1 %v9546_v23 }
 0xe73   :  { %11600 = vmatmul.mubr.f32.vlgmr.msra.gmra.mrb[82].mxu1 %v9615_v37  ;;  %11602 = vmatprep.subr.mxu1 %v13739_v48 }
 0xe74   :  { %v9624_v3 = vand.u32 4294901760, %v9623_v50  ;;  %11604 = vmatprep.mubr.msk.f32.mxu1 %vm12220_vm0, %v13739_v48 }
 0xe76   :  { %v9625_v5 = vsub.f32 %v9623_v50, %v9624_v3 }
 0xe78   :  { %v9626_v1 = vand.u32 4294901760, %v9625_v5 }
 0xe7a   :  { %11603 = vmatpush3.msra.mxu1 %v9626_v1 }
 0xe7b   :  { %11605 = vmatmul.mubr.msk.f32.vlgmr.msra.gmra.mrb[82].mxu1 %vm1726_vm8, %v10117_v11  ;;  %11607 = vmatprep.subr.mxu1 %v13739_v48 }
 0xe7c   :  { %11608 = vmatpush3.msra.mxu1 %v9623_v50  ;;  %11609 = vmatprep.mubr.msk.f32.mxu1 %vm12220_vm0, %v13739_v48 }
 0xe7d   :  { %11612 = vmatprep.subr.mxu1 %v13739_v48 }
 0xe83   :  { %11610 = vmatmul.mubr.f32.vlgmr.msra.gmra.mrb[82].mxu1 %v9612_v57 }
 0xe84   :  { %11613 = vmatpush3.msra.mxu1 %v9546_v23  ;;  %11614 = vmatprep.mubr.msk.f32.mxu1 %vm12220_vm0, %v13739_v48 }
 0xe85   :  { %11617 = vmatprep.subr.mxu1 %v13739_v48 }
 0xe8b   :  { %11615 = vmatmul.mubr.f32.vlgmr.msra.gmra.mrb[82].mxu1 %v9613_v60 }
 0xe8c   :  { %11618 = vmatpush3.msra.mxu1 %v9624_v3  ;;  %11619 = vmatprep.mubr.msk.f32.mxu1 %vm12220_vm0, %v13739_v48 }
 0xe8d   :  { %11622 = vmatprep.subr.mxu1 %v13739_v48 }
 0xe93   :  { %11620 = vmatmul.mubr.msk.f32.vlgmr.msra.gmra.mrb[82].mxu1 %vm1726_vm8, %v10117_v11 }
 0xe94   :  { %11623 = vmatpush3.msra.mxu1 %v9546_v23  ;;  %11624 = vmatprep.mubr.msk.f32.mxu1 %vm12220_vm0, %v13739_v48 }
 0xe9b   :  { %11625 = vmatmul.mubr.msk.f32.vlgmr.msra.gmra.mrb[82].mxu1 %vm1726_vm8, %v10117_v11 }
 0xf6e   :  { %v9987_v63 = vpop.f32.mrb[82].mxu1 }
 0xf6f   :  { %9991 = vst [vmem:[#allocation8] sm:$0xff] %v9987_v63  ;;  %v11626_v28 = vpop.f32.mrb[83].mxu1 }
 0xf70   :  { %12198 = shalt.err (!%p12195_p3)
}
 0xf71   :  { %s12199_s24 = scalar_lea.hbm %s13730_s6, 128 }
 0xf72   :  { %p12200_p4 = scmp.ne.s32.totalorder %s13730_s6, %s12199_s24  ;;  %p12203_p5 = scmp.lt.u32.totalorder %s12199_s24, %s13730_s6 }
 0xf74   :  { %p12205_p6 = pnand %p12203_p5, %p12200_p4 }
 0xf76   :  { %12208 = shalt.err (!%p12205_p6)
}
 0xf77   :  { %10001 = dma.vmem_to_hbm [thread:$0]  %s9999_s20, 128, %s13730_s6, [#allocation7]  }
 0xf78   :  { %12213 = dma.done.wait [#allocation7], 128  }
 0xf79   :  { %12214 = vsyncadd [#allocation7], 4294967168 }
 0xf7a   :  { %10005 = vsyncpa [#allocation6], 1 }
 0xf7b   :  { %10006 = vsyncpa [#allocation7], 1 }

</bundles_post_ra>
